<compile_context>
chip_gen: v7x
topology: tpu7x:2x2x1
jax: 0.10.0
libtpu: 0.0.40
codegen_flags: <defaults>
</compile_context>

<pallas_src>
import functools

import jax
import jax.numpy as jnp
from jax.experimental import pallas as pl
from jax.experimental.pallas import tpu as pltpu


def _round_up(x, m):
    return (x + m - 1) // m * m


def _residual_block_kernel(x_ref, w1_ref, s1_ref, b1_ref, w2_ref, s2_ref,
                           b2_ref, o_ref, *scratch,
                           Cip, Cop, Ho1, Wo1, Ho2, Wo2, stride, dilation,
                           padding, use_1x1, tb1, tb2, ow, Hm, Wm):
    """Fused conv1+BN1+ReLU -> conv2+BN2 -> (+shortcut) -> ReLU.

    One batch element per grid step.  Each 3x3 conv is a row-banded im2col
    matmul (K = 9*C); the intermediate activation lives in the bf16 VMEM
    scratch `mid_ref` and never touches HBM.  When use_1x1, the 1x1 shortcut
    is fused into conv1's matmul (extra Cop output columns, centre-tap rows).
    """
    if use_1x1:
        mid_ref, sc_ref = scratch
    else:
        (mid_ref,) = scratch
        sc_ref = None
    d, p = dilation, padding

    # -- clear only the zero-padding border strips of `mid`; the interior is
    #    fully overwritten below (safe under any grid/core partitioning) --
    if p > 0:
        mid_ref[0:p, :, :] = jnp.zeros((p, Wm, Cop), jnp.bfloat16)
        mid_ref[p + Ho1:Hm, :, :] = jnp.zeros((Hm - p - Ho1, Wm, Cop),
                                              jnp.bfloat16)
    if ow > 0:
        mid_ref[p:p + Ho1, 0:ow, :] = jnp.zeros((Ho1, ow, Cop), jnp.bfloat16)
    if Wm - ow - Wo1 > 0:
        mid_ref[p:p + Ho1, ow + Wo1:Wm, :] = jnp.zeros(
            (Ho1, Wm - ow - Wo1, Cop), jnp.bfloat16)

    def im2col(band, nrows, wout, cin, s, col0):
        """(rows, width, cin) bf16 band -> (nrows*wout, 9*cin) bf16 patches."""
        taps = []
        for kh in range(3):
            for kw in range(3):
                r0, c0 = kh * d, col0 + kw * d
                if s == 1:
                    t = jax.lax.slice(band, (r0, c0, 0),
                                      (r0 + nrows, c0 + wout, cin))
                else:
                    t = jax.lax.slice(
                        band, (r0, c0, 0),
                        (r0 + s * (nrows - 1) + 1,
                         c0 + s * (wout - 1) + 1, cin),
                        (s, s, 1))
                taps.append(t.reshape(nrows * wout, cin))
        return jnp.concatenate(taps, axis=-1)          # lane-dim concat, bf16

    # ------- phase A: conv1 + BN1 + ReLU (+ fused 1x1 shortcut), banded -----
    def conv1_band(r0, nrows):
        lr = stride * (nrows - 1) + 1 + 2 * d
        xband = x_ref[pl.ds(r0 * stride, lr), :, :]    # bf16, no upcast
        patches = im2col(xband, nrows, Wo1, Cip, stride, 0)
        acc = jnp.dot(patches, w1_ref[...],
                      preferred_element_type=jnp.float32)
        acc = acc * s1_ref[...] + b1_ref[...]          # f32 epilogue
        a1 = jnp.maximum(acc[:, :Cop], 0.0).astype(jnp.bfloat16)
        mid_ref[pl.ds(p + r0, nrows), ow:ow + Wo1, :] = a1.reshape(
            nrows, Wo1, Cop)
        if use_1x1:
            # shortcut = centre-tap columns of the fused matmul (already +b3)
            sc_ref[pl.ds(r0, nrows), :, :] = acc[:, Cop:].reshape(
                nrows, Wo1, Cop)

    nb1, tr1 = Ho1 // tb1, Ho1 % tb1
    if nb1 > 0:
        @pl.loop(0, nb1)
        def _(b):
            conv1_band(b * tb1, tb1)
    if tr1 > 0:
        conv1_band(nb1 * tb1, tr1)

    # ------- phase B: conv2 + BN2 + shortcut + ReLU, banded ------------------
    def conv2_band(r0, nrows):
        mband = mid_ref[pl.ds(r0, nrows + 2 * d), :, :]   # bf16 scratch read
        patches = im2col(mband, nrows, Wo2, Cop, 1, ow - p)
        acc = jnp.dot(patches, w2_ref[...],
                      preferred_element_type=jnp.float32)
        acc = acc * s2_ref[...] + b2_ref[...]
        if use_1x1:
            sc = sc_ref[pl.ds(r0, nrows), :, :].reshape(nrows * Wo2, Cop)
        else:
            xs = x_ref[pl.ds(p + r0, nrows), p:p + Wo2, :]
            sc = xs.astype(jnp.float32).reshape(nrows * Wo2, Cip)
        out = jnp.maximum(acc + sc, 0.0).astype(o_ref.dtype)
        o_ref[pl.ds(r0, nrows), :, :] = out.reshape(nrows, Wo2, Cop)

    nb2, tr2 = Ho2 // tb2, Ho2 % tb2
    if nb2 > 0:
        @pl.loop(0, nb2)
        def _(b):
            conv2_band(b * tb2, tb2)
    if tr2 > 0:
        conv2_band(nb2 * tb2, tr2)


def _fused_residual_block(x_pad, w1, s1, b1, w2, s2, b2, *, Cop, stride,
                          dilation, padding, use_1x1, band_rows=None):
    """Launch the fused kernel.  x_pad: NHWC, spatially + channel padded, bf16."""
    N, Hp, Wp, Cip = x_pad.shape
    d, p = dilation, padding
    Ho1 = (Hp - 2 * d - 1) // stride + 1
    Wo1 = (Wp - 2 * d - 1) // stride + 1
    Ho2 = Ho1 + 2 * p - 2 * d
    Wo2 = Wo1 + 2 * p - 2 * d
    n1 = w1.shape[1]                    # Cop, or 2*Cop when the 1x1 is fused

    ow = _round_up(p, 16) if p > 0 else 0   # bf16 sublane(16)-aligned start
    Hm = Ho1 + 2 * p
    Wm = ow + Wo1 + p

    def pick_band(ho, wo, cin):
        if band_rows is not None:
            return max(1, min(band_rows, ho))
        rows = max(4, (2 << 20) // max(wo * 9 * cin * 2, 1))   # ~2 MiB patches
        return max(1, min(ho, rows))

    tb1 = pick_band(Ho1, Wo1, Cip)
    tb2 = pick_band(Ho2, Wo2, Cop)

    kernel = functools.partial(
        _residual_block_kernel, Cip=Cip, Cop=Cop, Ho1=Ho1, Wo1=Wo1, Ho2=Ho2,
        Wo2=Wo2, stride=stride, dilation=d, padding=p, use_1x1=use_1x1,
        tb1=tb1, tb2=tb2, ow=ow, Hm=Hm, Wm=Wm)

    in_specs = [
        pl.BlockSpec((None, Hp, Wp, Cip), lambda n: (n, 0, 0, 0)),  # x
        pl.BlockSpec((9 * Cip, n1), lambda n: (0, 0)),              # w1 [| w3]
        pl.BlockSpec((1, n1), lambda n: (0, 0)),                    # s1 [| 1]
        pl.BlockSpec((1, n1), lambda n: (0, 0)),                    # b1 [| b3]
        pl.BlockSpec((9 * Cop, Cop), lambda n: (0, 0)),             # w2
        pl.BlockSpec((1, Cop), lambda n: (0, 0)),                   # s2
        pl.BlockSpec((1, Cop), lambda n: (0, 0)),                   # b2
    ]
    scratch = [pltpu.VMEM((Hm, Wm, Cop), jnp.bfloat16)]             # mid (bf16)
    if use_1x1:
        scratch.append(pltpu.VMEM((Ho2, Wo2, Cop), jnp.float32))    # shortcut

    # Per-step VMEM footprint -> explicit scoped-VMEM budget (with headroom).
    est = 2 * Hp * Wp * Cip * 2                      # x block (double buffered)
    est += 2 * Ho2 * Wo2 * Cop * 2                   # out block (double buffered)
    est += 2 * ((9 * Cip * n1 + 9 * Cop * Cop) * 2 + (2 * n1 + 2 * Cop) * 4)
    est += Hm * Wm * Cop * 2                         # mid scratch
    if use_1x1:
        est += Ho2 * Wo2 * Cop * 4                   # shortcut scratch
    band = max(
        tb1 * Wo1 * (9 * Cip * 2 + 2 * n1 * 4)
        + (stride * (tb1 - 1) + 1 + 2 * d) * Wp * Cip * 2,
        tb2 * Wo2 * (9 * Cop * 2 + 2 * Cop * 4) + (tb2 + 2 * d) * Wm * Cop * 2)
    est += 2 * band                                  # im2col patches + accum
    vmem_limit = int(min(64 << 20, max(16 << 20, 2 * est)))

    flops = 2 * N * (Ho1 * Wo1 * 9 * Cip * n1 + Ho2 * Wo2 * 9 * Cop * Cop)
    bytes_accessed = (int(x_pad.size) * 2
                      + sum(int(a.size) * a.dtype.itemsize
                            for a in (w1, s1, b1, w2, s2, b2))
                      + N * Ho2 * Wo2 * Cop * 2)

    return pl.pallas_call(
        kernel,
        out_shape=jax.ShapeDtypeStruct((N, Ho2, Wo2, Cop), jnp.bfloat16),
        grid=(N,),
        in_specs=in_specs,
        out_specs=pl.BlockSpec((None, Ho2, Wo2, Cop), lambda n: (n, 0, 0, 0)),
        scratch_shapes=scratch,
        compiler_params=pltpu.CompilerParams(
            dimension_semantics=("parallel",),
            vmem_limit_bytes=vmem_limit),
        cost_estimate=pl.CostEstimate(
            flops=flops, transcendentals=0, bytes_accessed=bytes_accessed),
    )(x_pad, w1, s1, b1, w2, s2, b2)


class ResidualBlockPallas:
    """JAX/Pallas port of REDCPNet ResidualBlock (eval-mode BatchNorm)."""

    LANE = 128

    def __init__(self, cin, cout, strides=1, dilation=1, padding=1,
                 use_1x1conv=False, dil=False, flag=False, key=None,
                 band_rows=None):
        if dil and flag:
            dilation, padding = 5, 5
        if dil and not flag:
            dilation, padding = 2, 2
        self.cin, self.cout = cin, cout
        self.stride, self.dilation, self.padding = strides, dilation, padding
        self.use_1x1 = use_1x1conv
        self.band_rows = band_rows
        self.cip = _round_up(cin, self.LANE)
        self.cop = _round_up(cout, self.LANE)
        if use_1x1conv and padding != dilation:
            # Centre-tap fusion of the 1x1 shortcut needs padding == dilation
            # (the residual add itself also requires it for matching shapes).
            raise ValueError("use_1x1conv requires padding == dilation")

        if key is None:
            key = jax.random.PRNGKey(42)
        ks = jax.random.split(key, 6)
        eps = 1e-5

        def conv_init(k, kh, kw, ci, co):
            fan_in = kh * kw * ci
            bound = 1.0 / (fan_in ** 0.5)
            kw_, kb_ = jax.random.split(k)
            w = jax.random.uniform(kw_, (kh * kw, ci, co), jnp.float32,
                                   -bound, bound)
            b = jax.random.uniform(kb_, (co,), jnp.float32, -bound, bound)
            return w, b

        def bn_init(k, co):
            k1, k2, k3, k4 = jax.random.split(k, 4)
            gamma = 1.0 + 0.1 * jax.random.normal(k1, (co,), jnp.float32)
            beta = 0.1 * jax.random.normal(k2, (co,), jnp.float32)
            mean = 0.1 * jax.random.normal(k3, (co,), jnp.float32)
            var = jax.random.uniform(k4, (co,), jnp.float32, 0.5, 1.5)
            return gamma, beta, mean, var

        def fold_bn(bias, gamma, beta, mean, var):
            s = gamma / jnp.sqrt(var + eps)
            return s, beta + (bias - mean) * s

        def pad_cols(v, co, cop):
            return jnp.zeros((1, cop), jnp.float32).at[0, :co].set(v)

        def im2col_w(w, ci, co, cip, cop):
            kk = w.shape[0]
            wp = jnp.zeros((kk, cip, cop), jnp.float32).at[:, :ci, :co].set(w)
            return wp.reshape(kk * cip, cop)

        # conv1 + bn1 (folded)
        self.w1, b1c = conv_init(ks[0], 3, 3, cin, cout)
        g, be, m, v = bn_init(ks[1], cout)
        self.s1, self.b1 = fold_bn(b1c, g, be, m, v)
        # conv2 + bn2 (folded)
        self.w2, b2c = conv_init(ks[2], 3, 3, cout, cout)
        g, be, m, v = bn_init(ks[3], cout)
        self.s2, self.b2 = fold_bn(b2c, g, be, m, v)
        if use_1x1conv:
            self.w3, self.b3 = conv_init(ks[4], 1, 1, cin, cout)

        # ---- kernel-side packed params (lane-dense; bf16 weights, f32 s/b) --
        w1_f = im2col_w(self.w1, cin, cout, self.cip, self.cop)
        if use_1x1conv:
            # Fuse the 1x1 shortcut into conv1's matmul: w3 sits in the
            # centre-tap rows (tap index 4 of the 3x3), extra Cop columns.
            w3_pad = jnp.zeros((self.cip, self.cop),
                               jnp.float32).at[:cin, :cout].set(self.w3[0])
            w3_f = jnp.zeros((9 * self.cip, self.cop), jnp.float32)
            w3_f = w3_f.at[4 * self.cip:5 * self.cip, :].set(w3_pad)
            self.w1_k = jnp.concatenate([w1_f, w3_f], axis=1).astype(
                jnp.bfloat16)                                     # (9Cip, 2Cop)
            self.s1_k = jnp.concatenate(
                [pad_cols(self.s1, cout, self.cop),
                 jnp.ones((1, self.cop), jnp.float32)], axis=1)
            self.b1_k = jnp.concatenate(
                [pad_cols(self.b1, cout, self.cop),
                 pad_cols(self.b3, cout, self.cop)], axis=1)
        else:
            self.w1_k = w1_f.astype(jnp.bfloat16)                 # (9Cip, Cop)
            self.s1_k = pad_cols(self.s1, cout, self.cop)
            self.b1_k = pad_cols(self.b1, cout, self.cop)
        self.w2_k = im2col_w(self.w2, cout, cout, self.cop,
                             self.cop).astype(jnp.bfloat16)       # (9Cop, Cop)
        self.s2_k = pad_cols(self.s2, cout, self.cop)
        self.b2_k = pad_cols(self.b2, cout, self.cop)

    # ---------------- NHWC-resident fast path (no NCHW transposes) ----------
    def pad_input_nhwc(self, x_nhwc):
        """NHWC (true channels) -> spatially + channel padded bf16 NHWC."""
        p = self.padding
        x = jnp.pad(x_nhwc, ((0, 0), (p, p), (p, p),
                             (0, self.cip - x_nhwc.shape[-1])))
        return x.astype(jnp.bfloat16)

    def apply_padded_nhwc(self, x_pad):
        """Input already padded NHWC bf16; returns channel-padded NHWC bf16.
        Chained blocks only need a spatial re-pad between calls."""
        return _fused_residual_block(
            x_pad, self.w1_k, self.s1_k, self.b1_k,
            self.w2_k, self.s2_k, self.b2_k,
            Cop=self.cop, stride=self.stride, dilation=self.dilation,
            padding=self.padding, use_1x1=self.use_1x1,
            band_rows=self.band_rows)

    # ---------------- NCHW drop-in contract ---------------------------------
    def __call__(self, x_nchw):
        N, C, H, W = x_nchw.shape
        assert C == self.cin
        p, d, s = self.padding, self.dilation, self.stride
        if not self.use_1x1:
            Ho1 = (H + 2 * p - 2 * d - 1) // s + 1
            Wo1 = (W + 2 * p - 2 * d - 1) // s + 1
            Ho2 = Ho1 + 2 * p - 2 * d
            Wo2 = Wo1 + 2 * p - 2 * d
            if self.cin != self.cout or Ho2 != H or Wo2 != W:
                raise ValueError("identity shortcut shape mismatch; "
                                 "use use_1x1conv=True")
        x = jnp.transpose(x_nchw, (0, 2, 3, 1))
        y = self.apply_padded_nhwc(self.pad_input_nhwc(x))
        y = y[..., :self.cout].astype(x_nchw.dtype)   # drop padded channels
        return jnp.transpose(y, (0, 3, 1, 2))

    # Pure-JAX (XLA conv) reference mirroring kernel precision
    # (bf16 operands, bf16 a1, f32 accumulation/epilogue, bf16 output).
    def reference(self, x_nchw):
        f32 = jnp.float32

        def q(a):
            return a.astype(jnp.bfloat16).astype(f32)

        def conv(inp, w, kh, kw, ci, co, stride, padding, dilation):
            w4 = q(w.reshape(kh, kw, ci, co))
            return jax.lax.conv_general_dilated(
                inp, w4, (stride, stride),
                ((padding, padding), (padding, padding)),
                rhs_dilation=(dilation, dilation),
                dimension_numbers=("NHWC", "HWIO", "NHWC"))

        x = q(jnp.transpose(x_nchw, (0, 2, 3, 1)))
        a1 = jax.nn.relu(
            conv(x, self.w1, 3, 3, self.cin, self.cout, self.stride,
                 self.padding, self.dilation) * self.s1 + self.b1)
        a1 = q(a1)
        out = conv(a1, self.w2, 3, 3, self.cout, self.cout, 1,
                   self.padding, self.dilation) * self.s2 + self.b2
        if self.use_1x1:
            sc = conv(x, self.w3, 1, 1, self.cin, self.cout, self.stride,
                      0, 1) + self.b3
        else:
            sc = x
        out = q(jax.nn.relu(out + sc))              # kernel emits bf16 output
        return jnp.transpose(out, (0, 3, 1, 2))


if __name__ == "__main__":
    key = jax.random.PRNGKey(0)
    kx, kp1, kp2, kp3 = jax.random.split(key, 4)

    N, C, H, W = 2, 4, 16, 16
    x = jax.random.normal(kx, (N, C, H, W), jnp.float32)

    # Kernel emits bf16; the reference is quantised the same way, so the
    # tolerance only has to cover one bf16 ULP (rounding-boundary straddles
    # from f32 accumulation-order differences) -> rtol/atol 2e-2.
    def check(name, blk, xin, out_c):
        y = jax.block_until_ready(jax.jit(lambda a: blk(a))(xin))
        assert y.shape == (xin.shape[0], out_c, H, W), (name, y.shape)
        ref = blk.reference(xin)
        err = float(jnp.max(jnp.abs(y - ref)))
        assert bool(jnp.allclose(y, ref, rtol=2e-2, atol=2e-2)), \
            f"{name}: max abs error {err}"
        return y

    # 1) identity shortcut, banded path (2 full row-bands of 8)
    blk1 = ResidualBlockPallas(C, C, strides=1, use_1x1conv=False,
                               key=kp1, band_rows=8)
    y1 = check("identity", blk1, x, C)

    # NHWC-resident fast path (no NCHW transposes) matches the NCHW wrapper.
    xp = blk1.pad_input_nhwc(jnp.transpose(x, (0, 2, 3, 1)))
    y1f = jax.block_until_ready(jax.jit(blk1.apply_padded_nhwc)(xp))
    y1f = jnp.transpose(y1f[..., :C].astype(jnp.float32), (0, 3, 1, 2))
    assert float(jnp.max(jnp.abs(y1f - y1))) < 1e-6

    # 2) 1x1-conv shortcut K-fused into conv1's matmul, cin != cout,
    #    auto band size (single band).
    blk2 = ResidualBlockPallas(C, 8, strides=1, use_1x1conv=True, key=kp2)
    check("1x1-shortcut", blk2, x, 8)

    # 3) dilated variant (dil=True -> dilation=2, padding=2); band of 6 rows
    #    exercises the ragged tail (2 full bands + tail of 4).
    blk3 = ResidualBlockPallas(C, C, strides=1, dil=True, key=kp3, band_rows=6)
    check("dilated", blk3, x, C)

    print("KERNEL_OK")
</pallas_src>

<mosaic_0001>
module attributes {stable_mosaic.version = 11 : i64} {
  func.func @_residual_block_kernel(%arg0: i32, %arg1: memref<1x18x18x128xbf16, #tpu.memory_space<vmem>>, %arg2: memref<1152x128xbf16, #tpu.memory_space<vmem>>, %arg3: memref<1x128xf32, #tpu.memory_space<vmem>>, %arg4: memref<1x128xf32, #tpu.memory_space<vmem>>, %arg5: memref<1152x128xbf16, #tpu.memory_space<vmem>>, %arg6: memref<1x128xf32, #tpu.memory_space<vmem>>, %arg7: memref<1x128xf32, #tpu.memory_space<vmem>>, %arg8: memref<1x16x16x128xbf16, #tpu.memory_space<vmem>>, %arg9: memref<18x33x128xbf16, #tpu.memory_space<vmem>>) attributes {dimension_semantics = [#tpu.dimension_semantics<parallel>], iteration_bounds = array<i64: 2>, scalar_prefetch = 0 : i64, scratch_operands = 1 : i64, tpu.core_type = #tpu.core_type<tc>, window_params = [{transform_indices = @transform_0, window_bounds = array<i64: 1, 18, 18, 128>}, {pipeline_mode = #tpu.pipeline_mode<synchronous>, transform_indices = @transform_1, window_bounds = array<i64: 1152, 128>}, {pipeline_mode = #tpu.pipeline_mode<synchronous>, transform_indices = @transform_2, window_bounds = array<i64: 1, 128>}, {pipeline_mode = #tpu.pipeline_mode<synchronous>, transform_indices = @transform_3, window_bounds = array<i64: 1, 128>}, {pipeline_mode = #tpu.pipeline_mode<synchronous>, transform_indices = @transform_4, window_bounds = array<i64: 1152, 128>}, {pipeline_mode = #tpu.pipeline_mode<synchronous>, transform_indices = @transform_5, window_bounds = array<i64: 1, 128>}, {pipeline_mode = #tpu.pipeline_mode<synchronous>, transform_indices = @transform_6, window_bounds = array<i64: 1, 128>}, {transform_indices = @transform_7, window_bounds = array<i64: 1, 16, 16, 128>}]} {
    %cst = arith.constant 0.000000e+00 : bf16
    %0 = vector.broadcast %cst : bf16 to vector<1x33x128xbf16>
    %c0 = arith.constant 0 : index
    %c0_0 = arith.constant 0 : index
    %c0_1 = arith.constant 0 : index
    %1 = vector.load %arg9[%c0, %c0_0, %c0_1] : memref<18x33x128xbf16, #tpu.memory_space<vmem>>, vector<1x33x128xbf16>
    tpu.vector_store %arg9[%c0, %c0_0, %c0_1], %0 {strides = array<i32>} : memref<18x33x128xbf16, #tpu.memory_space<vmem>>, vector<1x33x128xbf16>,
    %cst_2 = arith.constant 0.000000e+00 : bf16
    %2 = vector.broadcast %cst_2 : bf16 to vector<1x33x128xbf16>
    %c17 = arith.constant 17 : index
    %c0_3 = arith.constant 0 : index
    %c0_4 = arith.constant 0 : index
    %3 = vector.load %arg9[%c17, %c0_3, %c0_4] : memref<18x33x128xbf16, #tpu.memory_space<vmem>>, vector<1x33x128xbf16>
    tpu.vector_store %arg9[%c17, %c0_3, %c0_4], %2 {strides = array<i32>} : memref<18x33x128xbf16, #tpu.memory_space<vmem>>, vector<1x33x128xbf16>,
    %cst_5 = arith.constant 0.000000e+00 : bf16
    %4 = vector.broadcast %cst_5 : bf16 to vector<16x16x128xbf16>
    %c1 = arith.constant 1 : index
    %c0_6 = arith.constant 0 : index
    %c0_7 = arith.constant 0 : index
    %5 = vector.load %arg9[%c1, %c0_6, %c0_7] : memref<18x33x128xbf16, #tpu.memory_space<vmem>>, vector<16x16x128xbf16>
    tpu.vector_store %arg9[%c1, %c0_6, %c0_7], %4 {strides = array<i32>} : memref<18x33x128xbf16, #tpu.memory_space<vmem>>, vector<16x16x128xbf16>,
    %cst_8 = arith.constant 0.000000e+00 : bf16
    %6 = vector.broadcast %cst_8 : bf16 to vector<16x1x128xbf16>
    %c1_9 = arith.constant 1 : index
    %c32 = arith.constant 32 : index
    %c0_10 = arith.constant 0 : index
    %7 = vector.load %arg9[%c1_9, %c32, %c0_10] : memref<18x33x128xbf16, #tpu.memory_space<vmem>>, vector<16x1x128xbf16>
    tpu.vector_store %arg9[%c1_9, %c32, %c0_10], %6 {strides = array<i32>} : memref<18x33x128xbf16, #tpu.memory_space<vmem>>, vector<16x1x128xbf16>,
    %c0_i32 = arith.constant 0 : i32
    %c2_i32 = arith.constant 2 : i32
    %8 = arith.addi %c0_i32, %c2_i32 : i32
    %c1_i32 = arith.constant 1 : i32
    scf.for %arg10 = %c0_i32 to %8 step %c1_i32  : i32 {
      %c1_i32_16 = arith.constant 1 : i32
      %10 = arith.muli %arg10, %c1_i32_16 : i32
      %c0_i32_17 = arith.constant 0 : i32
      %11 = arith.addi %c0_i32_17, %10 : i32
      %c8_i32 = arith.constant 8 : i32
      %12 = arith.muli %11, %c8_i32 : i32
      %c1_i32_18 = arith.constant 1 : i32
      %13 = arith.muli %12, %c1_i32_18 : i32
      %c0_19 = arith.constant 0 : index
      %14 = arith.index_cast %13 : i32 to index
      %c0_20 = arith.constant 0 : index
      %c0_21 = arith.constant 0 : index
      %15 = vector.load %arg1[%c0_19, %14, %c0_20, %c0_21] : memref<1x18x18x128xbf16, #tpu.memory_space<vmem>>, vector<1x10x18x128xbf16>
      %16 = vector.shape_cast %15 : vector<1x10x18x128xbf16> to vector<10x18x128xbf16>
      %17 = vector.extract_strided_slice %16 {offsets = [0, 0, 0], sizes = [8, 16, 128], strides = [1, 1, 1]} : vector<10x18x128xbf16> to vector<8x16x128xbf16>
      %18 = vector.shape_cast %17 : vector<8x16x128xbf16> to vector<128x128xbf16>
      %19 = vector.extract_strided_slice %16 {offsets = [0, 1, 0], sizes = [8, 16, 128], strides = [1, 1, 1]} : vector<10x18x128xbf16> to vector<8x16x128xbf16>
      %20 = vector.shape_cast %19 : vector<8x16x128xbf16> to vector<128x128xbf16>
      %21 = vector.extract_strided_slice %16 {offsets = [0, 2, 0], sizes = [8, 16, 128], strides = [1, 1, 1]} : vector<10x18x128xbf16> to vector<8x16x128xbf16>
      %22 = vector.shape_cast %21 : vector<8x16x128xbf16> to vector<128x128xbf16>
      %23 = vector.extract_strided_slice %16 {offsets = [1, 0, 0], sizes = [8, 16, 128], strides = [1, 1, 1]} : vector<10x18x128xbf16> to vector<8x16x128xbf16>
      %24 = vector.shape_cast %23 : vector<8x16x128xbf16> to vector<128x128xbf16>
      %25 = vector.extract_strided_slice %16 {offsets = [1, 1, 0], sizes = [8, 16, 128], strides = [1, 1, 1]} : vector<10x18x128xbf16> to vector<8x16x128xbf16>
      %26 = vector.shape_cast %25 : vector<8x16x128xbf16> to vector<128x128xbf16>
      %27 = vector.extract_strided_slice %16 {offsets = [1, 2, 0], sizes = [8, 16, 128], strides = [1, 1, 1]} : vector<10x18x128xbf16> to vector<8x16x128xbf16>
      %28 = vector.shape_cast %27 : vector<8x16x128xbf16> to vector<128x128xbf16>
      %29 = vector.extract_strided_slice %16 {offsets = [2, 0, 0], sizes = [8, 16, 128], strides = [1, 1, 1]} : vector<10x18x128xbf16> to vector<8x16x128xbf16>
      %30 = vector.shape_cast %29 : vector<8x16x128xbf16> to vector<128x128xbf16>
      %31 = vector.extract_strided_slice %16 {offsets = [2, 1, 0], sizes = [8, 16, 128], strides = [1, 1, 1]} : vector<10x18x128xbf16> to vector<8x16x128xbf16>
      %32 = vector.shape_cast %31 : vector<8x16x128xbf16> to vector<128x128xbf16>
      %33 = vector.extract_strided_slice %16 {offsets = [2, 2, 0], sizes = [8, 16, 128], strides = [1, 1, 1]} : vector<10x18x128xbf16> to vector<8x16x128xbf16>
      %34 = vector.shape_cast %33 : vector<8x16x128xbf16> to vector<128x128xbf16>
      %35 = tpu.concatenate %18, %20, %22, %24, %26, %28, %30, %32, %34 in 1 : vector<128x128xbf16>, vector<128x128xbf16>, vector<128x128xbf16>, vector<128x128xbf16>, vector<128x128xbf16>, vector<128x128xbf16>, vector<128x128xbf16>, vector<128x128xbf16>, vector<128x128xbf16> -> vector<128x1152xbf16>
      %c0_22 = arith.constant 0 : index
      %c0_23 = arith.constant 0 : index
      %36 = vector.load %arg2[%c0_22, %c0_23] : memref<1152x128xbf16, #tpu.memory_space<vmem>>, vector<1152x128xbf16>
      %cst_24 = arith.constant dense<0.000000e+00> : vector<128x128xf32>
      %37 = tpu.matmul %35, %36, %cst_24 {dimension_numbers = #tpu.dot_dimension_numbers<[1], [0], [0], [1], [0, 0, 1, 1], [], []>} : vector<128x1152xbf16>, vector<1152x128xbf16>, vector<128x128xf32> -> vector<128x128xf32>
      %c0_25 = arith.constant 0 : index
      %c0_26 = arith.constant 0 : index
      %38 = vector.load %arg3[%c0_25, %c0_26] : memref<1x128xf32, #tpu.memory_space<vmem>>, vector<1x128xf32>
      %39 = vector.broadcast %38 : vector<1x128xf32> to vector<128x128xf32>
      %40 = arith.mulf %37, %39 : vector<128x128xf32>
      %c0_27 = arith.constant 0 : index
      %c0_28 = arith.constant 0 : index
      %41 = vector.load %arg4[%c0_27, %c0_28] : memref<1x128xf32, #tpu.memory_space<vmem>>, vector<1x128xf32>
      %42 = vector.broadcast %41 : vector<1x128xf32> to vector<128x128xf32>
      %43 = arith.addf %40, %42 : vector<128x128xf32>
      %cst_29 = arith.constant 0.000000e+00 : f32
      %44 = vector.broadcast %cst_29 : f32 to vector<128x128xf32>
      %45 = arith.maximumf %43, %44 : vector<128x128xf32>
      %46 = arith.truncf %45 : vector<128x128xf32> to vector<128x128xbf16>
      %47 = vector.shape_cast %46 : vector<128x128xbf16> to vector<8x16x128xbf16>
      %c1_i32_30 = arith.constant 1 : i32
      %48 = arith.addi %c1_i32_30, %12 : i32
      %49 = arith.index_cast %48 : i32 to index
      %c16 = arith.constant 16 : index
      %c0_31 = arith.constant 0 : index
      %50 = vector.load %arg9[%49, %c16, %c0_31] : memref<18x33x128xbf16, #tpu.memory_space<vmem>>, vector<8x16x128xbf16>
      tpu.vector_store %arg9[%49, %c16, %c0_31], %47 {strides = array<i32>} : memref<18x33x128xbf16, #tpu.memory_space<vmem>>, vector<8x16x128xbf16>,
    }
    %c2_i32_11 = arith.constant 2 : i32
    %c0_i32_12 = arith.constant 0 : i32
    %c2_i32_13 = arith.constant 2 : i32
    %9 = arith.addi %c0_i32_12, %c2_i32_13 : i32
    %c1_i32_14 = arith.constant 1 : i32
    scf.for %arg10 = %c0_i32_12 to %9 step %c1_i32_14  : i32 {
      %c1_i32_16 = arith.constant 1 : i32
      %10 = arith.muli %arg10, %c1_i32_16 : i32
      %c0_i32_17 = arith.constant 0 : i32
      %11 = arith.addi %c0_i32_17, %10 : i32
      %c8_i32 = arith.constant 8 : i32
      %12 = arith.muli %11, %c8_i32 : i32
      %13 = arith.index_cast %12 : i32 to index
      %c0_18 = arith.constant 0 : index
      %c0_19 = arith.constant 0 : index
      %14 = vector.load %arg9[%13, %c0_18, %c0_19] : memref<18x33x128xbf16, #tpu.memory_space<vmem>>, vector<10x33x128xbf16>
      %15 = vector.extract_strided_slice %14 {offsets = [0, 15, 0], sizes = [8, 16, 128], strides = [1, 1, 1]} : vector<10x33x128xbf16> to vector<8x16x128xbf16>
      %16 = vector.shape_cast %15 : vector<8x16x128xbf16> to vector<128x128xbf16>
      %17 = vector.extract_strided_slice %14 {offsets = [0, 16, 0], sizes = [8, 16, 128], strides = [1, 1, 1]} : vector<10x33x128xbf16> to vector<8x16x128xbf16>
      %18 = vector.shape_cast %17 : vector<8x16x128xbf16> to vector<128x128xbf16>
      %19 = vector.extract_strided_slice %14 {offsets = [0, 17, 0], sizes = [8, 16, 128], strides = [1, 1, 1]} : vector<10x33x128xbf16> to vector<8x16x128xbf16>
      %20 = vector.shape_cast %19 : vector<8x16x128xbf16> to vector<128x128xbf16>
      %21 = vector.extract_strided_slice %14 {offsets = [1, 15, 0], sizes = [8, 16, 128], strides = [1, 1, 1]} : vector<10x33x128xbf16> to vector<8x16x128xbf16>
      %22 = vector.shape_cast %21 : vector<8x16x128xbf16> to vector<128x128xbf16>
      %23 = vector.extract_strided_slice %14 {offsets = [1, 16, 0], sizes = [8, 16, 128], strides = [1, 1, 1]} : vector<10x33x128xbf16> to vector<8x16x128xbf16>
      %24 = vector.shape_cast %23 : vector<8x16x128xbf16> to vector<128x128xbf16>
      %25 = vector.extract_strided_slice %14 {offsets = [1, 17, 0], sizes = [8, 16, 128], strides = [1, 1, 1]} : vector<10x33x128xbf16> to vector<8x16x128xbf16>
      %26 = vector.shape_cast %25 : vector<8x16x128xbf16> to vector<128x128xbf16>
      %27 = vector.extract_strided_slice %14 {offsets = [2, 15, 0], sizes = [8, 16, 128], strides = [1, 1, 1]} : vector<10x33x128xbf16> to vector<8x16x128xbf16>
      %28 = vector.shape_cast %27 : vector<8x16x128xbf16> to vector<128x128xbf16>
      %29 = vector.extract_strided_slice %14 {offsets = [2, 16, 0], sizes = [8, 16, 128], strides = [1, 1, 1]} : vector<10x33x128xbf16> to vector<8x16x128xbf16>
      %30 = vector.shape_cast %29 : vector<8x16x128xbf16> to vector<128x128xbf16>
      %31 = vector.extract_strided_slice %14 {offsets = [2, 17, 0], sizes = [8, 16, 128], strides = [1, 1, 1]} : vector<10x33x128xbf16> to vector<8x16x128xbf16>
      %32 = vector.shape_cast %31 : vector<8x16x128xbf16> to vector<128x128xbf16>
      %33 = tpu.concatenate %16, %18, %20, %22, %24, %26, %28, %30, %32 in 1 : vector<128x128xbf16>, vector<128x128xbf16>, vector<128x128xbf16>, vector<128x128xbf16>, vector<128x128xbf16>, vector<128x128xbf16>, vector<128x128xbf16>, vector<128x128xbf16>, vector<128x128xbf16> -> vector<128x1152xbf16>
      %c0_20 = arith.constant 0 : index
      %c0_21 = arith.constant 0 : index
      %34 = vector.load %arg5[%c0_20, %c0_21] : memref<1152x128xbf16, #tpu.memory_space<vmem>>, vector<1152x128xbf16>
      %cst_22 = arith.constant dense<0.000000e+00> : vector<128x128xf32>
      %35 = tpu.matmul %33, %34, %cst_22 {dimension_numbers = #tpu.dot_dimension_numbers<[1], [0], [0], [1], [0, 0, 1, 1], [], []>} : vector<128x1152xbf16>, vector<1152x128xbf16>, vector<128x128xf32> -> vector<128x128xf32>
      %c0_23 = arith.constant 0 : index
      %c0_24 = arith.constant 0 : index
      %36 = vector.load %arg6[%c0_23, %c0_24] : memref<1x128xf32, #tpu.memory_space<vmem>>, vector<1x128xf32>
      %37 = vector.broadcast %36 : vector<1x128xf32> to vector<128x128xf32>
      %38 = arith.mulf %35, %37 : vector<128x128xf32>
      %c0_25 = arith.constant 0 : index
      %c0_26 = arith.constant 0 : index
      %39 = vector.load %arg7[%c0_25, %c0_26] : memref<1x128xf32, #tpu.memory_space<vmem>>, vector<1x128xf32>
      %40 = vector.broadcast %39 : vector<1x128xf32> to vector<128x128xf32>
      %41 = arith.addf %38, %40 : vector<128x128xf32>
      %c1_i32_27 = arith.constant 1 : i32
      %42 = arith.addi %c1_i32_27, %12 : i32
      %c0_28 = arith.constant 0 : index
      %43 = arith.index_cast %42 : i32 to index
      %c1_29 = arith.constant 1 : index
      %c0_30 = arith.constant 0 : index
      %44 = vector.load %arg1[%c0_28, %43, %c1_29, %c0_30] : memref<1x18x18x128xbf16, #tpu.memory_space<vmem>>, vector<1x8x16x128xbf16>
      %45 = vector.shape_cast %44 : vector<1x8x16x128xbf16> to vector<8x16x128xbf16>
      %46 = arith.extf %45 : vector<8x16x128xbf16> to vector<8x16x128xf32>
      %47 = vector.shape_cast %46 : vector<8x16x128xf32> to vector<128x128xf32>
      %48 = arith.addf %41, %47 : vector<128x128xf32>
      %cst_31 = arith.constant 0.000000e+00 : f32
      %49 = vector.broadcast %cst_31 : f32 to vector<128x128xf32>
      %50 = arith.maximumf %48, %49 : vector<128x128xf32>
      %51 = arith.truncf %50 : vector<128x128xf32> to vector<128x128xbf16>
      %52 = vector.shape_cast %51 : vector<128x128xbf16> to vector<8x16x128xbf16>
      %c0_32 = arith.constant 0 : index
      %53 = arith.index_cast %12 : i32 to index
      %c0_33 = arith.constant 0 : index
      %c0_34 = arith.constant 0 : index
      %54 = vector.load %arg8[%c0_32, %53, %c0_33, %c0_34] : memref<1x16x16x128xbf16, #tpu.memory_space<vmem>>, vector<1x8x16x128xbf16>
      %55 = vector.shape_cast %54 : vector<1x8x16x128xbf16> to vector<8x16x128xbf16>
      %56 = vector.shape_cast %52 : vector<8x16x128xbf16> to vector<1x8x16x128xbf16>
      tpu.vector_store %arg8[%c0_32, %53, %c0_33, %c0_34], %56 {strides = array<i32>} : memref<1x16x16x128xbf16, #tpu.memory_space<vmem>>, vector<1x8x16x128xbf16>,
    }
    %c2_i32_15 = arith.constant 2 : i32
    return
  }
  func.func @transform_0(%arg0: i32) -> (i32, i32, i32, i32) {
    %c0_i32 = arith.constant 0 : i32
    %c0_i32_0 = arith.constant 0 : i32
    %c0_i32_1 = arith.constant 0 : i32
    %c0_i32_2 = arith.constant 0 : i32
    return %arg0, %c0_i32, %c0_i32_0, %c0_i32_1 : i32, i32, i32, i32
  }
  func.func @transform_1(%arg0: i32) -> (i32, i32) {
    %c0_i32 = arith.constant 0 : i32
    %c0_i32_0 = arith.constant 0 : i32
    %c0_i32_1 = arith.constant 0 : i32
    return %c0_i32, %c0_i32_0 : i32, i32
  }
  func.func @transform_2(%arg0: i32) -> (i32, i32) {
    %c0_i32 = arith.constant 0 : i32
    %c0_i32_0 = arith.constant 0 : i32
    %c0_i32_1 = arith.constant 0 : i32
    return %c0_i32, %c0_i32_0 : i32, i32
  }
  func.func @transform_3(%arg0: i32) -> (i32, i32) {
    %c0_i32 = arith.constant 0 : i32
    %c0_i32_0 = arith.constant 0 : i32
    %c0_i32_1 = arith.constant 0 : i32
    return %c0_i32, %c0_i32_0 : i32, i32
  }
  func.func @transform_4(%arg0: i32) -> (i32, i32) {
    %c0_i32 = arith.constant 0 : i32
    %c0_i32_0 = arith.constant 0 : i32
    %c0_i32_1 = arith.constant 0 : i32
    return %c0_i32, %c0_i32_0 : i32, i32
  }
  func.func @transform_5(%arg0: i32) -> (i32, i32) {
    %c0_i32 = arith.constant 0 : i32
    %c0_i32_0 = arith.constant 0 : i32
    %c0_i32_1 = arith.constant 0 : i32
    return %c0_i32, %c0_i32_0 : i32, i32
  }
  func.func @transform_6(%arg0: i32) -> (i32, i32) {
    %c0_i32 = arith.constant 0 : i32
    %c0_i32_0 = arith.constant 0 : i32
    %c0_i32_1 = arith.constant 0 : i32
    return %c0_i32, %c0_i32_0 : i32, i32
  }
  func.func @transform_7(%arg0: i32) -> (i32, i32, i32, i32) {
    %c0_i32 = arith.constant 0 : i32
    %c0_i32_0 = arith.constant 0 : i32
    %c0_i32_1 = arith.constant 0 : i32
    %c0_i32_2 = arith.constant 0 : i32
    return %arg0, %c0_i32, %c0_i32_0, %c0_i32_1 : i32, i32, i32, i32
  }
}

</mosaic_0001>

<bundles_post_ra>
// kernel: _lambda_.1
= control target key start
LH: loop header
LB: loop body
LE: loop exit
PB: predicated region body
PF: predicated region fallthrough
CT: control target
= control target key end

     0   :  { %s5426_s24 = smov 0   ;;  %s7022_s0 = inlined_call_operand.vmem [shape: bf16[2,18,18,128], index: 0, kind: input, shape index: {}]   ;;  %s7023_s1 = inlined_call_operand.vmem [shape: bf16[1152,128], index: 1, kind: input, shape index: {}]   ;;  %s7024_s2 = inlined_call_operand.vmem [shape: f32[1,128], index: 2, kind: input, shape index: {}]   ;;  %s7025_s3 = inlined_call_operand.vmem [shape: f32[1,128], index: 3, kind: input, shape index: {}]   ;;  %s7026_s4 = inlined_call_operand.vmem [shape: bf16[1152,128], index: 4, kind: input, shape index: {}]   ;;  %s7027_s5 = inlined_call_operand.vmem [shape: f32[1,128], index: 5, kind: input, shape index: {}]   ;;  %s7028_s6 = inlined_call_operand.vmem [shape: f32[1,128], index: 6, kind: input, shape index: {}]   ;;  %s7029_s7 = inlined_call_operand.vmem [shape: bf16[2,16,16,128], index: 7, kind: output, shape index: {}]  }
   0x1 LB: > { %s4081_s25 = sadd.s32 4294967295, %s5375_s24   ;;  %p4085_p0 = scmp.ge.s32.totalorder %s5375_s24, 1  ;;  %s5375_s24 = sphi %s5426_s24, %s17_s24  }
   0x2   : > { %p237_p1 = scmp.lt.s32.totalorder %s5375_s24, 3 }
   0x4   : > { %p238_p2 = pnand %p4085_p0, %p237_p1 }
   0x5   : > { %p5436_p3 = scmp.lt.s32.totalorder (!%p238_p2), %s4081_s25, 1  ;;  %vm284_vm0 = vcmask (!%p238_p2), 1040384   ;;  %vm285_vm1 = vsmask.f32 (!%p238_p2), 256  ;;  %v5385_v0 = vmov (!%p238_p2), 0   ;;  %s5496_s12 = smov (!%p238_p2), 0  }
   0x6   : > { %241 = sbr.rel (%p238_p2) target bundleno = 841 (0x349), region = 48  ;;  %280 = vst [vmem:[#allocation2] sm:$0xf] (!%p238_p2), %v5385_v0  ;;  %281 = vst [vmem:[#allocation2 + $0x4] sm:$0xf] (!%p238_p2), %v5385_v0 }
   0x7   : > { %282 = vst [vmem:[#allocation2 + $0x8] sm:$0xf] (!%p238_p2), %v5385_v0  ;;  %283 = vst [vmem:[#allocation2 + $0xc] sm:$0xf] (!%p238_p2), %v5385_v0  ;;  %v287_v2 = vld [vmem:[#allocation2 + $0x10] sm:$0x1] (!%p238_p2) }
   0x8   : > { %291 = vst [vmem:[#allocation2 + $0x154] sm:$0xf] (!%p238_p2), %v5385_v0  ;;  %292 = vst [vmem:[#allocation2 + $0x158] sm:$0xf] (!%p238_p2), %v5385_v0  ;;  %v295_v3 = vld [vmem:[#allocation2 + $0x164] sm:$0x1] (!%p238_p2) }
   0x9   : > { %293 = vst [vmem:[#allocation2 + $0x15c] sm:$0xf] (!%p238_p2), %v5385_v0  ;;  %294 = vst [vmem:[#allocation2 + $0x160] sm:$0xf] (!%p238_p2), %v5385_v0  ;;  %v331_v6 = vld [vmem:[#allocation2 + $0x24] sm:$0x1] (!%p238_p2) }
   0xa   : > { %299 = vst [vmem:[#allocation2 + $0x14] sm:$0xf] (!%p238_p2), %v5385_v0  ;;  %300 = vst [vmem:[#allocation2 + $0x18] sm:$0xf] (!%p238_p2), %v5385_v0  ;;  %v334_v8 = vld [vmem:[#allocation2 + $0x38] sm:$0x1] (!%p238_p2) }
   0xb   : > { %301 = vst [vmem:[#allocation2 + $0x28] sm:$0xf] (!%p238_p2), %v5385_v0  ;;  %302 = vst [vmem:[#allocation2 + $0x2c] sm:$0xf] (!%p238_p2), %v5385_v0  ;;  %v337_v9 = vld [vmem:[#allocation2 + $0x4c] sm:$0x1] (!%p238_p2) }
   0xc   : > { %303 = vst [vmem:[#allocation2 + $0x3c] sm:$0xf] (!%p238_p2), %v5385_v0  ;;  %304 = vst [vmem:[#allocation2 + $0x40] sm:$0xf] (!%p238_p2), %v5385_v0  ;;  %v340_v12 = vld [vmem:[#allocation2 + $0x60] sm:$0x1] (!%p238_p2) }
   0xd   : > { %305 = vst [vmem:[#allocation2 + $0x50] sm:$0xf] %v5385_v0  ;;  %306 = vst [vmem:[#allocation2 + $0x54] sm:$0xf] %v5385_v0  ;;  %s7040_s25 = smov (!%p5436_p3, %s4081_s25), 1 }
   0xe   : > { %307 = vst [vmem:[#allocation2 + $0x64] sm:$0xf] %v5385_v0  ;;  %308 = vst [vmem:[#allocation2 + $0x68] sm:$0xf] %v5385_v0  ;;  %s5171_s27 = smul.u32 216, %s7040_s25  ;;  %s4403_s28 = sshll.u32 %s7040_s25, 7 }
   0xf   : > { %309 = vst [vmem:[#allocation2 + $0x78] sm:$0xf] %v5385_v0  ;;  %310 = vst [vmem:[#allocation2 + $0x7c] sm:$0xf] %v5385_v0  ;;  %s5463_s8 = scalar_lea.vmem %s7029_s7, %s4403_s28  ;;  %v343_v14 = vld [vmem:[#allocation2 + $0x74] sm:$0x1] }
  0x10   : > { %311 = vst [vmem:[#allocation2 + $0x8c] sm:$0xf] %v5385_v0  ;;  %312 = vst [vmem:[#allocation2 + $0x90] sm:$0xf] %v5385_v0  ;;  %v346_v15 = vld [vmem:[#allocation2 + $0x88] sm:$0x1]  ;;  %s5470_s11 = scalar_lea.vmem %s7022_s0, %s5171_s27 }
  0x11   : > { %313 = vst [vmem:[#allocation2 + $0xa0] sm:$0xf] %v5385_v0  ;;  %314 = vst [vmem:[#allocation2 + $0xa4] sm:$0xf] %v5385_v0  ;;  %v349_v18 = vld [vmem:[#allocation2 + $0x9c] sm:$0x1] }
  0x12   : > { %315 = vst [vmem:[#allocation2 + $0xb4] sm:$0xf] %v5385_v0  ;;  %316 = vst [vmem:[#allocation2 + $0xb8] sm:$0xf] %v5385_v0  ;;  %v352_v19 = vld [vmem:[#allocation2 + $0xb0] sm:$0x1] }
  0x13   : > { %317 = vst [vmem:[#allocation2 + $0xc8] sm:$0xf] %v5385_v0  ;;  %318 = vst [vmem:[#allocation2 + $0xcc] sm:$0xf] %v5385_v0  ;;  %v355_v22 = vld [vmem:[#allocation2 + $0xc4] sm:$0x1] }
  0x14   : > { %319 = vst [vmem:[#allocation2 + $0xdc] sm:$0xf] %v5385_v0  ;;  %320 = vst [vmem:[#allocation2 + $0xe0] sm:$0xf] %v5385_v0  ;;  %v358_v23 = vld [vmem:[#allocation2 + $0xd8] sm:$0x1] }
  0x15   : > { %321 = vst [vmem:[#allocation2 + $0xf0] sm:$0xf] %v5385_v0  ;;  %322 = vst [vmem:[#allocation2 + $0xf4] sm:$0xf] %v5385_v0  ;;  %v361_v26 = vld [vmem:[#allocation2 + $0xec] sm:$0x1] }
  0x16   : > { %323 = vst [vmem:[#allocation2 + $0x104] sm:$0xf] %v5385_v0  ;;  %324 = vst [vmem:[#allocation2 + $0x108] sm:$0xf] %v5385_v0  ;;  %v364_v27 = vld [vmem:[#allocation2 + $0x100] sm:$0x1] }
  0x17   : > { %325 = vst [vmem:[#allocation2 + $0x118] sm:$0xf] %v5385_v0  ;;  %326 = vst [vmem:[#allocation2 + $0x11c] sm:$0xf] %v5385_v0  ;;  %v367_v30 = vld [vmem:[#allocation2 + $0x114] sm:$0x1] }
  0x18   : > { %327 = vst [vmem:[#allocation2 + $0x12c] sm:$0xf] %v5385_v0  ;;  %328 = vst [vmem:[#allocation2 + $0x130] sm:$0xf] %v5385_v0  ;;  %v370_v31 = vld [vmem:[#allocation2 + $0x128] sm:$0x1] }
  0x19   : > { %329 = vst [vmem:[#allocation2 + $0x140] sm:$0xf] %v5385_v0  ;;  %330 = vst [vmem:[#allocation2 + $0x144] sm:$0xf] %v5385_v0  ;;  %v373_v34 = vld [vmem:[#allocation2 + $0x13c] sm:$0x1] }
  0x1a   : > { %vm5442_vm2 = vmand %vm284_vm0, %vm285_vm1  ;;  %v376_v35 = vld [vmem:[#allocation2 + $0x150] sm:$0x1] }
  0x1b   : > { %v288_v4 = vsel %vm5442_vm2, 0, %v287_v2  ;;  %v296_v5 = vsel %vm5442_vm2, 0, %v295_v3  ;;  %v332_v7 = vsel %vm5442_vm2, 0, %v331_v6  ;;  %v335_v10 = vsel %vm5442_vm2, 0, %v334_v8 }
  0x1c   : > { %289 = vst [vmem:[#allocation2 + $0x10] sm:$0x1] %v288_v4  ;;  %297 = vst [vmem:[#allocation2 + $0x164] sm:$0x1] %v296_v5  ;;  %v338_v11 = vsel %vm5442_vm2, 0, %v337_v9  ;;  %v341_v13 = vsel %vm5442_vm2, 0, %v340_v12 }
  0x1d   : > { %333 = vst [vmem:[#allocation2 + $0x24] sm:$0x1] %v332_v7  ;;  %336 = vst [vmem:[#allocation2 + $0x38] sm:$0x1] %v335_v10  ;;  %v344_v16 = vsel %vm5442_vm2, 0, %v343_v14  ;;  %v347_v17 = vsel %vm5442_vm2, 0, %v346_v15 }
  0x1e   : > { %339 = vst [vmem:[#allocation2 + $0x4c] sm:$0x1] %v338_v11  ;;  %342 = vst [vmem:[#allocation2 + $0x60] sm:$0x1] %v341_v13  ;;  %v350_v20 = vsel %vm5442_vm2, 0, %v349_v18  ;;  %v353_v21 = vsel %vm5442_vm2, 0, %v352_v19 }
  0x1f   : > { %345 = vst [vmem:[#allocation2 + $0x74] sm:$0x1] %v344_v16  ;;  %348 = vst [vmem:[#allocation2 + $0x88] sm:$0x1] %v347_v17  ;;  %v356_v24 = vsel %vm5442_vm2, 0, %v355_v22  ;;  %v359_v25 = vsel %vm5442_vm2, 0, %v358_v23 }
  0x20   : > { %351 = vst [vmem:[#allocation2 + $0x9c] sm:$0x1] %v350_v20  ;;  %354 = vst [vmem:[#allocation2 + $0xb0] sm:$0x1] %v353_v21  ;;  %v362_v28 = vsel %vm5442_vm2, 0, %v361_v26  ;;  %v365_v29 = vsel %vm5442_vm2, 0, %v364_v27 }
  0x21   : > { %357 = vst [vmem:[#allocation2 + $0xc4] sm:$0x1] %v356_v24  ;;  %360 = vst [vmem:[#allocation2 + $0xd8] sm:$0x1] %v359_v25  ;;  %v368_v32 = vsel %vm5442_vm2, 0, %v367_v30  ;;  %v371_v33 = vsel %vm5442_vm2, 0, %v370_v31 }
  0x22   : > { %363 = vst [vmem:[#allocation2 + $0xec] sm:$0x1] %v362_v28  ;;  %366 = vst [vmem:[#allocation2 + $0x100] sm:$0x1] %v365_v29  ;;  %v374_v36 = vsel %vm5442_vm2, 0, %v373_v34  ;;  %v377_v37 = vsel %vm5442_vm2, 0, %v376_v35 }
  0x23   : > { %369 = vst [vmem:[#allocation2 + $0x114] sm:$0x1] %v368_v32  ;;  %372 = vst [vmem:[#allocation2 + $0x128] sm:$0x1] %v371_v33 }
  0x24   : > { %375 = vst [vmem:[#allocation2 + $0x13c] sm:$0x1] %v374_v36  ;;  %378 = vst [vmem:[#allocation2 + $0x150] sm:$0x1] %v377_v37 }
  0x25 LB: >> { %v5197_v38 = vld [vmem:[%s7023_s1 + $0x40] sm:$0xff]   ;;  %v5201_v42 = vld [vmem:[%s7023_s1 + $0x48] sm:$0xff]   ;;  %v5205_v46 = vld [vmem:[%s7023_s1 + $0x50] sm:$0xff]   ;;  %s4404_s28 = smul.u32 96, %s5379_s12  ;;  %vm638_vm3 = vcmask 1042432   ;;  %vm639_vm4 = vcmask 1046532   ;;  %s5379_s12 = sphi %s5496_s12, %s384_s12  }
  0x26   : >> { %v5198_v39 = vld [vmem:[%s7023_s1 + $0xc0] sm:$0xff]   ;;  %4531 = vmatprep.subr.bf16.mxu0 %v5197_v38  ;;  %v5202_v43 = vld [vmem:[%s7023_s1 + $0xc8] sm:$0xff]   ;;  %v5206_v47 = vld [vmem:[%s7023_s1 + $0xd0] sm:$0xff]   ;;  %vm419_vm5 = vsmask.f32 3328  ;;  %s4223_s14 = smul.u32 160, %s5379_s12 }
  0x27   : >> { %v5199_v40 = vld [vmem:[%s7023_s1] sm:$0xff]   ;;  %4595 = vmatprep.subr.bf16.mxu1 %v5198_v39  ;;  %v5203_v44 = vld [vmem:[%s7023_s1 + $0x8] sm:$0xff]   ;;  %v5207_v48 = vld [vmem:[%s7023_s1 + $0x10] sm:$0xff]   ;;  %s5593_s17 = scalar_lea.vmem %s5470_s11, %s4404_s28  ;;  %vm420_vm6 = vsmask.f32 7440  ;;  %s384_s12 = sadd.s32 1, %s5379_s12  }
  0x28   : >> { %v5200_v41 = vld [vmem:[%s7023_s1 + $0x80] sm:$0xff]   ;;  %4532 = vmatpush3.bf16.msra.mxu0 %v5199_v40  ;;  %v5204_v45 = vld [vmem:[%s7023_s1 + $0x88] sm:$0xff]   ;;  %v5208_v49 = vld [vmem:[%s7023_s1 + $0x90] sm:$0xff]   ;;  %s6182_s15 = scalar_lea.vmem [#allocation2], %s4223_s14  ;;  %p381_p4 = scmp.ge.s32.totalorder %s384_s12, 2  }
  0x29   : >> { %4596 = vmatpush3.bf16.msra.mxu1 %v5200_v41  ;;  %4533 = vmatprep.subr.bf16.mxu0 %v5201_v42  ;;  %v5209_v50 = vld [vmem:[%s7023_s1 + $0x58] sm:$0xff]   ;;  %v5213_v54 = vld [vmem:[%s7023_s1 + $0x60] sm:$0xff]   ;;  %v5217_v58 = vld [vmem:[%s7023_s1 + $0x68] sm:$0xff]   ;;  %s6219_s16 = smov (%p381_p4), 0  }
  0x2a   : >> { %4597 = vmatprep.subr.bf16.mxu1 %v5202_v43  ;;  %v5210_v51 = vld [vmem:[%s7023_s1 + $0xd8] sm:$0xff]   ;;  %v5214_v55 = vld [vmem:[%s7023_s1 + $0xe0] sm:$0xff]   ;;  %v5218_v59 = vld [vmem:[%s7023_s1 + $0xe8] sm:$0xff]  }
  0x2b   : >> { %v5211_v52 = vld [vmem:[%s7023_s1 + $0x18] sm:$0xff]   ;;  %v5215_v56 = vld [vmem:[%s7023_s1 + $0x20] sm:$0xff]   ;;  %v5219_v60 = vld [vmem:[%s7023_s1 + $0x28] sm:$0xff]  }
  0x2c   : >> { %4534 = vmatpush3.bf16.msra.mxu0 %v5203_v44  ;;  %v5212_v53 = vld [vmem:[%s7023_s1 + $0x98] sm:$0xff]   ;;  %v5216_v57 = vld [vmem:[%s7023_s1 + $0xa0] sm:$0xff]   ;;  %v5220_v61 = vld [vmem:[%s7023_s1 + $0xa8] sm:$0xff]  }
  0x2d   : >> { %4598 = vmatpush3.bf16.msra.mxu1 %v5204_v45  ;;  %4535 = vmatprep.subr.bf16.mxu0 %v5205_v46  ;;  %v5221_v62 = vld [vmem:[%s7023_s1 + $0x70] sm:$0xff]   ;;  %v5225_v2 = vld [vmem:[%s7023_s1 + $0x78] sm:$0xff]   ;;  %v5602_v6 = vld [vmem:[%s5593_s17] sm:$0xf] }
  0x2e   : >> { %4599 = vmatprep.subr.bf16.mxu1 %v5206_v47  ;;  %v5222_v63 = vld [vmem:[%s7023_s1 + $0xf0] sm:$0xff]   ;;  %v5226_v3 = vld [vmem:[%s7023_s1 + $0xf8] sm:$0xff]   ;;  %v5605_v7 = vld [vmem:[%s5593_s17 + $0x4] sm:$0xf]  ;;  %v423_v9 = vshrl.u32 %v5602_v6, 16  ;;  %v426_v10 = vshll.u32 %v5602_v6, 16 }
  0x2f   : >> { %v5223_v0 = vld [vmem:[%s7023_s1 + $0x30] sm:$0xff]   ;;  %v5227_v4 = vld [vmem:[%s7023_s1 + $0x38] sm:$0xff]   ;;  %v391_v8 = vld [vmem:[%s5593_s17 + $0x8] sm:$0x1]  ;;  %v432_v11 = vshll.u32 %v5605_v7, 16  ;;  %v436_v12 = vshrl.u32 %v5605_v7, 16 }
  0x30   : >> { %4536 = vmatpush3.bf16.msra.mxu0 %v5207_v48  ;;  %v5224_v1 = vld [vmem:[%s7023_s1 + $0xb0] sm:$0xff]   ;;  %v5228_v5 = vld [vmem:[%s7023_s1 + $0xb8] sm:$0xff]   ;;  %v442_v13 = vshll.u32 %v391_v8, 16  ;;  %v5613_v14 = vld [vmem:[%s5593_s17 + $0xc] sm:$0xf]  ;;  %v425_v15 = vrot.slane %v423_v9, 4 }
  0x31   : >> { %4600 = vmatpush3.bf16.msra.mxu1 %v5208_v49  ;;  %4537 = vmatprep.subr.bf16.mxu0 %v5209_v50  ;;  %v428_v16 = vrot.slane %v426_v10, 5  ;;  %v5616_v17 = vld [vmem:[%s5593_s17 + $0x10] sm:$0xf]  ;;  %v447_v18 = vshrl.u32 %v5613_v14, 16  ;;  %v450_v19 = vshll.u32 %v5613_v14, 16  ;;  %v434_v20 = vrot.slane %v432_v11, 5  ;;  %vm5623_vm7 = vmor %vm638_vm3, %vm639_vm4 }
  0x32   : >> { %4601 = vmatprep.subr.bf16.mxu1 %v5210_v51  ;;  %v438_v21 = vrot.slane %v436_v12, 4  ;;  %v444_v22 = vrot.slane %v442_v13, 5  ;;  %v456_v23 = vshll.u32 %v5616_v17, 16  ;;  %vm5629_vm8 = vmor %vm419_vm5, %vm420_vm6  ;;  %v460_v29 = vshrl.u32 %v5616_v17, 16  ;;  %v5231_v30 = vld [vmem:[%s7023_s1 + $0x140] sm:$0xff]  }
  0x33   : >> { %v429_v26 = vor.u32 %v428_v16, %v425_v15  ;;  %v449_v27 = vrot.slane %v447_v18, 4  ;;  %v452_v28 = vrot.slane %v450_v19, 5  ;;  %v5639_v32 = vcombine.low %v5613_v14, %v5616_v17  ;;  %v5232_v34 = vld [vmem:[%s7023_s1 + $0x1c0] sm:$0xff]   ;;  %v394_v46 = vld [vmem:[%s5593_s17 + $0x14] sm:$0x1] }
  0x34   : >> { %4538 = vmatpush3.bf16.msra.mxu0 %v5211_v52  ;;  %v439_v31 = vor.u32 %v438_v21, %v434_v20  ;;  %v4092_v33 = vrot.slane %v5602_v6, 9  ;;  %v646_v36 = vrot.slane %v391_v8, 5  ;;  %v643_v37 = vrot.slane %v5605_v7, 5  ;;  %v5233_v44 = vld [vmem:[%s7023_s1 + $0x100] sm:$0xff]   ;;  %v5663_v52 = vld [vmem:[%s5593_s17 + $0x18] sm:$0xf] }
  0x35   : >> { %4602 = vmatpush3.bf16.msra.mxu1 %v5212_v53  ;;  %4539 = vmatprep.subr.bf16.mxu0 %v5213_v54  ;;  %v430_v35 = vrot.slane %v429_v26, 4  ;;  %v453_v38 = vor.u32 %v452_v28, %v449_v27  ;;  %v462_v40 = vrot.slane %v460_v29, 4  ;;  %v5234_v45 = vld [vmem:[%s7023_s1 + $0x180] sm:$0xff]   ;;  %v4102_v49 = vcombine.low %v5602_v6, %v5605_v7  ;;  %v5666_v53 = vld [vmem:[%s5593_s17 + $0x1c] sm:$0xf]  ;;  %v5238_v6 = vld [vmem:[%s7023_s1 + $0x108] sm:$0xff]  }
  0x36   : >> { %4603 = vmatprep.subr.bf16.mxu1 %v5214_v55  ;;  %v440_v39 = vrot.slane %v439_v31, 4  ;;  %1590 = vmatprep.mubr.bf16.mxu1 %v5639_v32  ;;  %v644_v42 = vsel %vm5623_vm7, %v4092_v33, %v643_v37  ;;  %v645_v43 = vrot.slane %v643_v37, 4  ;;  %v458_v50 = vrot.slane %v456_v23, 5  ;;  %v5239_v7 = vld [vmem:[%s7023_s1 + $0x188] sm:$0xff]   ;;  %v397_v12 = vld [vmem:[%s5593_s17 + $0x20] sm:$0x1] }
  0x37   : >> { %v435_v41 = vsel %vm5629_vm8, %v430_v35, %v434_v20  ;;  %v454_v47 = vrot.slane %v453_v38, 4  ;;  %v466_v51 = vshll.u32 %v394_v46, 16  ;;  %v5241_v16 = vld [vmem:[%s7023_s1 + $0x150] sm:$0xff]   ;;  %v490_v19 = vshll.u32 %v397_v12, 16  ;;  %v5708_v20 = vld [vmem:[%s5593_s17 + $0x24] sm:$0xf] }
  0x38   : >> { %4540 = vmatpush3.bf16.msra.mxu0 %v5215_v56  ;;  %v445_v48 = vsel %vm5629_vm8, %v440_v39, %v444_v22  ;;  %v647_v55 = vsel %vm5623_vm7, %v645_v43, %v646_v36  ;;  %v471_v56 = vshrl.u32 %v5663_v52, 16  ;;  %v5711_v21 = vld [vmem:[%s5593_s17 + $0x28] sm:$0xf]  ;;  %v4094_v22 = vrot.slane %v5663_v52, 9  ;;  %v5243_v39 = vld [vmem:[%s7023_s1 + $0x110] sm:$0xff]  }
  0x39   : >> { %4604 = vmatpush3.bf16.msra.mxu1 %v5216_v57  ;;  %4541 = vmatprep.subr.bf16.mxu0 %v5217_v58  ;;  %v4110_v54 = vcombine.low %v435_v41, %v445_v48  ;;  %v474_v57 = vshll.u32 %v5663_v52, 16  ;;  %v4118_v58 = vcombine.low %v644_v42, %v647_v55  ;;  %v495_v28 = vshrl.u32 %v5708_v20, 16 }
  0x3a   : >> { %4605 = vmatprep.subr.bf16.mxu1 %v5218_v59  ;;  %v463_v59 = vor.u32 %v462_v40, %v458_v50  ;;  %v473_v10 = vrot.slane %v471_v56, 4  ;;  %v492_v29 = vrot.slane %v490_v19, 5  ;;  %v508_v31 = vshrl.u32 %v5711_v21, 16 }
  0x3b   : >> { %1493 = vmatprep.mubr.bf16.mxu0 %v4110_v54  ;;  %v476_v13 = vrot.slane %v474_v57, 5  ;;  %v5722_v33 = vcombine.low %v5708_v20, %v5711_v21  ;;  %v657_v37 = vrot.slane %v5666_v53, 5  ;;  %v660_v38 = vrot.slane %v397_v12, 5  ;;  %v5754_v54 = vld [vmem:[%s5593_s17 + $0x34] sm:$0xf]  ;;  %v5249_v12 = vld [vmem:[%s7023_s1 + $0x198] sm:$0xff]  }
  0x3c   : >> { %4542 = vmatpush3.bf16.msra.mxu0 %v5219_v60  ;;  %v468_v60 = vrot.slane %v466_v51, 5  ;;  %v504_v48 = vshll.u32 %v5711_v21, 16  ;;  %v4095_v55 = vrot.slane %v5708_v20, 9 }
  0x3d   : >> { %4606 = vmatpush3.bf16.msra.mxu1 %v5220_v61  ;;  %4543 = vmatprep.subr.bf16.mxu0 %v5221_v62  ;;  %v5236_v61 = vld [vmem:[%s7023_s1 + $0x148] sm:$0xff]   ;;  %v484_v62 = vshrl.u32 %v5666_v53, 16  ;;  %v477_v26 = vor.u32 %v476_v13, %v473_v10  ;;  %v658_v42 = vsel %vm5623_vm7, %v4094_v22, %v657_v37  ;;  %v659_v43 = vrot.slane %v657_v37, 4  ;;  %v5251_v13 = vld [vmem:[%s7023_s1 + $0x160] sm:$0xff]  }
  0x3e   : >> { %4607 = vmatprep.subr.bf16.mxu1 %v5222_v63  ;;  %v5678_v63 = vcombine.low %v5663_v52, %v5666_v53 }
  0x3f   : >> { %v486_v15 = vrot.slane %v484_v62, 4  ;;  %v478_v35 = vrot.slane %v477_v26, 4  ;;  %v661_v51 = vsel %vm5623_vm7, %v659_v43, %v660_v38  ;;  %v5796_v26 = vld [vmem:[%s5593_s17 + $0x3c] sm:$0xf] }
  0x40   : >> { %4544 = vmatpush3.bf16.msra.mxu0 %v5223_v0  ;;  %v4093_v0 = vrot.slane %v5613_v14, 9  ;;  %v480_v14 = vshll.u32 %v5666_v53, 16  ;;  %v5751_v53 = vld [vmem:[%s5593_s17 + $0x30] sm:$0xf]  ;;  %v5759_v57 = vcombine.low %v658_v42, %v661_v51  ;;  %v546_v37 = vshll.u32 %v5796_v26, 16 }
  0x41   : >> { %4608 = vmatpush3.bf16.msra.mxu1 %v5224_v1  ;;  %4545 = vmatprep.subr.bf16.mxu0 %v5225_v2  ;;  %v650_v1 = vrot.slane %v5616_v17, 5  ;;  %v5237_v2 = vld [vmem:[%s7023_s1 + $0x1c8] sm:$0xff]   ;;  %v519_v62 = vshrl.u32 %v5751_v53, 16  ;;  %v671_v42 = vrot.slane %v5754_v54, 5 }
  0x42   : >> { %4609 = vmatprep.subr.bf16.mxu1 %v5226_v3  ;;  %v459_v3 = vsel %vm5629_vm8, %v454_v47, %v458_v50  ;;  %v482_v27 = vrot.slane %v480_v14, 5  ;;  %v403_v14 = vld [vmem:[%s5593_s17 + $0x38] sm:$0x1] }
  0x43   : >> { %v651_v8 = vsel %vm5623_vm7, %v4093_v0, %v650_v1  ;;  %v652_v9 = vrot.slane %v650_v1, 4  ;;  %v522_v0 = vshll.u32 %v5751_v53, 16  ;;  %v532_v1 = vshrl.u32 %v5754_v54, 16 }
  0x44   : >> { %4546 = vmatpush3.bf16.msra.mxu0 %v5227_v4  ;;  %v464_v4 = vrot.slane %v463_v59, 4  ;;  %v487_v36 = vor.u32 %v486_v15, %v482_v27  ;;  %v483_v40 = vsel %vm5629_vm8, %v478_v35, %v482_v27  ;;  %v506_v59 = vrot.slane %v504_v48, 5  ;;  %v5799_v27 = vld [vmem:[%s5593_s17 + $0x40] sm:$0xf] }
  0x45   : >> { %4610 = vmatpush3.bf16.msra.mxu1 %v5228_v5  ;;  %4659 = vmatprep.subr.bf16.mxu0 %v5231_v30  ;;  %v653_v5 = vrot.slane %v394_v46, 5  ;;  %v498_v30 = vshll.u32 %v5708_v20, 16  ;;  %v497_v46 = vrot.slane %v495_v28, 4  ;;  %v521_v15 = vrot.slane %v519_v62, 4  ;;  %v5254_v48 = vld [vmem:[%s7023_s1 + $0x1a0] sm:$0xff]  }
  0x46   : >> { %4723 = vmatprep.subr.bf16.mxu1 %v5232_v34  ;;  %v469_v11 = vsel %vm5629_vm8, %v464_v4, %v468_v60  ;;  %v5242_v34 = vld [vmem:[%s7023_s1 + $0x1d0] sm:$0xff]   ;;  %v488_v41 = vrot.slane %v487_v36, 4  ;;  %v5247_v60 = vld [vmem:[%s7023_s1 + $0x1d8] sm:$0xff]   ;;  %v5770_v4 = vcombine.low %v5751_v53, %v5754_v54  ;;  %v534_v19 = vrot.slane %v532_v1, 4 }
  0x47   : >> { %1494 = vmatmul.mubr.bf16.vlgmr.msra.gmra.mrb[0].mxu0 %v4102_v49  ;;  %v5703_v17 = vcombine.low %v459_v3, %v469_v11  ;;  %v654_v18 = vsel %vm5623_vm7, %v652_v9, %v653_v5  ;;  %v500_v47 = vrot.slane %v498_v30, 5  ;;  %v510_v49 = vrot.slane %v508_v31, 4 }
  0x48   : >> { %1591 = vmatmul.mubr.bf16.vlgmr.msra.gmra.mrb[0].mxu1 %v4118_v58  ;;  %4660 = vmatpush3.bf16.msra.mxu0 %v5233_v44  ;;  %v5714_v23 = vcombine.low %v651_v8, %v654_v18  ;;  %v5244_v44 = vld [vmem:[%s7023_s1 + $0x190] sm:$0xff]   ;;  %v493_v50 = vsel %vm5629_vm8, %v488_v41, %v492_v29  ;;  %v664_v5 = vrot.slane %v5711_v21, 5  ;;  %v528_v18 = vshll.u32 %v5754_v54, 16 }
  0x49   : >> { %4724 = vmatpush3.bf16.msra.mxu1 %v5234_v45  ;;  %1598 = vmatprep.mubr.bf16.mxu1 %v5678_v63  ;;  %v400_v45 = vld [vmem:[%s5593_s17 + $0x2c] sm:$0x1]  ;;  %v5757_v56 = vcombine.low %v483_v40, %v493_v50  ;;  %v501_v58 = vor.u32 %v500_v47, %v497_v46  ;;  %v511_v3 = vor.u32 %v510_v49, %v506_v59  ;;  %v538_v22 = vshll.u32 %v403_v14, 16  ;;  %v406_v50 = vld [vmem:[%s5593_s17 + $0x44] sm:$0x1] }
  0x4a   : >> { %4661 = vmatprep.subr.bf16.mxu0 %v5236_v61  ;;  %4725 = vmatprep.subr.bf16.mxu1 %v5237_v2  ;;  %v514_v52 = vshll.u32 %v400_v45, 16  ;;  %v665_v10 = vsel %vm5623_vm7, %v4095_v55, %v664_v5  ;;  %v666_v11 = vrot.slane %v664_v5, 4  ;;  %v4096_v28 = vrot.slane %v5751_v53, 9  ;;  %v5256_v49 = vld [vmem:[%s7023_s1 + $0x168] sm:$0xff]  }
  0x4b   : >> { %1501 = vmatprep.mubr.bf16.mxu0 %v5703_v17  ;;  %v502_v2 = vrot.slane %v501_v58, 4  ;;  %v512_v9 = vrot.slane %v511_v3, 4  ;;  %v530_v31 = vrot.slane %v528_v18, 5  ;;  %v540_v35 = vrot.slane %v538_v22, 5  ;;  %v5257_v5 = vld [vmem:[%s7023_s1 + $0x1e8] sm:$0xff]   ;;  %v5261_v22 = vld [vmem:[%s7023_s1 + $0x170] sm:$0xff]  }
  0x4c   : >> { %4662 = vmatpush3.bf16.msra.mxu0 %v5238_v6  ;;  %v516_v61 = vrot.slane %v514_v52, 5  ;;  %v667_v6 = vrot.slane %v400_v45, 5  ;;  %v543_v36 = vshrl.u32 %v5796_v26, 16  ;;  %v556_v38 = vshrl.u32 %v5799_v27, 16 }
  0x4d   : >> { %4726 = vmatpush3.bf16.msra.mxu1 %v5239_v7  ;;  %4663 = vmatprep.subr.bf16.mxu0 %v5241_v16  ;;  %v5248_v7 = vld [vmem:[%s7023_s1 + $0x118] sm:$0xff]   ;;  %v507_v8 = vsel %vm5629_vm8, %v502_v2, %v506_v59  ;;  %v524_v16 = vrot.slane %v522_v0, 5  ;;  %v535_v41 = vor.u32 %v534_v19, %v530_v31  ;;  %v5816_v43 = vcombine.low %v5796_v26, %v5799_v27 }
  0x4e   : >> { %4727 = vmatprep.subr.bf16.mxu1 %v5242_v34  ;;  %v517_v20 = vsel %vm5629_vm8, %v512_v9, %v516_v61  ;;  %v668_v21 = vsel %vm5623_vm7, %v666_v11, %v667_v6  ;;  %v5252_v34 = vld [vmem:[%s7023_s1 + $0x1e0] sm:$0xff]   ;;  %v673_v47 = vrot.slane %v671_v42, 4  ;;  %v545_v51 = vrot.slane %v543_v36, 4  ;;  %v5841_v61 = vld [vmem:[%s5593_s17 + $0x4c] sm:$0xf] }
  0x4f   : >> { %1502 = vmatmul.mubr.bf16.gmra.mrb[4].mxu0 %v5639_v32  ;;  %v5246_v32 = vld [vmem:[%s7023_s1 + $0x158] sm:$0xff]   ;;  %v5802_v29 = vcombine.low %v507_v8, %v517_v20  ;;  %v525_v30 = vor.u32 %v524_v16, %v521_v15  ;;  %v536_v46 = vrot.slane %v535_v41, 4  ;;  %v548_v52 = vrot.slane %v546_v37, 5  ;;  %v5258_v15 = vld [vmem:[%s7023_s1 + $0x128] sm:$0xff]   ;;  %v5884_v37 = vld [vmem:[%s5593_s17 + $0x54] sm:$0xf] }
  0x50   : >> { %1599 = vmatmul.mubr.bf16.gmra.mrb[4].mxu1 %v5714_v23  ;;  %4664 = vmatpush3.bf16.msra.mxu0 %v5243_v39  ;;  %v5811_v39 = vcombine.low %v665_v10, %v668_v21  ;;  %v552_v53 = vshll.u32 %v5799_v27, 16  ;;  %v558_v54 = vrot.slane %v556_v38, 4  ;;  %v672_v58 = vsel %vm5623_vm7, %v4096_v28, %v671_v42  ;;  %v5259_v21 = vld [vmem:[%s7023_s1 + $0x1a8] sm:$0xff]   ;;  %v5887_v38 = vld [vmem:[%s5593_s17 + $0x58] sm:$0xf] }
  0x51   : >> { %1606 = vmatprep.mubr.bf16.mxu1 %v5722_v33  ;;  %4728 = vmatpush3.bf16.msra.mxu1 %v5244_v44  ;;  %v526_v40 = vrot.slane %v525_v30, 4  ;;  %v674_v44 = vrot.slane %v403_v14, 5  ;;  %v541_v55 = vsel %vm5629_vm8, %v536_v46, %v540_v35  ;;  %v562_v59 = vshll.u32 %v406_v50, 16 }
  0x52   : >> { %4665 = vmatprep.subr.bf16.mxu0 %v5246_v32  ;;  %1509 = vmatprep.mubr.bf16.mxu0 %v5757_v56  ;;  %v5253_v32 = vld [vmem:[%s7023_s1 + $0x120] sm:$0xff]   ;;  %v4097_v62 = vrot.slane %v5796_v26, 9  ;;  %v549_v2 = vor.u32 %v548_v52, %v545_v51  ;;  %v554_v3 = vrot.slane %v552_v53, 5  ;;  %v580_v9 = vshrl.u32 %v5841_v61, 16  ;;  %v5875_v26 = vld [vmem:[%s5593_s17 + $0x50] sm:$0x1] }
  0x53   : >> { %4729 = vmatprep.subr.bf16.mxu1 %v5247_v60  ;;  %v531_v45 = vsel %vm5629_vm8, %v526_v40, %v530_v31  ;;  %v5838_v60 = vld [vmem:[%s5593_s17 + $0x48] sm:$0xf]  ;;  %v675_v1 = vsel %vm5623_vm7, %v673_v47, %v674_v44  ;;  %v564_v6 = vrot.slane %v562_v59, 5  ;;  %v681_v14 = vrot.slane %v406_v50, 5 }
  0x54   : >> { %4666 = vmatpush3.bf16.msra.mxu0 %v5248_v7  ;;  %v5844_v0 = vcombine.low %v531_v45, %v541_v55  ;;  %v567_v7 = vshrl.u32 %v5838_v60, 16  ;;  %v570_v8 = vshll.u32 %v5838_v60, 16  ;;  %v550_v10 = vrot.slane %v549_v2, 4  ;;  %v5262_v45 = vld [vmem:[%s7023_s1 + $0x1f0] sm:$0xff]   ;;  %v412_v2 = vld [vmem:[%s5593_s17 + $0x5c] sm:$0x1] }
  0x55   : >> { %4730 = vmatpush3.bf16.msra.mxu1 %v5249_v12  ;;  %4667 = vmatprep.subr.bf16.mxu0 %v5251_v13  ;;  %v559_v11 = vor.u32 %v558_v54, %v554_v3  ;;  %v678_v12 = vrot.slane %v5799_v27, 5  ;;  %v5857_v13 = vcombine.low %v672_v58, %v675_v1  ;;  %v5866_v19 = vcombine.low %v5838_v60, %v5841_v61  ;;  %v5263_v55 = vld [vmem:[%s7023_s1 + $0x130] sm:$0xff]   ;;  %v5266_v1 = vld [vmem:[%s7023_s1 + $0x178] sm:$0xff]  }
  0x56   : >> { %4731 = vmatprep.subr.bf16.mxu1 %v5252_v34  ;;  %v555_v16 = vsel %vm5629_vm8, %v550_v10, %v554_v3  ;;  %v569_v27 = vrot.slane %v567_v7, 4  ;;  %v572_v28 = vrot.slane %v570_v8, 5  ;;  %v576_v30 = vshll.u32 %v5841_v61, 16 }
  0x57   : >> { %1510 = vmatmul.mubr.bf16.gmra.mrb[8].mxu0 %v5678_v63  ;;  %v560_v18 = vrot.slane %v559_v11, 4  ;;  %v680_v20 = vrot.slane %v678_v12, 4  ;;  %v582_v31 = vrot.slane %v580_v9, 4  ;;  %v679_v35 = vsel %vm5623_vm7, %v4097_v62, %v678_v12 }
  0x58   : >> { %1607 = vmatmul.mubr.bf16.gmra.mrb[8].mxu1 %v5759_v57  ;;  %1517 = vmatprep.mubr.bf16.mxu0 %v5802_v29  ;;  %v586_v36 = vshll.u32 %v5875_v26, 16  ;;  %v4098_v40 = vrot.slane %v5838_v60, 9  ;;  %v573_v44 = vor.u32 %v572_v28, %v569_v27  ;;  %v591_v47 = vshrl.u32 %v5884_v37, 16  ;;  %v5268_v28 = vld [vmem:[%s7023_s1 + $0x138] sm:$0xff]  }
  0x59   : >> { %1614 = vmatprep.mubr.bf16.mxu1 %v5770_v4  ;;  %4668 = vmatpush3.bf16.msra.mxu0 %v5253_v32  ;;  %v565_v34 = vsel %vm5629_vm8, %v560_v18, %v564_v6  ;;  %v682_v42 = vsel %vm5623_vm7, %v680_v20, %v681_v14  ;;  %v578_v32 = vrot.slane %v576_v30, 5  ;;  %v685_v52 = vrot.slane %v5841_v61, 5  ;;  %v5264_v61 = vld [vmem:[%s7023_s1 + $0x1b0] sm:$0xff]   ;;  %v5267_v14 = vld [vmem:[%s7023_s1 + $0x1f8] sm:$0xff]   ;;  %v5937_v18 = vld [vmem:[%s5593_s17 + $0x60] sm:$0xf] }
  0x5a   : >> { %4732 = vmatpush3.bf16.msra.mxu1 %v5254_v48  ;;  %4669 = vmatprep.subr.bf16.mxu0 %v5256_v49  ;;  %v5892_v41 = vcombine.low %v555_v16, %v565_v34  ;;  %v588_v46 = vrot.slane %v586_v36, 5  ;;  %v594_v48 = vshll.u32 %v5884_v37, 16  ;;  %v604_v49 = vshrl.u32 %v5887_v38, 16  ;;  %v5940_v20 = vld [vmem:[%s5593_s17 + $0x64] sm:$0xf] }
  0x5b   : >> { %4733 = vmatprep.subr.bf16.mxu1 %v5257_v5  ;;  %v574_v50 = vrot.slane %v573_v44, 4  ;;  %v583_v51 = vor.u32 %v582_v31, %v578_v32  ;;  %v5905_v53 = vcombine.low %v679_v35, %v682_v42  ;;  %v688_v54 = vrot.slane %v5875_v26, 5  ;;  %v5269_v35 = vld [vmem:[%s7023_s1 + $0x1b8] sm:$0xff]   ;;  %v5270_v36 = vld [vmem:[%s7023_s1 + $0x200] sm:$0xff]  }
  0x5c   : >> { %v5915_v60 = vcombine.low %v5884_v37, %v5887_v38  ;;  %v687_v62 = vrot.slane %v685_v52, 4  ;;  %v593_v3 = vrot.slane %v591_v47, 4  ;;  %v596_v5 = vrot.slane %v594_v48, 5  ;;  %v5271_v48 = vld [vmem:[%s7023_s1 + $0x208] sm:$0xff]  }
  0x5d   : >> { %4670 = vmatpush3.bf16.msra.mxu0 %v5258_v15  ;;  %v579_v58 = vsel %vm5629_vm8, %v574_v50, %v578_v32  ;;  %v584_v59 = vrot.slane %v583_v51, 4  ;;  %v600_v6 = vshll.u32 %v5887_v38, 16  ;;  %v606_v7 = vrot.slane %v604_v49, 4 }
  0x5e   : >> { %4734 = vmatpush3.bf16.msra.mxu1 %v5259_v21  ;;  %4671 = vmatprep.subr.bf16.mxu0 %v5261_v22  ;;  %v610_v9 = vshll.u32 %v412_v2, 16  ;;  %v597_v11 = vor.u32 %v596_v5, %v593_v3  ;;  %v686_v15 = vsel %vm5623_vm7, %v4098_v40, %v685_v52  ;;  %v689_v21 = vsel %vm5623_vm7, %v687_v62, %v688_v54  ;;  %v6022_v62 = vld [vmem:[%s5593_s17 + $0x70] sm:$0xf] }
  0x5f   : >> { %1518 = vmatmul.mubr.bf16.gmra.mrb[12].mxu0 %v5722_v33  ;;  %4735 = vmatprep.subr.bf16.mxu1 %v5262_v45  ;;  %v589_v8 = vsel %vm5629_vm8, %v584_v59, %v588_v46  ;;  %v602_v12 = vrot.slane %v600_v6, 5  ;;  %v692_v27 = vrot.slane %v5887_v38, 5  ;;  %v4099_v34 = vrot.slane %v5884_v37, 9  ;;  %v6019_v59 = vld [vmem:[%s5593_s17 + $0x6c] sm:$0xf] }
  0x60   : >> { %1615 = vmatmul.mubr.bf16.gmra.mrb[12].mxu1 %v5811_v39  ;;  %1525 = vmatprep.mubr.bf16.mxu0 %v5844_v0  ;;  %v5927_v10 = vcombine.low %v579_v58, %v589_v8  ;;  %v612_v16 = vrot.slane %v610_v9, 5  ;;  %v598_v22 = vrot.slane %v597_v11, 4  ;;  %v5959_v38 = vcombine.low %v686_v15, %v689_v21  ;;  %v415_v58 = vld [vmem:[%s5593_s17 + $0x68] sm:$0x1] }
  0x61   : >> { %1622 = vmatprep.mubr.bf16.mxu1 %v5816_v43  ;;  %4672 = vmatpush3.bf16.msra.mxu0 %v5263_v55  ;;  %v607_v26 = vor.u32 %v606_v7, %v602_v12  ;;  %v5965_v42 = vcombine.low %v5937_v18, %v5940_v20  ;;  %v694_v44 = vrot.slane %v692_v27, 4  ;;  %v695_v37 = vrot.slane %v412_v2, 5 }
  0x62   : >> { %4736 = vmatpush3.bf16.msra.mxu1 %v5264_v61  ;;  %4673 = vmatprep.subr.bf16.mxu0 %v5266_v1  ;;  %v603_v30 = vsel %vm5629_vm8, %v598_v22, %v602_v12  ;;  %v693_v45 = vsel %vm5623_vm7, %v4099_v34, %v692_v27  ;;  %v701_v49 = vshll.u32 %v5937_v18, 16  ;;  %v711_v50 = vshrl.u32 %v5940_v20, 16  ;;  %v5278_v61 = vld [vmem:[%s7023_s1 + $0x238] sm:$0xff]  }
  0x63   : >> { %4737 = vmatprep.subr.bf16.mxu1 %v5267_v14  ;;  %v608_v31 = vrot.slane %v607_v26, 4  ;;  %v696_v46 = vsel %vm5623_vm7, %v694_v44, %v695_v37  ;;  %v707_v51 = vshll.u32 %v5940_v20, 16  ;;  %v717_v3 = vshll.u32 %v415_v58, 16 }
  0x64   : >> { %v5977_v47 = vcombine.low %v693_v45, %v696_v46  ;;  %v703_v52 = vrot.slane %v701_v49, 5  ;;  %v713_v55 = vrot.slane %v711_v50, 4  ;;  %v732_v5 = vshrl.u32 %v6019_v59, 16 }
  0x65   : >> { %4674 = vmatpush3.bf16.msra.mxu0 %v5268_v28  ;;  %v613_v40 = vsel %vm5629_vm8, %v608_v31, %v612_v16  ;;  %v709_v54 = vrot.slane %v707_v51, 5  ;;  %v735_v6 = vshll.u32 %v6019_v59, 16  ;;  %v741_v7 = vshll.u32 %v6022_v62, 16  ;;  %v418_v16 = vld [vmem:[%s5593_s17 + $0x74] sm:$0x1] }
  0x66   : >> { %4738 = vmatpush3.bf16.msra.mxu1 %v5269_v35  ;;  %5075 = vmatprep.subr.bf16.mxu0 %v5270_v36  ;;  %v5967_v32 = vcombine.low %v603_v30, %v613_v40  ;;  %v719_v9 = vrot.slane %v717_v3, 5  ;;  %v734_v11 = vrot.slane %v732_v5, 4  ;;  %v726_v22 = vrot.slane %v5940_v20, 5 }
  0x67   : >> { %1526 = vmatmul.mubr.bf16.gmra.mrb[16].mxu0 %v5770_v4  ;;  %5139 = vmatprep.subr.bf16.mxu1 %v5270_v36  ;;  %v714_v2 = vor.u32 %v713_v55, %v709_v54  ;;  %v737_v12 = vrot.slane %v735_v6, 5  ;;  %v743_v14 = vrot.slane %v741_v7, 5  ;;  %v751_v30 = vshll.u32 %v418_v16, 16 }
  0x68   : >> { %1623 = vmatmul.mubr.bf16.gmra.mrb[16].mxu1 %v5857_v13  ;;  %1533 = vmatprep.mubr.bf16.mxu0 %v5892_v41  ;;  %v729_v34 = vrot.slane %v415_v58, 5 }
  0x69   : >> { %1630 = vmatprep.mubr.bf16.mxu1 %v5866_v19  ;;  %v715_v8 = vrot.slane %v714_v2, 4  ;;  %v738_v27 = vor.u32 %v737_v12, %v734_v11  ;;  %v753_v40 = vrot.slane %v751_v30, 5 }
  0x6b   : >> { %v720_v26 = vsel %vm5629_vm8, %v715_v8, %v719_v9  ;;  %v739_v35 = vrot.slane %v738_v27, 4 }
  0x6f   : >> { %1534 = vmatmul.mubr.bf16.gmra.mrb[20].mxu0 %v5816_v43 }
  0x70   : >> { %1631 = vmatmul.mubr.bf16.gmra.mrb[20].mxu1 %v5905_v53  ;;  %1541 = vmatprep.mubr.bf16.mxu0 %v5927_v10 }
  0x71   : >> { %1638 = vmatprep.mubr.bf16.mxu1 %v5915_v60 }
  0x77   : >> { %1542 = vmatmul.mubr.bf16.gmra.mrb[24].mxu0 %v5866_v19 }
  0x78   : >> { %1639 = vmatmul.mubr.bf16.gmra.mrb[24].mxu1 %v5959_v38  ;;  %1549 = vmatprep.mubr.bf16.mxu0 %v5967_v32 }
  0x79   : >> { %1646 = vmatprep.mubr.bf16.mxu1 %v5965_v42 }
  0x7f   : >> { %1550 = vmatmul.mubr.bf16.gmra.mrb[28].mxu0 %v5915_v60 }
  0x80   : >> { %1647 = vmatmul.mubr.bf16.gmra.mrb[28].mxu1 %v5977_v47  ;;  %1687 = vmatprep.mubr.bf16.mxu0 %v5714_v23  ;;  %v5272_v23 = vld [vmem:[%s7023_s1 + $0x210] sm:$0xff]  }
  0x81   : >> { %1784 = vmatprep.mubr.bf16.mxu1 %v5757_v56 }
  0x87   : >> { %1688 = vmatmul.mubr.bf16.vlgmr.msra.gmra.mrb[32].mxu0 %v5703_v17  ;;  %v5274_v17 = vld [vmem:[%s7023_s1 + $0x220] sm:$0xff]  }
  0x88   : >> { %1785 = vmatmul.mubr.bf16.vlgmr.msra.gmra.mrb[32].mxu1 %v5678_v63  ;;  %5076 = vmatpush3.bf16.msra.mxu0 %v5270_v36  ;;  %v5273_v63 = vld [vmem:[%s7023_s1 + $0x218] sm:$0xff]  }
  0x89   : >> { %5147 = vmatpush3.bf16.msra.mxu1 %v5270_v36  ;;  %1695 = vmatprep.mubr.bf16.mxu0 %v5759_v57 }
  0x8a   : >> { %1792 = vmatprep.mubr.bf16.mxu1 %v5802_v29  ;;  %5077 = vmatprep.subr.bf16.mxu0 %v5271_v48 }
  0x8b   : >> { %5140 = vmatprep.subr.bf16.mxu1 %v5271_v48 }
  0x8c   : >> { %5078 = vmatpush3.bf16.msra.mxu0 %v5271_v48 }
  0x8d   : >> { %5148 = vmatpush3.bf16.msra.mxu1 %v5271_v48  ;;  %5079 = vmatprep.subr.bf16.mxu0 %v5272_v23  ;;  %v4101_v48 = vrot.slane %v6019_v59, 9 }
  0x8e   : >> { %5141 = vmatprep.subr.bf16.mxu1 %v5272_v23 }
  0x8f   : >> { %1696 = vmatmul.mubr.bf16.gmra.mrb[36].mxu0 %v5757_v56  ;;  %v698_v56 = vshrl.u32 %v5937_v18, 16 }
  0x90   : >> { %1793 = vmatmul.mubr.bf16.gmra.mrb[36].mxu1 %v5722_v33  ;;  %1703 = vmatprep.mubr.bf16.mxu0 %v5811_v39  ;;  %v5275_v33 = vld [vmem:[%s7023_s1 + $0x228] sm:$0xff]  }
  0x91   : >> { %1800 = vmatprep.mubr.bf16.mxu1 %v5844_v0  ;;  %5080 = vmatpush3.bf16.msra.mxu0 %v5272_v23 }
  0x92   : >> { %5149 = vmatpush3.bf16.msra.mxu1 %v5272_v23  ;;  %5081 = vmatprep.subr.bf16.mxu0 %v5273_v63 }
  0x93   : >> { %5142 = vmatprep.subr.bf16.mxu1 %v5273_v63 }
  0x95   : >> { %5082 = vmatpush3.bf16.msra.mxu0 %v5273_v63 }
  0x96   : >> { %5150 = vmatpush3.bf16.msra.mxu1 %v5273_v63  ;;  %5083 = vmatprep.subr.bf16.mxu0 %v5274_v17  ;;  %v763_v63 = vrot.slane %v418_v16, 5 }
  0x97   : >> { %5143 = vmatprep.subr.bf16.mxu1 %v5274_v17  ;;  %1704 = vmatmul.mubr.bf16.gmra.mrb[40].mxu0 %v5802_v29  ;;  %v700_v29 = vrot.slane %v698_v56, 4 }
  0x98   : >> { %1801 = vmatmul.mubr.bf16.gmra.mrb[40].mxu1 %v5770_v4  ;;  %1711 = vmatprep.mubr.bf16.mxu0 %v5857_v13  ;;  %v5276_v4 = vld [vmem:[%s7023_s1 + $0x230] sm:$0xff]  }
  0x99   : >> { %1808 = vmatprep.mubr.bf16.mxu1 %v5892_v41  ;;  %5084 = vmatpush3.bf16.msra.mxu0 %v5274_v17  ;;  %v704_v1 = vor.u32 %v703_v52, %v700_v29 }
  0x9a   : >> { %5151 = vmatpush3.bf16.msra.mxu1 %v5274_v17  ;;  %5085 = vmatprep.subr.bf16.mxu0 %v5275_v33 }
  0x9b   : >> { %5144 = vmatprep.subr.bf16.mxu1 %v5275_v33 }
  0x9d   : >> { %5086 = vmatpush3.bf16.msra.mxu0 %v5275_v33 }
  0x9e   : >> { %5152 = vmatpush3.bf16.msra.mxu1 %v5275_v33  ;;  %5087 = vmatprep.subr.bf16.mxu0 %v5276_v4 }
  0x9f   : >> { %5145 = vmatprep.subr.bf16.mxu1 %v5276_v4  ;;  %1712 = vmatmul.mubr.bf16.gmra.mrb[44].mxu0 %v5844_v0  ;;  %v745_v0 = vshrl.u32 %v6022_v62, 16 }
  0xa0   : >> { %1809 = vmatmul.mubr.bf16.gmra.mrb[44].mxu1 %v5816_v43  ;;  %1719 = vmatprep.mubr.bf16.mxu0 %v5905_v53  ;;  %v705_v43 = vrot.slane %v704_v1, 4 }
  0xa1   : >> { %1816 = vmatprep.mubr.bf16.mxu1 %v5927_v10  ;;  %5088 = vmatpush3.bf16.msra.mxu0 %v5276_v4  ;;  %v747_v15 = vrot.slane %v745_v0, 4 }
  0xa2   : >> { %5153 = vmatpush3.bf16.msra.mxu1 %v5276_v4  ;;  %5089 = vmatprep.subr.bf16.mxu0 %v5278_v61  ;;  %v710_v21 = vsel %vm5629_vm8, %v705_v43, %v709_v54 }
  0xa3   : >> { %5146 = vmatprep.subr.bf16.mxu1 %v5278_v61  ;;  %v748_v28 = vor.u32 %v747_v15, %v743_v14  ;;  %v4127_v31 = vcombine.low %v710_v21, %v720_v26 }
  0xa5   : >> { %5090 = vmatpush3.bf16.msra.mxu0 %v5278_v61  ;;  %v749_v36 = vrot.slane %v748_v28, 4 }
  0xa6   : >> { %5154 = vmatpush3.bf16.msra.mxu1 %v5278_v61 }
  0xa7   : >> { %1720 = vmatmul.mubr.bf16.gmra.mrb[48].mxu0 %v5892_v41  ;;  %v4100_v41 = vrot.slane %v5937_v18, 9  ;;  %v744_v18 = vsel %vm5629_vm8, %v739_v35, %v743_v14  ;;  %v754_v37 = vsel %vm5629_vm8, %v749_v36, %v753_v40 }
  0xa8   : >> { %1817 = vmatmul.mubr.bf16.gmra.mrb[48].mxu1 %v5866_v19  ;;  %1727 = vmatprep.mubr.bf16.mxu0 %v5959_v38  ;;  %v728_v19 = vrot.slane %v726_v22, 4  ;;  %v4130_v46 = vcombine.low %v744_v18, %v754_v37 }
  0xa9   : >> { %1824 = vmatprep.mubr.bf16.mxu1 %v5967_v32  ;;  %v727_v20 = vsel %vm5623_vm7, %v4100_v41, %v726_v22 }
  0xaa   : >> { %v730_v44 = vsel %vm5623_vm7, %v728_v19, %v729_v34 }
  0xab   : >> { %v4128_v45 = vcombine.low %v727_v20, %v730_v44 }
  0xaf   : >> { %1728 = vmatmul.mubr.bf16.gmra.mrb[52].mxu0 %v5927_v10  ;;  %v760_v10 = vrot.slane %v6022_v62, 5 }
  0xb0   : >> { %1825 = vmatmul.mubr.bf16.gmra.mrb[52].mxu1 %v5915_v60  ;;  %1735 = vmatprep.mubr.bf16.mxu0 %v5977_v47  ;;  %v4129_v60 = vcombine.low %v6019_v59, %v6022_v62 }
  0xb1   : >> { %1832 = vmatprep.mubr.bf16.mxu1 %v4127_v31  ;;  %v762_v23 = vrot.slane %v760_v10, 4 }
  0xb7   : >> { %1736 = vmatmul.mubr.bf16.gmra.mrb[56].mxu0 %v5967_v32 }
  0xb8   : >> { %1833 = vmatmul.mubr.bf16.gmra.mrb[56].mxu1 %v5965_v42  ;;  %1743 = vmatprep.mubr.bf16.mxu0 %v4128_v45  ;;  %v761_v42 = vsel %vm5623_vm7, %v4101_v48, %v760_v10 }
  0xb9   : >> { %1840 = vmatprep.mubr.bf16.mxu1 %v4130_v46 }
  0xbf   : >> { %1744 = vmatmul.mubr.bf16.gmra.mrb[60].mxu0 %v4127_v31 }
  0xc0   : >> { %1841 = vmatmul.mubr.bf16.gmra.mrb[60].mxu1 %v4129_v60  ;;  %5091 = vmatprep.mubr.bf16.mxu0 %v5759_v57  ;;  %v764_v57 = vsel %vm5623_vm7, %v762_v23, %v763_v63 }
  0xc1   : >> { %5099 = vmatprep.mubr.bf16.mxu1 %v5959_v38  ;;  %v4131_v38 = vcombine.low %v761_v42, %v764_v57 }
  0xc7   : >> { %5092 = vmatmul.mubr.bf16.vlgmr.msra.gmra.mrb[64].mxu0 %v5811_v39 }
  0xc8   : >> { %5100 = vmatmul.mubr.bf16.vlgmr.msra.gmra.mrb[64].mxu1 %v5977_v47  ;;  %5095 = vmatprep.mubr.bf16.mxu0 %v5857_v13 }
  0xc9   : >> { %5103 = vmatprep.mubr.bf16.mxu1 %v4128_v45 }
  0xcf   : >> { %5096 = vmatmul.mubr.bf16.gmra.mrb[68].mxu0 %v5905_v53 }
  0xd0   : >> { %5104 = vmatmul.mubr.bf16.gmra.mrb[68].mxu1 %v4131_v38 }
 0x11a   : >> { %v4547_v32 = vpop.f32.mrb[0].mxu0 }
 0x11b   : >> { %v4611_v17 = vpop.f32.mrb[0].mxu1  ;;  %v4548_v33 = vpop.f32.mrb[1].mxu0 }
 0x11c   : >> { %v4612_v56 = vpop.f32.mrb[1].mxu1  ;;  %v4549_v39 = vadd.f32 %v4548_v33, %v4547_v32  ;;  %v4550_v47 = vpop.f32.mrb[2].mxu0 }
 0x11d   : >> { %v4613_v49 = vadd.f32 %v4612_v56, %v4611_v17  ;;  %v4614_v50 = vpop.f32.mrb[2].mxu1  ;;  %v4551_v13 = vpop.f32.mrb[3].mxu0 }
 0x11e   : >> { %v4615_v51 = vpop.f32.mrb[3].mxu1  ;;  %v4552_v29 = vadd.f32 %v4551_v13, %v4550_v47 }
 0x11f   : >> { %v6073_v4 = vadd.f32 %v4613_v49, %v4549_v39  ;;  %v4616_v52 = vadd.f32 %v4615_v51, %v4614_v50 }
 0x121   : >> { %v6075_v24 = vadd.f32 %v4616_v52, %v4552_v29 }
 0x122   : >> { %v4553_v54 = vpop.f32.mrb[4].mxu0 }
 0x123   : >> { %v4617_v55 = vpop.f32.mrb[4].mxu1  ;;  %v4554_v53 = vpop.f32.mrb[5].mxu0 }
 0x124   : >> { %v4618_v58 = vpop.f32.mrb[5].mxu1  ;;  %v4555_v59 = vadd.f32 %v4554_v53, %v4553_v54  ;;  %v4556_v61 = vpop.f32.mrb[6].mxu0 }
 0x125   : >> { %v4619_v62 = vadd.f32 %v4618_v58, %v4617_v55  ;;  %v4620_v1 = vpop.f32.mrb[6].mxu1  ;;  %v4557_v2 = vpop.f32.mrb[7].mxu0 }
 0x126   : >> { %v4621_v3 = vpop.f32.mrb[7].mxu1  ;;  %v4558_v6 = vadd.f32 %v4557_v2, %v4556_v61 }
 0x127   : >> { %v6077_v5 = vadd.f32 %v4619_v62, %v4555_v59  ;;  %v4622_v7 = vadd.f32 %v4621_v3, %v4620_v1 }
 0x129   : >> { %v6079_v0 = vadd.f32 %v4622_v7, %v4558_v6 }
 0x12a   : >> { %v4559_v43 = vpop.f32.mrb[8].mxu0 }
 0x12b   : >> { %v4623_v8 = vpop.f32.mrb[8].mxu1  ;;  %v4560_v9 = vpop.f32.mrb[9].mxu0 }
 0x12c   : >> { %v4624_v11 = vpop.f32.mrb[9].mxu1  ;;  %v4561_v12 = vadd.f32 %v4560_v9, %v4559_v43  ;;  %v4562_v15 = vpop.f32.mrb[10].mxu0 }
 0x12d   : >> { %v4625_v14 = vadd.f32 %v4624_v11, %v4623_v8  ;;  %v4626_v16 = vpop.f32.mrb[10].mxu1  ;;  %v4563_v21 = vpop.f32.mrb[11].mxu0 }
 0x12e   : >> { %v4627_v22 = vpop.f32.mrb[11].mxu1  ;;  %v4564_v27 = vadd.f32 %v4563_v21, %v4562_v15 }
 0x12f   : >> { %v6081_v26 = vadd.f32 %v4625_v14, %v4561_v12  ;;  %v4628_v28 = vadd.f32 %v4627_v22, %v4626_v16 }
 0x131   : >> { %v6083_v30 = vadd.f32 %v4628_v28, %v4564_v27 }
 0x132   : >> { %v4565_v31 = vpop.f32.mrb[12].mxu0 }
 0x133   : >> { %v4629_v41 = vpop.f32.mrb[12].mxu1  ;;  %v4566_v34 = vpop.f32.mrb[13].mxu0 }
 0x134   : >> { %v4630_v19 = vpop.f32.mrb[13].mxu1  ;;  %v4567_v35 = vadd.f32 %v4566_v34, %v4565_v31  ;;  %v4568_v40 = vpop.f32.mrb[14].mxu0 }
 0x135   : >> { %v4631_v36 = vadd.f32 %v4630_v19, %v4629_v41  ;;  %v4632_v20 = vpop.f32.mrb[14].mxu1  ;;  %v4569_v44 = vpop.f32.mrb[15].mxu0 }
 0x136   : >> { %v4633_v18 = vpop.f32.mrb[15].mxu1  ;;  %v4570_v45 = vadd.f32 %v4569_v44, %v4568_v40 }
 0x137   : >> { %v6085_v37 = vadd.f32 %v4631_v36, %v4567_v35  ;;  %v4634_v46 = vadd.f32 %v4633_v18, %v4632_v20 }
 0x139   : >> { %v6087_v60 = vadd.f32 %v4634_v46, %v4570_v45 }
 0x13a   : >> { %v4571_v10 = vpop.f32.mrb[16].mxu0 }
 0x13b   : >> { %v4635_v48 = vpop.f32.mrb[16].mxu1  ;;  %v4572_v23 = vpop.f32.mrb[17].mxu0 }
 0x13c   : >> { %v4636_v63 = vpop.f32.mrb[17].mxu1  ;;  %v4573_v42 = vadd.f32 %v4572_v23, %v4571_v10  ;;  %v4574_v38 = vpop.f32.mrb[18].mxu0 }
 0x13d   : >> { %v4637_v57 = vadd.f32 %v4636_v63, %v4635_v48  ;;  %v4638_v32 = vpop.f32.mrb[18].mxu1  ;;  %v4575_v17 = vpop.f32.mrb[19].mxu0 }
 0x13e   : >> { %v4639_v33 = vpop.f32.mrb[19].mxu1  ;;  %v4576_v39 = vadd.f32 %v4575_v17, %v4574_v38 }
 0x13f   : >> { %v6089_v56 = vadd.f32 %v4637_v57, %v4573_v42  ;;  %v4640_v49 = vadd.f32 %v4639_v33, %v4638_v32 }
 0x141   : >> { %v6091_v47 = vadd.f32 %v4640_v49, %v4576_v39 }
 0x142   : >> { %v4577_v50 = vpop.f32.mrb[20].mxu0 }
 0x143   : >> { %v4641_v13 = vpop.f32.mrb[20].mxu1  ;;  %v4578_v51 = vpop.f32.mrb[21].mxu0 }
 0x144   : >> { %v4642_v29 = vpop.f32.mrb[21].mxu1  ;;  %v4579_v52 = vadd.f32 %v4578_v51, %v4577_v50  ;;  %v4580_v55 = vpop.f32.mrb[22].mxu0 }
 0x145   : >> { %v4643_v54 = vadd.f32 %v4642_v29, %v4641_v13  ;;  %v4644_v53 = vpop.f32.mrb[22].mxu1  ;;  %v4581_v58 = vpop.f32.mrb[23].mxu0 }
 0x146   : >> { %v4645_v59 = vpop.f32.mrb[23].mxu1  ;;  %v4582_v61 = vadd.f32 %v4581_v58, %v4580_v55 }
 0x147   : >> { %v6093_v62 = vadd.f32 %v4643_v54, %v4579_v52  ;;  %v4646_v1 = vadd.f32 %v4645_v59, %v4644_v53 }
 0x149   : >> { %v6095_v2 = vadd.f32 %v4646_v1, %v4582_v61 }
 0x14a   : >> { %v4583_v3 = vpop.f32.mrb[24].mxu0 }
 0x14b   : >> { %v4647_v6 = vpop.f32.mrb[24].mxu1  ;;  %v4584_v7 = vpop.f32.mrb[25].mxu0 }
 0x14c   : >> { %v4648_v43 = vpop.f32.mrb[25].mxu1  ;;  %v4585_v8 = vadd.f32 %v4584_v7, %v4583_v3  ;;  %v4586_v11 = vpop.f32.mrb[26].mxu0 }
 0x14d   : >> { %v4649_v9 = vadd.f32 %v4648_v43, %v4647_v6  ;;  %v4650_v12 = vpop.f32.mrb[26].mxu1  ;;  %v4587_v14 = vpop.f32.mrb[27].mxu0 }
 0x14e   : >> { %v4651_v15 = vpop.f32.mrb[27].mxu1  ;;  %v4588_v21 = vadd.f32 %v4587_v14, %v4586_v11 }
 0x14f   : >> { %v6097_v16 = vadd.f32 %v4649_v9, %v4585_v8  ;;  %v4652_v22 = vadd.f32 %v4651_v15, %v4650_v12 }
 0x151   : >> { %v6099_v27 = vadd.f32 %v4652_v22, %v4588_v21 }
 0x152   : >> { %v4589_v28 = vpop.f32.mrb[28].mxu0 }
 0x153   : >> { %v4653_v31 = vpop.f32.mrb[28].mxu1  ;;  %v4590_v41 = vpop.f32.mrb[29].mxu0 }
 0x154   : >> { %v4654_v34 = vpop.f32.mrb[29].mxu1  ;;  %v4591_v19 = vadd.f32 %v4590_v41, %v4589_v28  ;;  %v4592_v36 = vpop.f32.mrb[30].mxu0 }
 0x155   : >> { %v4655_v35 = vadd.f32 %v4654_v34, %v4653_v31  ;;  %v4656_v40 = vpop.f32.mrb[30].mxu1  ;;  %v4593_v20 = vpop.f32.mrb[31].mxu0 }
 0x156   : >> { %v4657_v44 = vpop.f32.mrb[31].mxu1  ;;  %v4594_v45 = vadd.f32 %v4593_v20, %v4592_v36 }
 0x157   : >> { %v6101_v18 = vadd.f32 %v4655_v35, %v4591_v19  ;;  %v4658_v46 = vadd.f32 %v4657_v44, %v4656_v40 }
 0x159   : >> { %v6103_v10 = vadd.f32 %v4658_v46, %v4594_v45 }
 0x15a   : >> { %v4675_v48 = vpop.f32.mrb[32].mxu0 }
 0x15b   : >> { %v4739_v23 = vpop.f32.mrb[32].mxu1  ;;  %v4676_v63 = vpop.f32.mrb[33].mxu0 }
 0x15c   : >> { %v4740_v42 = vpop.f32.mrb[33].mxu1  ;;  %v4677_v57 = vadd.f32 %v4676_v63, %v4675_v48  ;;  %v4678_v32 = vpop.f32.mrb[34].mxu0 }
 0x15d   : >> { %v4741_v38 = vadd.f32 %v4740_v42, %v4739_v23  ;;  %v4742_v17 = vpop.f32.mrb[34].mxu1  ;;  %v4679_v33 = vpop.f32.mrb[35].mxu0 }
 0x15e   : >> { %v4743_v39 = vpop.f32.mrb[35].mxu1  ;;  %v1690_v49 = vadd.f32 %v4677_v57, %v6073_v4  ;;  %v4680_v50 = vadd.f32 %v4679_v33, %v4678_v32 }
 0x15f   : >> { %v4744_v13 = vadd.f32 %v4743_v39, %v4742_v17 }
 0x160   : >> { %v1693_v51 = vadd.f32 %v4680_v50, %v6075_v24  ;;  %v6107_v29 = vadd.f32 %v4741_v38, %v1690_v49 }
 0x162   : >> { %v4681_v52 = vpop.f32.mrb[36].mxu0  ;;  %v6109_v55 = vadd.f32 %v4744_v13, %v1693_v51 }
 0x163   : >> { %v4745_v54 = vpop.f32.mrb[36].mxu1  ;;  %v4682_v53 = vpop.f32.mrb[37].mxu0 }
 0x164   : >> { %v4746_v58 = vpop.f32.mrb[37].mxu1  ;;  %v4683_v59 = vadd.f32 %v4682_v53, %v4681_v52  ;;  %v4684_v1 = vpop.f32.mrb[38].mxu0 }
 0x165   : >> { %v4747_v61 = vadd.f32 %v4746_v58, %v4745_v54  ;;  %v4748_v3 = vpop.f32.mrb[38].mxu1  ;;  %v4685_v6 = vpop.f32.mrb[39].mxu0 }
 0x166   : >> { %v4749_v7 = vpop.f32.mrb[39].mxu1  ;;  %v1698_v4 = vadd.f32 %v4683_v59, %v6077_v5  ;;  %v4686_v43 = vadd.f32 %v4685_v6, %v4684_v1 }
 0x167   : >> { %v4750_v8 = vadd.f32 %v4749_v7, %v4748_v3 }
 0x168   : >> { %v1701_v24 = vadd.f32 %v4686_v43, %v6079_v0  ;;  %v6113_v9 = vadd.f32 %v4747_v61, %v1698_v4 }
 0x16a   : >> { %v4687_v11 = vpop.f32.mrb[40].mxu0  ;;  %v6115_v14 = vadd.f32 %v4750_v8, %v1701_v24 }
 0x16b   : >> { %v4751_v12 = vpop.f32.mrb[40].mxu1  ;;  %v4688_v15 = vpop.f32.mrb[41].mxu0 }
 0x16c   : >> { %v4752_v21 = vpop.f32.mrb[41].mxu1  ;;  %v4689_v22 = vadd.f32 %v4688_v15, %v4687_v11  ;;  %v4690_v31 = vpop.f32.mrb[42].mxu0 }
 0x16d   : >> { %v4753_v28 = vadd.f32 %v4752_v21, %v4751_v12  ;;  %v4754_v41 = vpop.f32.mrb[42].mxu1  ;;  %v4691_v34 = vpop.f32.mrb[43].mxu0 }
 0x16e   : >> { %v4755_v19 = vpop.f32.mrb[43].mxu1  ;;  %v1706_v5 = vadd.f32 %v4689_v22, %v6081_v26  ;;  %v4692_v35 = vadd.f32 %v4691_v34, %v4690_v31 }
 0x16f   : >> { %v4756_v36 = vadd.f32 %v4755_v19, %v4754_v41 }
 0x170   : >> { %v1709_v0 = vadd.f32 %v4692_v35, %v6083_v30  ;;  %v6119_v40 = vadd.f32 %v4753_v28, %v1706_v5 }
 0x172   : >> { %v4693_v20 = vpop.f32.mrb[44].mxu0  ;;  %v6121_v45 = vadd.f32 %v4756_v36, %v1709_v0 }
 0x173   : >> { %v4757_v44 = vpop.f32.mrb[44].mxu1  ;;  %v4694_v46 = vpop.f32.mrb[45].mxu0 }
 0x174   : >> { %v4758_v48 = vpop.f32.mrb[45].mxu1  ;;  %v4695_v23 = vadd.f32 %v4694_v46, %v4693_v20  ;;  %v4696_v42 = vpop.f32.mrb[46].mxu0 }
 0x175   : >> { %v4759_v63 = vadd.f32 %v4758_v48, %v4757_v44  ;;  %v4760_v57 = vpop.f32.mrb[46].mxu1  ;;  %v4697_v38 = vpop.f32.mrb[47].mxu0 }
 0x176   : >> { %v4761_v32 = vpop.f32.mrb[47].mxu1  ;;  %v1714_v26 = vadd.f32 %v4695_v23, %v6085_v37  ;;  %v4698_v17 = vadd.f32 %v4697_v38, %v4696_v42 }
 0x177   : >> { %v4762_v33 = vadd.f32 %v4761_v32, %v4760_v57 }
 0x178   : >> { %v1717_v30 = vadd.f32 %v4698_v17, %v6087_v60  ;;  %v6125_v39 = vadd.f32 %v4759_v63, %v1714_v26 }
 0x17a   : >> { %v4699_v49 = vpop.f32.mrb[48].mxu0  ;;  %v6127_v13 = vadd.f32 %v4762_v33, %v1717_v30 }
 0x17b   : >> { %v4763_v50 = vpop.f32.mrb[48].mxu1  ;;  %v4700_v51 = vpop.f32.mrb[49].mxu0 }
 0x17c   : >> { %v4764_v52 = vpop.f32.mrb[49].mxu1  ;;  %v4701_v54 = vadd.f32 %v4700_v51, %v4699_v49  ;;  %v4702_v58 = vpop.f32.mrb[50].mxu0 }
 0x17d   : >> { %v4765_v53 = vadd.f32 %v4764_v52, %v4763_v50  ;;  %v4766_v59 = vpop.f32.mrb[50].mxu1  ;;  %v4703_v61 = vpop.f32.mrb[51].mxu0 }
 0x17e   : >> { %v4767_v1 = vpop.f32.mrb[51].mxu1  ;;  %v1722_v37 = vadd.f32 %v4701_v54, %v6089_v56  ;;  %v4704_v3 = vadd.f32 %v4703_v61, %v4702_v58 }
 0x17f   : >> { %v4768_v6 = vadd.f32 %v4767_v1, %v4766_v59 }
 0x180   : >> { %v1725_v60 = vadd.f32 %v4704_v3, %v6091_v47  ;;  %v1819_v7 = vadd.f32 %v4765_v53, %v1722_v37  ;;  %v6146_v3 = vld [vmem:[%s7024_s2] ss:$0 sm:$0xff] }
 0x182   : >> { %v4705_v4 = vpop.f32.mrb[52].mxu0  ;;  %v6131_v8 = vadd.f32 %v4768_v6, %v1725_v60 }
 0x183   : >> { %v4769_v43 = vpop.f32.mrb[52].mxu1  ;;  %v4706_v24 = vpop.f32.mrb[53].mxu0 }
 0x184   : >> { %v4770_v11 = vpop.f32.mrb[53].mxu1  ;;  %v4707_v12 = vadd.f32 %v4706_v24, %v4705_v4  ;;  %v4708_v21 = vpop.f32.mrb[54].mxu0 }
 0x185   : >> { %v4771_v15 = vadd.f32 %v4770_v11, %v4769_v43  ;;  %v4772_v22 = vpop.f32.mrb[54].mxu1  ;;  %v4709_v28 = vpop.f32.mrb[55].mxu0 }
 0x186   : >> { %v4773_v31 = vpop.f32.mrb[55].mxu1  ;;  %v1730_v41 = vadd.f32 %v4707_v12, %v6093_v62  ;;  %v4710_v56 = vadd.f32 %v4709_v28, %v4708_v21 }
 0x187   : >> { %v4774_v34 = vadd.f32 %v4773_v31, %v4772_v22 }
 0x188   : >> { %v1733_v19 = vadd.f32 %v4710_v56, %v6095_v2  ;;  %v1827_v47 = vadd.f32 %v4771_v15, %v1730_v41 }
 0x18a   : >> { %v4711_v5 = vpop.f32.mrb[56].mxu0  ;;  %v1830_v36 = vadd.f32 %v4774_v34, %v1733_v19 }
 0x18b   : >> { %v4775_v35 = vpop.f32.mrb[56].mxu1  ;;  %v4712_v0 = vpop.f32.mrb[57].mxu0 }
 0x18c   : >> { %v4776_v20 = vpop.f32.mrb[57].mxu1  ;;  %v4713_v44 = vadd.f32 %v4712_v0, %v4711_v5  ;;  %v4714_v48 = vpop.f32.mrb[58].mxu0 }
 0x18d   : >> { %v4777_v46 = vadd.f32 %v4776_v20, %v4775_v35  ;;  %v4778_v23 = vpop.f32.mrb[58].mxu1  ;;  %v4715_v63 = vpop.f32.mrb[59].mxu0 }
 0x18e   : >> { %v4779_v42 = vpop.f32.mrb[59].mxu1  ;;  %v1738_v57 = vadd.f32 %v4713_v44, %v6097_v16  ;;  %v4716_v38 = vadd.f32 %v4715_v63, %v4714_v48 }
 0x18f   : >> { %v4780_v62 = vadd.f32 %v4779_v42, %v4778_v23 }
 0x190   : >> { %v1741_v32 = vadd.f32 %v4716_v38, %v6099_v27  ;;  %v6137_v26 = vadd.f32 %v4777_v46, %v1738_v57 }
 0x192   : >> { %v4717_v2 = vpop.f32.mrb[60].mxu0  ;;  %v6139_v33 = vadd.f32 %v4780_v62, %v1741_v32 }
 0x193   : >> { %v4781_v17 = vpop.f32.mrb[60].mxu1  ;;  %v4718_v30 = vpop.f32.mrb[61].mxu0 }
 0x194   : >> { %v4782_v49 = vpop.f32.mrb[61].mxu1  ;;  %v4719_v50 = vadd.f32 %v4718_v30, %v4717_v2  ;;  %v4720_v52 = vpop.f32.mrb[62].mxu0 }
 0x195   : >> { %v4783_v51 = vadd.f32 %v4782_v49, %v4781_v17  ;;  %v4784_v54 = vpop.f32.mrb[62].mxu1  ;;  %v4721_v53 = vpop.f32.mrb[63].mxu0 }
 0x196   : >> { %v4785_v58 = vpop.f32.mrb[63].mxu1  ;;  %v1746_v16 = vadd.f32 %v4719_v50, %v6101_v18  ;;  %v4722_v59 = vadd.f32 %v4721_v53, %v4720_v52  ;;  %v6154_v18 = vld [vmem:[%s7025_s3] ss:$0 sm:$0xff] }
 0x197   : >> { %v4786_v61 = vadd.f32 %v4785_v58, %v4784_v54 }
 0x198   : >> { %v1749_v27 = vadd.f32 %v4722_v59, %v6103_v10  ;;  %v1843_v1 = vadd.f32 %v4783_v51, %v1746_v16 }
 0x19a   : >> { %v5093_v37 = vpop.f32.mrb[64].mxu0  ;;  %v6148_v60 = vadd.f32 %v4786_v61, %v1749_v27 }
 0x19b   : >> { %v5101_v6 = vpop.f32.mrb[64].mxu1  ;;  %v1892_v4 = vadd.f32 %v5093_v37, %v6113_v9  ;;  %v1883_v24 = vpop.f32.mrb[65].mxu0 }
 0x19c   : >> { %v1924_v43 = vadd.f32 %v5101_v6, %v1827_v47  ;;  %v1915_v11 = vpop.f32.mrb[65].mxu1  ;;  %v1884_v10 = vadd.f32 %v1883_v24, %v6107_v29  ;;  %v5094_v15 = vpop.f32.mrb[66].mxu0 }
 0x19d   : >> { %v1916_v12 = vadd.f32 %v1915_v11, %v1819_v7  ;;  %v5102_v21 = vpop.f32.mrb[66].mxu1  ;;  %v1955_v22 = vmul.f32 %v6146_v3, %v1892_v4  ;;  %v1895_v9 = vadd.f32 %v5094_v15, %v6115_v14  ;;  %v1886_v41 = vpop.f32.mrb[67].mxu0 }
 0x19e   : >> { %v1963_v28 = vmul.f32 %v6146_v3, %v1924_v43  ;;  %v1927_v31 = vadd.f32 %v5102_v21, %v1830_v36  ;;  %v1918_v56 = vpop.f32.mrb[67].mxu1  ;;  %v1953_v34 = vmul.f32 %v6146_v3, %v1884_v10  ;;  %v1887_v47 = vadd.f32 %v1886_v41, %v6109_v55 }
 0x19f   : >> { %v1961_v19 = vmul.f32 %v6146_v3, %v1916_v12  ;;  %v1919_v29 = vadd.f32 %v1918_v56, %v6131_v8  ;;  %v1978_v7 = vadd.f32 %v6154_v18, %v1955_v22  ;;  %v1956_v35 = vmul.f32 %v6146_v3, %v1895_v9 }
 0x1a0   : >> { %v1986_v5 = vadd.f32 %v6154_v18, %v1963_v28  ;;  %v1964_v14 = vmul.f32 %v6146_v3, %v1927_v31  ;;  %v1976_v36 = vadd.f32 %v6154_v18, %v1953_v34  ;;  %v1954_v20 = vmul.f32 %v6146_v3, %v1887_v47 }
 0x1a1   : >> { %v1984_v0 = vadd.f32 %v6154_v18, %v1961_v19  ;;  %v1962_v44 = vmul.f32 %v6146_v3, %v1919_v29  ;;  %v1994_v55 = vmax.f32 %v1978_v7, 0.0  ;;  %v1979_v8 = vadd.f32 %v6154_v18, %v1956_v35 }
 0x1a2   : >> { %v2002_v46 = vmax.f32 %v1986_v5, 0.0  ;;  %v1987_v48 = vadd.f32 %v6154_v18, %v1964_v14  ;;  %v1992_v23 = vmax.f32 %v1976_v36, 0.0  ;;  %v1977_v42 = vadd.f32 %v6154_v18, %v1954_v20  ;;  %v5097_v38 = vpop.f32.mrb[68].mxu0 }
 0x1a3   : >> { %v2000_v63 = vmax.f32 %v1984_v0, 0.0  ;;  %v1985_v57 = vadd.f32 %v6154_v18, %v1962_v44  ;;  %v5105_v62 = vpop.f32.mrb[68].mxu1  ;;  %v1995_v32 = vmax.f32 %v1979_v8, 0.0  ;;  %v1908_v17 = vadd.f32 %v5097_v38, %v6125_v39  ;;  %v1899_v49 = vpop.f32.mrb[69].mxu0 }
 0x1a4   : >> { %v2003_v2 = vmax.f32 %v1987_v48, 0.0  ;;  %v1940_v30 = vadd.f32 %v5105_v62, %v1843_v1  ;;  %v1931_v50 = vpop.f32.mrb[69].mxu1  ;;  %v4405_v51 = vpack.c.bf16 %v1992_v23, %v1992_v23  ;;  %v1993_v54 = vmax.f32 %v1977_v42, 0.0  ;;  %v5098_v58 = vpop.f32.mrb[70].mxu0 }
 0x1a5   : >> { %v4413_v52 = vpack.c.bf16 %v2000_v63, %v2000_v63  ;;  %v2001_v53 = vmax.f32 %v1985_v57, 0.0  ;;  %v5106_v16 = vpop.f32.mrb[70].mxu1  ;;  %v4443_v59 = vpack.c.bf16 %v1995_v32, %v1994_v55  ;;  %v1959_v27 = vmul.f32 %v6146_v3, %v1908_v17  ;;  %v1902_v6 = vpop.f32.mrb[71].mxu0 }
 0x1a6   : >> { %v4453_v61 = vpack.c.bf16 %v2003_v2, %v2002_v46  ;;  %v1967_v37 = vmul.f32 %v6146_v3, %v1940_v30  ;;  %v1934_v4 = vpop.f32.mrb[71].mxu1  ;;  %4224 = vst [vmem:[%s6182_s15 + $0x1c] sm:$0xf] %v4405_v51  ;;  %v4406_v39 = vpack.c.bf16 %v1993_v54, %v1993_v54  ;;  %v1900_v43 = vadd.f32 %v1899_v49, %v6119_v40 }
 0x1a7   : >> { %4232 = vst [vmem:[%s6182_s15 + $0x6c] sm:$0xf] %v4413_v52  ;;  %v4414_v1 = vpack.c.bf16 %v2001_v53, %v2001_v53  ;;  %v1932_v24 = vadd.f32 %v1931_v50, %v6137_v26  ;;  %4516 = vst [vmem:[%s6182_s15 + $0x30] sm:$0xff] %v4443_v59   ;;  %v1911_v11 = vadd.f32 %v5098_v58, %v6127_v13 }
 0x1a8   : >> { %4518 = vst [vmem:[%s6182_s15 + $0x80] sm:$0xff] %v4453_v61   ;;  %v1943_v10 = vadd.f32 %v5106_v16, %v6148_v60  ;;  %4225 = vst [vmem:[%s6182_s15 + $0x20] sm:$0xf] %v4406_v39  ;;  %v1957_v12 = vmul.f32 %v6146_v3, %v1900_v43  ;;  %v1903_v21 = vadd.f32 %v1902_v6, %v6121_v45 }
 0x1a9   : >> { %4233 = vst [vmem:[%s6182_s15 + $0x70] sm:$0xf] %v4414_v1  ;;  %v1965_v15 = vmul.f32 %v6146_v3, %v1932_v24  ;;  %v1935_v22 = vadd.f32 %v1934_v4, %v6139_v33  ;;  %v1982_v40 = vadd.f32 %v6154_v18, %v1959_v27  ;;  %v1990_v26 = vadd.f32 %v6154_v18, %v1967_v37 }
 0x1aa   : >> { %v1960_v28 = vmul.f32 %v6146_v3, %v1911_v11  ;;  %v1968_v13 = vmul.f32 %v6146_v3, %v1943_v10  ;;  %v1980_v60 = vadd.f32 %v6154_v18, %v1957_v12  ;;  %v1958_v31 = vmul.f32 %v6146_v3, %v1903_v21 }
 0x1ab   : >> { %v1988_v9 = vadd.f32 %v6154_v18, %v1965_v15  ;;  %v1966_v41 = vmul.f32 %v6146_v3, %v1935_v22  ;;  %v1998_v29 = vmax.f32 %v1982_v40, 0.0  ;;  %v2006_v7 = vmax.f32 %v1990_v26, 0.0 }
 0x1ac   : >> { %v1983_v45 = vadd.f32 %v6154_v18, %v1960_v28  ;;  %v1991_v33 = vadd.f32 %v6154_v18, %v1968_v13  ;;  %v1996_v56 = vmax.f32 %v1980_v60, 0.0  ;;  %v1981_v19 = vadd.f32 %v6154_v18, %v1958_v31 }
 0x1ad   : >> { %v2004_v34 = vmax.f32 %v1988_v9, 0.0  ;;  %v1989_v47 = vadd.f32 %v6154_v18, %v1966_v41  ;;  %383 = sbr.rel (!%p381_p4) target bundleno = 37 (0x25), region = 99 }
 0x1ae   : >> { %v1999_v5 = vmax.f32 %v1983_v45, 0.0  ;;  %v2007_v3 = vmax.f32 %v1991_v33, 0.0  ;;  %v4409_v35 = vpack.c.bf16 %v1996_v56, %v1996_v56  ;;  %v1997_v36 = vmax.f32 %v1981_v19, 0.0 }
 0x1af   : >> { %v4417_v14 = vpack.c.bf16 %v2004_v34, %v2004_v34  ;;  %v2005_v0 = vmax.f32 %v1989_v47, 0.0 }
 0x1b0   : >> { %v4448_v20 = vpack.c.bf16 %v1999_v5, %v1998_v29  ;;  %v4458_v44 = vpack.c.bf16 %v2007_v3, %v2006_v7  ;;  %4228 = vst [vmem:[%s6182_s15 + $0x44] sm:$0xf] %v4409_v35  ;;  %v4410_v55 = vpack.c.bf16 %v1997_v36, %v1997_v36 }
 0x1b1   : >> { %4236 = vst [vmem:[%s6182_s15 + $0x94] sm:$0xf] %v4417_v14  ;;  %v4418_v46 = vpack.c.bf16 %v2005_v0, %v2005_v0 }
 0x1b2   : >> { %4517 = vst [vmem:[%s6182_s15 + $0x58] sm:$0xff] %v4448_v20   ;;  %4519 = vst [vmem:[%s6182_s15 + $0xa8] sm:$0xff] %v4458_v44  }
 0x1b3   : >> { %4229 = vst [vmem:[%s6182_s15 + $0x48] sm:$0xf] %v4410_v55  ;;  %4237 = vst [vmem:[%s6182_s15 + $0x98] sm:$0xf] %v4418_v46 }
 0x1b4 LB: >> { %v5279_v18 = vld [vmem:[%s7026_s4 + $0x40] sm:$0xff]   ;;  %v5283_v63 = vld [vmem:[%s7026_s4 + $0x48] sm:$0xff]   ;;  %v5287_v62 = vld [vmem:[%s7026_s4 + $0x50] sm:$0xff]   ;;  %s4421_s9 = smul.u32 160, %s5383_s16  ;;  %vm2142_vm9 = vsmask.f32 4368  ;;  %s5383_s16 = sphi %s6219_s16, %s2097_s16  }
 0x1b5   : >> { %v5280_v8 = vld [vmem:[%s7026_s4 + $0xc0] sm:$0xff]   ;;  %4803 = vmatprep.subr.bf16.mxu0 %v5279_v18  ;;  %v5284_v42 = vld [vmem:[%s7026_s4 + $0xc8] sm:$0xff]   ;;  %v5288_v32 = vld [vmem:[%s7026_s4 + $0xd0] sm:$0xff]   ;;  %vm3830_vm11 = vcmask 1046528   ;;  %s4439_s21 = sshll.u32 %s5383_s16, 6 }
 0x1b6   : >> { %v5281_v48 = vld [vmem:[%s7026_s4] sm:$0xff]   ;;  %4867 = vmatprep.subr.bf16.mxu1 %v5280_v8  ;;  %v5285_v57 = vld [vmem:[%s7026_s4 + $0x8] sm:$0xff]   ;;  %v5289_v2 = vld [vmem:[%s7026_s4 + $0x10] sm:$0xff]   ;;  %s6321_s26 = scalar_lea.vmem [#allocation2], %s4421_s9  ;;  %s6965_s22 = scalar_lea.vmem %s5463_s8, %s4439_s21 }
 0x1b7   : >> { %v5282_v23 = vld [vmem:[%s7026_s4 + $0x80] sm:$0xff]   ;;  %4804 = vmatpush3.bf16.msra.mxu0 %v5281_v48  ;;  %v5286_v38 = vld [vmem:[%s7026_s4 + $0x88] sm:$0xff]   ;;  %v5290_v17 = vld [vmem:[%s7026_s4 + $0x90] sm:$0xff]  }
 0x1b8   : >> { %4868 = vmatpush3.bf16.msra.mxu1 %v5282_v23  ;;  %4805 = vmatprep.subr.bf16.mxu0 %v5283_v63  ;;  %v5291_v30 = vld [vmem:[%s7026_s4 + $0x58] sm:$0xff]   ;;  %v5295_v52 = vld [vmem:[%s7026_s4 + $0x60] sm:$0xff]   ;;  %v5299_v16 = vld [vmem:[%s7026_s4 + $0x68] sm:$0xff]  }
 0x1b9   : >> { %4869 = vmatprep.subr.bf16.mxu1 %v5284_v42  ;;  %v5292_v49 = vld [vmem:[%s7026_s4 + $0xd8] sm:$0xff]   ;;  %v5296_v54 = vld [vmem:[%s7026_s4 + $0xe0] sm:$0xff]   ;;  %v5300_v59 = vld [vmem:[%s7026_s4 + $0xe8] sm:$0xff]  }
 0x1ba   : >> { %v5293_v50 = vld [vmem:[%s7026_s4 + $0x18] sm:$0xff]   ;;  %v5297_v53 = vld [vmem:[%s7026_s4 + $0x20] sm:$0xff]   ;;  %v5301_v61 = vld [vmem:[%s7026_s4 + $0x28] sm:$0xff]  }
 0x1bb   : >> { %4806 = vmatpush3.bf16.msra.mxu0 %v5285_v57  ;;  %v5294_v51 = vld [vmem:[%s7026_s4 + $0x98] sm:$0xff]   ;;  %v5298_v58 = vld [vmem:[%s7026_s4 + $0xa0] sm:$0xff]   ;;  %v5302_v27 = vld [vmem:[%s7026_s4 + $0xa8] sm:$0xff]  }
 0x1bc   : >> { %4870 = vmatpush3.bf16.msra.mxu1 %v5286_v38  ;;  %4807 = vmatprep.subr.bf16.mxu0 %v5287_v62  ;;  %v5303_v37 = vld [vmem:[%s7026_s4 + $0x70] sm:$0xff]   ;;  %v5307_v1 = vld [vmem:[%s7026_s4 + $0x78] sm:$0xff]   ;;  %v2103_v10 = vld [vmem:[%s6321_s26 + $0x8] sm:$0xf] }
 0x1bd   : >> { %4871 = vmatprep.subr.bf16.mxu1 %v5288_v32  ;;  %v5304_v6 = vld [vmem:[%s7026_s4 + $0xf0] sm:$0xff]   ;;  %v5308_v43 = vld [vmem:[%s7026_s4 + $0xf8] sm:$0xff]   ;;  %v2104_v12 = vld [vmem:[%s6321_s26 + $0xc] sm:$0xf]  ;;  %v2150_v21 = vshrl.u32 %v2103_v10, 16  ;;  %v2153_v22 = vshll.u32 %v2103_v10, 16 }
 0x1be   : >> { %v5305_v4 = vld [vmem:[%s7026_s4 + $0x30] sm:$0xff]   ;;  %v5309_v24 = vld [vmem:[%s7026_s4 + $0x38] sm:$0xff]   ;;  %v2159_v40 = vshrl.u32 %v2104_v12, 16  ;;  %v2162_v26 = vshll.u32 %v2104_v12, 16  ;;  %v4261_v13 = vcombine.low %v2103_v10, %v2104_v12  ;;  %v6330_v60 = vld [vmem:[%s6321_s26 + $0x20] sm:$0xf] }
 0x1bf   : >> { %4808 = vmatpush3.bf16.msra.mxu0 %v5289_v2  ;;  %v5306_v39 = vld [vmem:[%s7026_s4 + $0xb0] sm:$0xff]   ;;  %v5310_v11 = vld [vmem:[%s7026_s4 + $0xb8] sm:$0xff]   ;;  %v2152_v41 = vrot.slane %v2150_v21, 7  ;;  %v2323_v33 = vrot.slane %v2150_v21, 4  ;;  %v2324_v56 = vrot.slane %v2153_v22, 5  ;;  %vm6339_vm10 = vmor %vm285_vm1, %vm2142_vm9  ;;  %v2181_v44 = vshrl.u32 %v6330_v60, 16 }
 0x1c0   : >> { %4872 = vmatpush3.bf16.msra.mxu1 %v5290_v17  ;;  %4809 = vmatprep.subr.bf16.mxu0 %v5291_v30  ;;  %v2106_v15 = vld [vmem:[%s6321_s26 + $0x18] sm:$0xf]  ;;  %v6327_v28 = vld [vmem:[%s6321_s26 + $0x1c] sm:$0xf]  ;;  %v2161_v45 = vrot.slane %v2159_v40, 7  ;;  %v2327_v19 = vrot.slane %v2162_v26, 5 }
 0x1c1   : >> { %4873 = vmatprep.subr.bf16.mxu1 %v5292_v49  ;;  %v2167_v9 = vshrl.u32 %v2106_v15, 16  ;;  %v2172_v31 = vshrl.u32 %v6327_v28, 16  ;;  %v2102_v34 = vld [vmem:[%s6321_s26 + $0x4] sm:$0xf]  ;;  %v2329_v47 = vrot.slane %v2159_v40, 4  ;;  %3255 = vmatprep.mubr.bf16.mxu0 %v4261_v13  ;;  %v2155_v3 = vor.u32 %v2153_v22, %v2152_v41  ;;  %v5317_v15 = vld [vmem:[%s7026_s4 + $0x148] sm:$0xff]  }
 0x1c2   : >> { %v2105_v5 = vld [vmem:[%s6321_s26 + $0x10] sm:$0x1]  ;;  %v2157_v35 = vrot.slane %v2152_v41, 4  ;;  %v2164_v14 = vor.u32 %v2162_v26, %v2161_v45  ;;  %v2175_v0 = vshll.u32 %v6327_v28, 16  ;;  %v2184_v55 = vshll.u32 %v6330_v60, 16  ;;  %v5312_v18 = vld [vmem:[%s7026_s4 + $0x140] sm:$0xff]  }
 0x1c3   : >> { %4810 = vmatpush3.bf16.msra.mxu0 %v5293_v50  ;;  %v4244_v29 = vrot.slane %v2167_v9, 11  ;;  %v2174_v7 = vrot.slane %v2172_v31, 7  ;;  %v2145_v46 = vshrl.u32 %v2102_v34, 16  ;;  %v5313_v8 = vld [vmem:[%s7026_s4 + $0x1c0] sm:$0xff]   ;;  %v2325_v23 = vor.u32 %v2324_v56, %v2323_v33  ;;  %v5318_v21 = vld [vmem:[%s7026_s4 + $0x1c8] sm:$0xff]  }
 0x1c4   : >> { %4874 = vmatpush3.bf16.msra.mxu1 %v5294_v51  ;;  %4811 = vmatprep.subr.bf16.mxu0 %v5295_v52  ;;  %v2330_v63 = vor.u32 %v2329_v47, %v2327_v19  ;;  %v2183_v42 = vrot.slane %v2181_v44, 7  ;;  %v2165_v38 = vsel %vm6339_vm10, %v2157_v35, %v2164_v14  ;;  %v2333_v62 = vshll.u32 %v2105_v5, 16  ;;  %v5314_v52 = vld [vmem:[%s7026_s4 + $0x100] sm:$0xff]   ;;  %v5319_v33 = vld [vmem:[%s7026_s4 + $0x108] sm:$0xff]  }
 0x1c5   : >> { %4875 = vmatprep.subr.bf16.mxu1 %v5296_v54  ;;  %v2179_v20 = vrot.slane %v2174_v7, 4  ;;  %v2177_v48 = vor.u32 %v2175_v0, %v2174_v7  ;;  %v4243_v57 = vrot.slane %v2145_v46, 11  ;;  %v2326_v32 = vrot.slane %v2325_v23, 4  ;;  %v2110_v54 = vld [vmem:[%s6321_s26 + $0x2c] sm:$0xf]  ;;  %v5323_v23 = vld [vmem:[%s7026_s4 + $0x1d0] sm:$0xff]  }
 0x1c6   : >> { %v2331_v2 = vrot.slane %v2330_v63, 4  ;;  %v6356_v17 = vcombine.low %v6327_v28, %v6330_v60  ;;  %v2186_v49 = vor.u32 %v2184_v55, %v2183_v42  ;;  %v2335_v51 = vrot.slane %v2333_v62, 5  ;;  %v5320_v28 = vld [vmem:[%s7026_s4 + $0x188] sm:$0xff]   ;;  %v2114_v7 = vld [vmem:[%s6321_s26 + $0x40] sm:$0xf]  ;;  %v5324_v62 = vld [vmem:[%s7026_s4 + $0x110] sm:$0xff]  }
 0x1c7   : >> { %4812 = vmatpush3.bf16.msra.mxu0 %v5297_v53  ;;  %v2178_v30 = vsel %vm6339_vm10, %v4244_v29, %v2177_v48  ;;  %v2156_v50 = vsel %vm6339_vm10, %v4243_v57, %v2155_v3  ;;  %v6367_v53 = vld [vmem:[%s6321_s26 + $0x30] sm:$0xf]  ;;  %v2337_v26 = vrot.slane %v2172_v31, 4  ;;  %v2338_v13 = vrot.slane %v2175_v0, 5  ;;  %v6411_v5 = vld [vmem:[%s6321_s26 + $0x44] sm:$0xf] }
 0x1c8   : >> { %4876 = vmatpush3.bf16.msra.mxu1 %v5298_v58  ;;  %4813 = vmatprep.subr.bf16.mxu0 %v5299_v16  ;;  %v4253_v58 = vcombine.low %v2156_v50, %v2165_v38  ;;  %v2328_v16 = vsel %vm5629_vm8, %v2326_v32, %v2327_v19  ;;  %v2341_v41 = vrot.slane %v2184_v55, 5  ;;  %v2343_v45 = vrot.slane %v2181_v44, 4  ;;  %v6416_v0 = vld [vmem:[%s6321_s26 + $0x48] sm:$0xf]  ;;  %v5322_v44 = vld [vmem:[%s7026_s4 + $0x150] sm:$0xff]  }
 0x1c9   : >> { %4877 = vmatprep.subr.bf16.mxu1 %v5300_v59  ;;  %v5315_v59 = vld [vmem:[%s7026_s4 + $0x180] sm:$0xff]   ;;  %v2339_v34 = vor.u32 %v2338_v13, %v2337_v26  ;;  %v2113_v48 = vld [vmem:[%s6321_s26 + $0x38] sm:$0x1]  ;;  %v2225_v57 = vshrl.u32 %v6416_v0, 16  ;;  %v2228_v38 = vshll.u32 %v6416_v0, 16  ;;  %v5325_v50 = vld [vmem:[%s7026_s4 + $0x190] sm:$0xff]  }
 0x1ca   : >> { %v2344_v47 = vor.u32 %v2343_v45, %v2341_v41 }
 0x1cb   : >> { %4814 = vmatpush3.bf16.msra.mxu0 %v5301_v61  ;;  %v6375_v61 = vld [vmem:[%s6321_s26 + $0x34] sm:$0xf]  ;;  %v2340_v35 = vrot.slane %v2339_v34, 4 }
 0x1cc   : >> { %4878 = vmatpush3.bf16.msra.mxu1 %v5302_v27  ;;  %4815 = vmatprep.subr.bf16.mxu0 %v5303_v37  ;;  %v2189_v27 = vshrl.u32 %v2110_v54, 16  ;;  %v2194_v37 = vshrl.u32 %v6367_v53, 16  ;;  %v2206_v40 = vshll.u32 %v6375_v61, 16  ;;  %v6407_v29 = vcombine.low %v6367_v53, %v6375_v61 }
 0x1cd   : >> { %4879 = vmatprep.subr.bf16.mxu1 %v5304_v6  ;;  %v2109_v6 = vld [vmem:[%s6321_s26 + $0x24] sm:$0x1]  ;;  %v2345_v46 = vrot.slane %v2344_v47, 4  ;;  %v2342_v63 = vsel %vm5629_vm8, %v2340_v35, %v2341_v41  ;;  %v2117_v41 = vld [vmem:[%s6321_s26 + $0x4c] sm:$0x1] }
 0x1ce   : >> { %v4245_v10 = vrot.slane %v2189_v27, 11  ;;  %v2196_v12 = vrot.slane %v2194_v37, 7  ;;  %v2347_v19 = vshll.u32 %v2109_v6, 16  ;;  %v2355_v54 = vrot.slane %v2206_v40, 5 }
 0x1cf   : >> { %4816 = vmatpush3.bf16.msra.mxu0 %v5305_v4  ;;  %v2187_v4 = vsel %vm6339_vm10, %v2179_v20, %v2186_v49  ;;  %v2211_v20 = vshrl.u32 %v2114_v7, 16 }
 0x1d0   : >> { %4880 = vmatpush3.bf16.msra.mxu1 %v5306_v39  ;;  %4817 = vmatprep.subr.bf16.mxu0 %v5307_v1  ;;  %v2336_v39 = vsel %vm5629_vm8, %v2331_v2, %v2335_v51  ;;  %v2197_v1 = vshll.u32 %v6367_v53, 16  ;;  %v2201_v9 = vrot.slane %v2196_v12, 4  ;;  %v2349_v14 = vrot.slane %v2347_v19, 5  ;;  %v5329_v19 = vld [vmem:[%s7026_s4 + $0x118] sm:$0xff]  }
 0x1d1   : >> { %4881 = vmatprep.subr.bf16.mxu1 %v5308_v43  ;;  %v2203_v43 = vshrl.u32 %v6375_v61, 16  ;;  %v4246_v42 = vrot.slane %v2211_v20, 11  ;;  %v5332_v20 = vld [vmem:[%s7026_s4 + $0x160] sm:$0xff]  }
 0x1d2   : >> { %v2199_v60 = vor.u32 %v2197_v1, %v2196_v12  ;;  %v2350_v32 = vsel %vm5629_vm8, %v2345_v46, %v2349_v14  ;;  %v2352_v49 = vrot.slane %v2197_v1, 5  ;;  %v2369_v14 = vrot.slane %v2228_v38, 5 }
 0x1d3   : >> { %4818 = vmatpush3.bf16.msra.mxu0 %v5309_v24  ;;  %v4254_v24 = vcombine.low %v2178_v30, %v2187_v4  ;;  %v2205_v22 = vrot.slane %v2203_v43, 7  ;;  %v2351_v30 = vrot.slane %v2194_v37, 4  ;;  %v6442_v51 = vcombine.low %v2342_v63, %v2350_v32  ;;  %v2122_v63 = vld [vmem:[%s6321_s26 + $0x68] sm:$0xf]  ;;  %v6510_v32 = vld [vmem:[%s6321_s26 + $0x6c] sm:$0xf] }
 0x1d4   : >> { %4882 = vmatpush3.bf16.msra.mxu1 %v5310_v11  ;;  %4931 = vmatprep.subr.bf16.mxu0 %v5312_v18  ;;  %v4269_v11 = vcombine.low %v2328_v16, %v2336_v39  ;;  %v2200_v31 = vsel %vm6339_vm10, %v4245_v10, %v2199_v60  ;;  %v2216_v18 = vshrl.u32 %v6411_v5, 16  ;;  %v2357_v53 = vrot.slane %v2203_v43, 4 }
 0x1d5   : >> { %4995 = vmatprep.subr.bf16.mxu1 %v5313_v8  ;;  %3352 = vmatprep.mubr.bf16.mxu1 %v4254_v24  ;;  %v2208_v56 = vor.u32 %v2206_v40, %v2205_v22  ;;  %v2219_v8 = vshll.u32 %v6411_v5, 16  ;;  %v2353_v27 = vor.u32 %v2352_v49, %v2351_v30  ;;  %v2361_v37 = vshll.u32 %v2113_v48, 16  ;;  %v5328_v40 = vld [vmem:[%s7026_s4 + $0x1d8] sm:$0xff]  }
 0x1d6   : >> { %3256 = vmatmul.mubr.bf16.vlgmr.msra.gmra.mrb[0].mxu0 %v4253_v58  ;;  %v2218_v2 = vrot.slane %v2216_v18, 7  ;;  %v5327_v58 = vld [vmem:[%s7026_s4 + $0x158] sm:$0xff]   ;;  %v2358_v4 = vor.u32 %v2357_v53, %v2355_v54  ;;  %v6455_v43 = vcombine.low %v6411_v5, %v6416_v0  ;;  %v2365_v47 = vrot.slane %v2216_v18, 4  ;;  %v5334_v53 = vld [vmem:[%s7026_s4 + $0x120] sm:$0xff]  }
 0x1d7   : >> { %4932 = vmatpush3.bf16.msra.mxu0 %v5314_v52  ;;  %3263 = vmatprep.mubr.bf16.mxu0 %v6356_v17  ;;  %v2209_v3 = vsel %vm6339_vm10, %v2201_v9, %v2208_v56  ;;  %v2227_v52 = vrot.slane %v2225_v57, 7  ;;  %v2354_v39 = vrot.slane %v2353_v27, 4  ;;  %v2363_v1 = vrot.slane %v2361_v37, 5  ;;  %v5330_v5 = vld [vmem:[%s7026_s4 + $0x198] sm:$0xff]   ;;  %v5335_v37 = vld [vmem:[%s7026_s4 + $0x1a0] sm:$0xff]  }
 0x1d8   : >> { %4933 = vmatprep.subr.bf16.mxu0 %v5317_v15  ;;  %3353 = vmatmul.mubr.bf16.vlgmr.msra.gmra.mrb[0].mxu1 %v4269_v11  ;;  %v6421_v55 = vcombine.low %v2200_v31, %v2209_v3  ;;  %v2221_v16 = vor.u32 %v2219_v8, %v2218_v2  ;;  %v6459_v11 = vld [vmem:[%s6321_s26 + $0x58] sm:$0xf]  ;;  %v2359_v12 = vrot.slane %v2358_v4, 4  ;;  %v6464_v15 = vld [vmem:[%s6321_s26 + $0x5c] sm:$0xf]  ;;  %v2366_v7 = vrot.slane %v2219_v8, 5 }
 0x1d9   : >> { %4996 = vmatpush3.bf16.msra.mxu1 %v5315_v59  ;;  %v2223_v59 = vrot.slane %v2218_v2, 4  ;;  %v2230_v6 = vor.u32 %v2228_v38, %v2227_v52  ;;  %v2238_v22 = vshrl.u32 %v6459_v11, 16  ;;  %v2356_v13 = vsel %vm5629_vm8, %v2354_v39, %v2355_v54  ;;  %v5333_v8 = vld [vmem:[%s7026_s4 + $0x1e0] sm:$0xff]   ;;  %v6513_v2 = vld [vmem:[%s6321_s26 + $0x70] sm:$0xf] }
 0x1da   : >> { %4997 = vmatprep.subr.bf16.mxu1 %v5318_v21  ;;  %3360 = vmatprep.mubr.bf16.mxu1 %v6421_v55  ;;  %v2222_v61 = vsel %vm6339_vm10, %v4246_v42, %v2221_v16  ;;  %v2241_v60 = vshll.u32 %v6459_v11, 16  ;;  %v2247_v9 = vshrl.u32 %v6464_v15, 16  ;;  %v2364_v45 = vsel %vm5629_vm8, %v2359_v12, %v2363_v1  ;;  %v2121_v54 = vld [vmem:[%s6321_s26 + $0x60] sm:$0x1]  ;;  %v5337_v1 = vld [vmem:[%s7026_s4 + $0x168] sm:$0xff]  }
 0x1db   : >> { %4934 = vmatpush3.bf16.msra.mxu0 %v5319_v33  ;;  %v2231_v10 = vsel %vm6339_vm10, %v2223_v59, %v2230_v6  ;;  %v2240_v56 = vrot.slane %v2238_v22, 7  ;;  %v2250_v34 = vshll.u32 %v6464_v15, 16  ;;  %v2371_v0 = vrot.slane %v2225_v57, 4 }
 0x1dc   : >> { %4935 = vmatprep.subr.bf16.mxu0 %v5322_v44  ;;  %v6470_v26 = vcombine.low %v2222_v61, %v2231_v10  ;;  %v2249_v31 = vrot.slane %v2247_v9, 7  ;;  %v2367_v46 = vor.u32 %v2366_v7, %v2365_v47  ;;  %v2375_v18 = vshll.u32 %v2117_v41, 16 }
 0x1dd   : >> { %4998 = vmatpush3.bf16.msra.mxu1 %v5320_v28  ;;  %v6485_v28 = vcombine.low %v2356_v13, %v2364_v45  ;;  %v2243_v3 = vor.u32 %v2241_v60, %v2240_v56  ;;  %v2245_v35 = vrot.slane %v2240_v56, 4  ;;  %v2260_v52 = vshrl.u32 %v6510_v32, 16 }
 0x1de   : >> { %3264 = vmatmul.mubr.bf16.gmra.mrb[4].mxu0 %v4254_v24  ;;  %4999 = vmatprep.subr.bf16.mxu1 %v5323_v23  ;;  %v2118_v24 = vld [vmem:[%s6321_s26 + $0x54] sm:$0xf]  ;;  %v2252_v44 = vor.u32 %v2250_v34, %v2249_v31  ;;  %v2372_v23 = vor.u32 %v2371_v0, %v2369_v14  ;;  %v2368_v57 = vrot.slane %v2367_v46, 4  ;;  %v2377_v38 = vrot.slane %v2375_v18, 5  ;;  %v5340_v18 = vld [vmem:[%s7026_s4 + $0x1a8] sm:$0xff]  }
 0x1df   : >> { %3271 = vmatprep.mubr.bf16.mxu0 %v6407_v29  ;;  %4936 = vmatpush3.bf16.msra.mxu0 %v5324_v62  ;;  %v2233_v21 = vshrl.u32 %v2118_v24, 16  ;;  %v6507_v62 = vcombine.low %v6459_v11, %v6464_v15  ;;  %v2263_v16 = vshll.u32 %v6510_v32, 16  ;;  %v2269_v59 = vshrl.u32 %v6513_v2, 16  ;;  %v2125_v46 = vld [vmem:[%s6321_s26 + $0x74] sm:$0x1] }
 0x1e0   : >> { %3361 = vmatmul.mubr.bf16.gmra.mrb[4].mxu1 %v6442_v51  ;;  %4937 = vmatprep.subr.bf16.mxu0 %v5327_v58  ;;  %v2253_v42 = vsel %vm6339_vm10, %v2245_v35, %v2252_v44  ;;  %v2373_v49 = vrot.slane %v2372_v23, 4  ;;  %v2370_v58 = vsel %vm5629_vm8, %v2368_v57, %v2369_v14  ;;  %v2272_v27 = vshll.u32 %v6513_v2, 16 }
 0x1e1   : >> { %5000 = vmatpush3.bf16.msra.mxu1 %v5325_v50  ;;  %v4247_v33 = vrot.slane %v2233_v21, 11  ;;  %3368 = vmatprep.mubr.bf16.mxu1 %v6470_v26  ;;  %v2255_v50 = vshrl.u32 %v2122_v63, 16  ;;  %v2262_v61 = vrot.slane %v2260_v52, 7  ;;  %v2379_v39 = vrot.slane %v2238_v22, 4  ;;  %v5338_v21 = vld [vmem:[%s7026_s4 + $0x1e8] sm:$0xff]  }
 0x1e2   : >> { %5001 = vmatprep.subr.bf16.mxu1 %v5328_v40  ;;  %v2378_v6 = vsel %vm5629_vm8, %v2373_v49, %v2377_v38  ;;  %v2271_v11 = vrot.slane %v2269_v59, 7  ;;  %v2380_v10 = vrot.slane %v2241_v60, 5  ;;  %v2383_v12 = vrot.slane %v2250_v34, 5  ;;  %v5339_v60 = vld [vmem:[%s7026_s4 + $0x128] sm:$0xff]   ;;  %v5343_v49 = vld [vmem:[%s7026_s4 + $0x1f0] sm:$0xff]  }
 0x1e3   : >> { %4938 = vmatpush3.bf16.msra.mxu0 %v5329_v19  ;;  %v2244_v48 = vsel %vm6339_vm10, %v4247_v33, %v2243_v3  ;;  %v4248_v4 = vrot.slane %v2255_v50, 11  ;;  %v6537_v24 = vcombine.low %v2370_v58, %v2378_v6  ;;  %v2265_v22 = vor.u32 %v2263_v16, %v2262_v61  ;;  %v6560_v3 = vld [vmem:[%s6321_s26 + $0x84] sm:$0xf]  ;;  %v5344_v58 = vld [vmem:[%s7026_s4 + $0x130] sm:$0xff]  }
 0x1e4   : >> { %4939 = vmatprep.subr.bf16.mxu0 %v5332_v20  ;;  %v6515_v30 = vcombine.low %v2244_v48, %v2253_v42  ;;  %v2267_v40 = vrot.slane %v2262_v61, 4  ;;  %v2385_v13 = vrot.slane %v2247_v9, 4  ;;  %v2389_v41 = vshll.u32 %v2121_v54, 16  ;;  %v2126_v9 = vld [vmem:[%s6321_s26 + $0x7c] sm:$0xf]  ;;  %v5342_v42 = vld [vmem:[%s7026_s4 + $0x170] sm:$0xff]  }
 0x1e5   : >> { %5002 = vmatpush3.bf16.msra.mxu1 %v5330_v5  ;;  %v2274_v45 = vor.u32 %v2272_v27, %v2271_v11  ;;  %v2381_v33 = vor.u32 %v2380_v10, %v2379_v39  ;;  %v2266_v56 = vsel %vm6339_vm10, %v4248_v4, %v2265_v22  ;;  %v2393_v19 = vrot.slane %v2260_v52, 4  ;;  %v2127_v5 = vld [vmem:[%s6321_s26 + $0x80] sm:$0xf]  ;;  %v5345_v6 = vld [vmem:[%s7026_s4 + $0x1b0] sm:$0xff]  }
 0x1e6   : >> { %3272 = vmatmul.mubr.bf16.gmra.mrb[8].mxu0 %v6421_v55  ;;  %5003 = vmatprep.subr.bf16.mxu1 %v5333_v8  ;;  %v2386_v34 = vor.u32 %v2385_v13, %v2383_v12  ;;  %v2391_v15 = vrot.slane %v2389_v41, 5  ;;  %v6556_v7 = vcombine.low %v6510_v32, %v6513_v2  ;;  %v2277_v35 = vshrl.u32 %v2126_v9, 16  ;;  %v2130_v10 = vld [vmem:[%s6321_s26 + $0x90] sm:$0xf]  ;;  %v2131_v13 = vld [vmem:[%s6321_s26 + $0x94] sm:$0xf] }
 0x1e7   : >> { %3279 = vmatprep.mubr.bf16.mxu0 %v6455_v43  ;;  %4940 = vmatpush3.bf16.msra.mxu0 %v5334_v53  ;;  %v2275_v31 = vsel %vm6339_vm10, %v2267_v40, %v2274_v45  ;;  %v2382_v47 = vrot.slane %v2381_v33, 4  ;;  %v2282_v20 = vshrl.u32 %v2127_v5, 16  ;;  %v2285_v44 = vshll.u32 %v2127_v5, 16  ;;  %v2132_v41 = vld [vmem:[%s6321_s26 + $0x98] sm:$0xf] }
 0x1e8   : >> { %3369 = vmatmul.mubr.bf16.gmra.mrb[8].mxu1 %v6485_v28  ;;  %4941 = vmatprep.subr.bf16.mxu0 %v5337_v1  ;;  %v6562_v14 = vcombine.low %v2266_v56, %v2275_v31  ;;  %v2387_v0 = vrot.slane %v2386_v34, 4  ;;  %v4249_v48 = vrot.slane %v2277_v35, 11  ;;  %v2291_v23 = vshrl.u32 %v6560_v3, 16 }
 0x1e9   : >> { %3376 = vmatprep.mubr.bf16.mxu1 %v6515_v30  ;;  %5004 = vmatpush3.bf16.msra.mxu1 %v5335_v37  ;;  %v2384_v8 = vsel %vm5629_vm8, %v2382_v47, %v2383_v12  ;;  %v2294_v63 = vshll.u32 %v6560_v3, 16  ;;  %v2284_v38 = vrot.slane %v2282_v20, 7  ;;  %v2394_v32 = vrot.slane %v2263_v16, 5 }
 0x1ea   : >> { %5005 = vmatprep.subr.bf16.mxu1 %v5338_v21  ;;  %v2392_v57 = vsel %vm5629_vm8, %v2387_v0, %v2391_v15  ;;  %v2397_v2 = vrot.slane %v2272_v27, 5  ;;  %v2293_v52 = vrot.slane %v2291_v23, 7  ;;  %v2399_v54 = vrot.slane %v2269_v59, 4  ;;  %v2129_v15 = vld [vmem:[%s6321_s26 + $0x88] sm:$0x1] }
 0x1eb   : >> { %4942 = vmatpush3.bf16.msra.mxu0 %v5339_v60  ;;  %v6582_v50 = vcombine.low %v2384_v8, %v2392_v57  ;;  %v2403_v53 = vshll.u32 %v2125_v46, 16  ;;  %v2287_v16 = vor.u32 %v2285_v44, %v2284_v38  ;;  %v2289_v27 = vrot.slane %v2284_v38, 4  ;;  %v5348_v8 = vld [vmem:[%s7026_s4 + $0x1f8] sm:$0xff]  }
 0x1ec   : >> { %4943 = vmatprep.subr.bf16.mxu0 %v5342_v42  ;;  %v2395_v37 = vor.u32 %v2394_v32, %v2393_v19  ;;  %v2296_v59 = vor.u32 %v2294_v63, %v2293_v52  ;;  %v2400_v4 = vor.u32 %v2399_v54, %v2397_v2  ;;  %v2407_v39 = vrot.slane %v2282_v20, 4 }
 0x1ed   : >> { %5006 = vmatpush3.bf16.msra.mxu1 %v5340_v18  ;;  %v2405_v61 = vrot.slane %v2403_v53, 5  ;;  %v2288_v1 = vsel %vm6339_vm10, %v4249_v48, %v2287_v16  ;;  %v2408_v12 = vrot.slane %v2285_v44, 5  ;;  %v6598_v40 = vcombine.low %v2127_v5, %v6560_v3  ;;  %v5347_v5 = vld [vmem:[%s7026_s4 + $0x178] sm:$0xff]   ;;  %v6629_v53 = vld [vmem:[%s6321_s26 + $0xa8] sm:$0xf] }
 0x1ee   : >> { %3280 = vmatmul.mubr.bf16.gmra.mrb[12].mxu0 %v6470_v26  ;;  %5007 = vmatprep.subr.bf16.mxu1 %v5343_v49  ;;  %v2396_v11 = vrot.slane %v2395_v37, 4  ;;  %v2297_v21 = vsel %vm6339_vm10, %v2289_v27, %v2296_v59  ;;  %v2401_v22 = vrot.slane %v2400_v4, 4  ;;  %v2299_v60 = vshrl.u32 %v2130_v10, 16 }
 0x1ef   : >> { %3287 = vmatprep.mubr.bf16.mxu0 %v6507_v62  ;;  %4944 = vmatpush3.bf16.msra.mxu0 %v5344_v58  ;;  %v6602_v45 = vcombine.low %v2288_v1, %v2297_v21  ;;  %v2304_v56 = vshrl.u32 %v2131_v13, 16  ;;  %v2307_v34 = vshll.u32 %v2131_v13, 16  ;;  %v2313_v31 = vshrl.u32 %v2132_v41, 16  ;;  %v6632_v58 = vld [vmem:[%s6321_s26 + $0xac] sm:$0xf]  ;;  %v5350_v21 = vld [vmem:[%s7026_s4 + $0x1b8] sm:$0xff]  }
 0x1f0   : >> { %3377 = vmatmul.mubr.bf16.gmra.mrb[12].mxu1 %v6537_v24  ;;  %v2398_v33 = vsel %vm5629_vm8, %v2396_v11, %v2397_v2  ;;  %v2406_v9 = vsel %vm5629_vm8, %v2401_v22, %v2405_v61  ;;  %v4250_v19 = vrot.slane %v2299_v60, 11  ;;  %v2316_v47 = vshll.u32 %v2132_v41, 16  ;;  %4945 = vmatprep.subr.bf16.mxu0 %v5347_v5  ;;  %v2133_v61 = vld [vmem:[%s6321_s26 + $0x9c] sm:$0x1] }
 0x1f1   : >> { %3384 = vmatprep.mubr.bf16.mxu1 %v6562_v14  ;;  %5008 = vmatpush3.bf16.msra.mxu1 %v5345_v6  ;;  %v6613_v3 = vcombine.low %v2398_v33, %v2406_v9  ;;  %v2306_v35 = vrot.slane %v2304_v56, 7  ;;  %v2409_v0 = vor.u32 %v2408_v12, %v2407_v39  ;;  %v2411_v20 = vrot.slane %v2294_v63, 5  ;;  %v5349_v39 = vld [vmem:[%s7026_s4 + $0x138] sm:$0xff]   ;;  %v5351_v9 = vld [vmem:[%s7026_s4 + $0x200] sm:$0xff]  }
 0x1f2   : >> { %v2315_v44 = vrot.slane %v2313_v31, 7  ;;  %v2413_v46 = vrot.slane %v2291_v23, 4  ;;  %v2417_v18 = vshll.u32 %v2129_v15, 16  ;;  %v6620_v38 = vcombine.low %v2131_v13, %v2132_v41  ;;  %v2134_v23 = vld [vmem:[%s6321_s26 + $0xa4] sm:$0xf]  ;;  %5009 = vmatprep.subr.bf16.mxu1 %v5348_v8 }
 0x1f3   : >> { %v2309_v48 = vor.u32 %v2307_v34, %v2306_v35  ;;  %v2311_v42 = vrot.slane %v2306_v35, 4  ;;  %v2410_v57 = vrot.slane %v2409_v0, 4  ;;  %v2421_v49 = vrot.slane %v2304_v56, 4  ;;  %4946 = vmatpush3.bf16.msra.mxu0 %v5349_v39 }
 0x1f4   : >> { %v2318_v63 = vor.u32 %v2316_v47, %v2315_v44  ;;  %v2414_v32 = vor.u32 %v2413_v46, %v2411_v20  ;;  %v2419_v2 = vrot.slane %v2417_v18, 5  ;;  %v2436_v16 = vshrl.u32 %v2134_v23, 16  ;;  %5107 = vmatprep.subr.bf16.mxu0 %v5351_v9 }
 0x1f5   : >> { %v2310_v52 = vsel %vm6339_vm10, %v4250_v19, %v2309_v48  ;;  %v2412_v54 = vsel %vm5629_vm8, %v2410_v57, %v2411_v20  ;;  %v2422_v27 = vrot.slane %v2307_v34, 5  ;;  %v2441_v59 = vshrl.u32 %v6629_v53, 16  ;;  %5010 = vmatpush3.bf16.msra.mxu1 %v5350_v21  ;;  %v5352_v57 = vld [vmem:[%s7026_s4 + $0x208] sm:$0xff]  }
 0x1f6   : >> { %3288 = vmatmul.mubr.bf16.gmra.mrb[16].mxu0 %v6515_v30  ;;  %v2319_v37 = vsel %vm6339_vm10, %v2311_v42, %v2318_v63  ;;  %v2415_v6 = vrot.slane %v2414_v32, 4  ;;  %v2444_v4 = vshll.u32 %v6629_v53, 16  ;;  %v4251_v11 = vrot.slane %v2436_v16, 11  ;;  %5155 = vmatprep.subr.bf16.mxu1 %v5351_v9  ;;  %v5353_v63 = vld [vmem:[%s7026_s4 + $0x210] sm:$0xff]  }
 0x1f7   : >> { %3295 = vmatprep.mubr.bf16.mxu0 %v6556_v7  ;;  %v6642_v1 = vcombine.low %v2310_v52, %v2319_v37  ;;  %v2450_v10 = vshrl.u32 %v6632_v58, 16  ;;  %v2453_v12 = vshll.u32 %v6632_v58, 16  ;;  %v2443_v13 = vrot.slane %v2441_v59, 7  ;;  %v2139_v52 = vld [vmem:[%s6321_s26 + $0xbc] sm:$0xf] }
 0x1f8   : >> { %3385 = vmatmul.mubr.bf16.gmra.mrb[16].mxu1 %v6582_v50  ;;  %v2420_v22 = vsel %vm5629_vm8, %v2415_v6, %v2419_v2  ;;  %v2423_v41 = vor.u32 %v2422_v27, %v2421_v49  ;;  %v2425_v60 = vrot.slane %v2316_v47, 5  ;;  %v2427_v34 = vrot.slane %v2313_v31, 4 }
 0x1f9   : >> { %3392 = vmatprep.mubr.bf16.mxu1 %v6602_v45  ;;  %v6654_v33 = vcombine.low %v2412_v54, %v2420_v22  ;;  %v2452_v56 = vrot.slane %v2450_v10, 7  ;;  %v2431_v15 = vshll.u32 %v2133_v61, 16  ;;  %v2446_v19 = vor.u32 %v2444_v4, %v2443_v13  ;;  %v2140_v54 = vld [vmem:[%s6321_s26 + $0xc0] sm:$0xf] }
 0x1fa   : >> { %v2448_v47 = vrot.slane %v2443_v13, 4  ;;  %v2424_v5 = vrot.slane %v2423_v41, 4  ;;  %v2428_v0 = vor.u32 %v2427_v34, %v2425_v60  ;;  %v2463_v32 = vrot.slane %v2450_v10, 4 }
 0x1fb   : >> { %v2455_v35 = vor.u32 %v2453_v12, %v2452_v56  ;;  %v2433_v31 = vrot.slane %v2431_v15, 5  ;;  %v2447_v20 = vsel %vm6339_vm10, %v4251_v11, %v2446_v19  ;;  %v2477_v6 = vshrl.u32 %v2139_v52, 16  ;;  %v2141_v19 = vld [vmem:[%s6321_s26 + $0xc4] sm:$0x1] }
 0x1fc   : >> { %v2429_v46 = vrot.slane %v2428_v0, 4  ;;  %v2426_v8 = vsel %vm5629_vm8, %v2424_v5, %v2425_v60  ;;  %v2480_v39 = vshll.u32 %v2139_v52, 16  ;;  %v2489_v10 = vshll.u32 %v2140_v54, 16 }
 0x1fd   : >> { %v2456_v44 = vsel %vm6339_vm10, %v2448_v47, %v2455_v35  ;;  %v2479_v11 = vrot.slane %v2477_v6, 7  ;;  %v2493_v34 = vrot.slane %v2477_v6, 4  ;;  %v2503_v35 = vshll.u32 %v2141_v19, 16 }
 0x1fe   : >> { %3296 = vmatmul.mubr.bf16.gmra.mrb[20].mxu0 %v6562_v14  ;;  %v6672_v18 = vcombine.low %v2447_v20, %v2456_v44  ;;  %v2434_v48 = vsel %vm5629_vm8, %v2429_v46, %v2433_v31  ;;  %v2494_v15 = vrot.slane %v2480_v39, 5 }
 0x1ff   : >> { %3303 = vmatprep.mubr.bf16.mxu0 %v6598_v40  ;;  %v6679_v42 = vcombine.low %v2426_v8, %v2434_v48  ;;  %v2482_v22 = vor.u32 %v2480_v39, %v2479_v11  ;;  %v2484_v13 = vrot.slane %v2479_v11, 4  ;;  %v2505_v31 = vrot.slane %v2503_v35, 5 }
 0x200   : >> { %3393 = vmatmul.mubr.bf16.gmra.mrb[20].mxu1 %v6613_v3  ;;  %v2495_v47 = vor.u32 %v2494_v15, %v2493_v34 }
 0x201   : >> { %3400 = vmatprep.mubr.bf16.mxu1 %v6642_v1 }
 0x202   : >> { %v2496_v0 = vrot.slane %v2495_v47, 4 }
 0x206   : >> { %3304 = vmatmul.mubr.bf16.gmra.mrb[24].mxu0 %v6602_v45 }
 0x207   : >> { %3311 = vmatprep.mubr.bf16.mxu0 %v6620_v38 }
 0x208   : >> { %3401 = vmatmul.mubr.bf16.gmra.mrb[24].mxu1 %v6654_v33 }
 0x209   : >> { %3408 = vmatprep.mubr.bf16.mxu1 %v6672_v18 }
 0x20e   : >> { %3312 = vmatmul.mubr.bf16.gmra.mrb[28].mxu0 %v6642_v1 }
 0x20f   : >> { %3449 = vmatprep.mubr.bf16.mxu0 %v6442_v51  ;;  %v5358_v51 = vld [vmem:[%s7026_s4 + $0x230] sm:$0xff]  }
 0x210   : >> { %3409 = vmatmul.mubr.bf16.gmra.mrb[28].mxu1 %v6679_v42 }
 0x211   : >> { %3546 = vmatprep.mubr.bf16.mxu1 %v6407_v29 }
 0x216   : >> { %3450 = vmatmul.mubr.bf16.vlgmr.msra.gmra.mrb[32].mxu0 %v6356_v17  ;;  %v5354_v17 = vld [vmem:[%s7026_s4 + $0x218] sm:$0xff]  }
 0x217   : >> { %5108 = vmatpush3.bf16.msra.mxu0 %v5351_v9  ;;  %3457 = vmatprep.mubr.bf16.mxu0 %v6485_v28 }
 0x218   : >> { %5109 = vmatprep.subr.bf16.mxu0 %v5352_v57  ;;  %3547 = vmatmul.mubr.bf16.vlgmr.msra.gmra.mrb[32].mxu1 %v6421_v55  ;;  %v5355_v55 = vld [vmem:[%s7026_s4 + $0x220] sm:$0xff]  }
 0x219   : >> { %5163 = vmatpush3.bf16.msra.mxu1 %v5351_v9  ;;  %3554 = vmatprep.mubr.bf16.mxu1 %v6455_v43 }
 0x21a   : >> { %5156 = vmatprep.subr.bf16.mxu1 %v5352_v57 }
 0x21b   : >> { %5110 = vmatpush3.bf16.msra.mxu0 %v5352_v57 }
 0x21c   : >> { %5111 = vmatprep.subr.bf16.mxu0 %v5353_v63 }
 0x21d   : >> { %5164 = vmatpush3.bf16.msra.mxu1 %v5352_v57 }
 0x21e   : >> { %3458 = vmatmul.mubr.bf16.gmra.mrb[36].mxu0 %v6407_v29  ;;  %5157 = vmatprep.subr.bf16.mxu1 %v5353_v63  ;;  %v5356_v29 = vld [vmem:[%s7026_s4 + $0x228] sm:$0xff]  }
 0x21f   : >> { %3465 = vmatprep.mubr.bf16.mxu0 %v6537_v24  ;;  %5112 = vmatpush3.bf16.msra.mxu0 %v5353_v63 }
 0x220   : >> { %3555 = vmatmul.mubr.bf16.gmra.mrb[36].mxu1 %v6470_v26  ;;  %5113 = vmatprep.subr.bf16.mxu0 %v5354_v17  ;;  %v2457_v26 = vrot.slane %v2441_v59, 4  ;;  %v2486_v59 = vshrl.u32 %v2140_v54, 16 }
 0x221   : >> { %3562 = vmatprep.mubr.bf16.mxu1 %v6507_v62  ;;  %5165 = vmatpush3.bf16.msra.mxu1 %v5353_v63 }
 0x222   : >> { %5158 = vmatprep.subr.bf16.mxu1 %v5354_v17  ;;  %v2499_v9 = vrot.slane %v2486_v59, 4 }
 0x223   : >> { %5114 = vmatpush3.bf16.msra.mxu0 %v5354_v17 }
 0x224   : >> { %5115 = vmatprep.subr.bf16.mxu0 %v5355_v55 }
 0x225   : >> { %5166 = vmatpush3.bf16.msra.mxu1 %v5354_v17 }
 0x226   : >> { %3466 = vmatmul.mubr.bf16.gmra.mrb[40].mxu0 %v6455_v43  ;;  %5159 = vmatprep.subr.bf16.mxu1 %v5355_v55  ;;  %v5360_v43 = vld [vmem:[%s7026_s4 + $0x238] sm:$0xff]  }
 0x227   : >> { %3473 = vmatprep.mubr.bf16.mxu0 %v6582_v50  ;;  %5116 = vmatpush3.bf16.msra.mxu0 %v5355_v55 }
 0x228   : >> { %3563 = vmatmul.mubr.bf16.gmra.mrb[40].mxu1 %v6515_v30  ;;  %5117 = vmatprep.subr.bf16.mxu0 %v5356_v29  ;;  %v2461_v30 = vrot.slane %v2453_v12, 5 }
 0x229   : >> { %3570 = vmatprep.mubr.bf16.mxu1 %v6556_v7  ;;  %5167 = vmatpush3.bf16.msra.mxu1 %v5355_v55 }
 0x22a   : >> { %5160 = vmatprep.subr.bf16.mxu1 %v5356_v29  ;;  %v2464_v23 = vor.u32 %v2463_v32, %v2461_v30 }
 0x22b   : >> { %5118 = vmatpush3.bf16.msra.mxu0 %v5356_v29 }
 0x22c   : >> { %5119 = vmatprep.subr.bf16.mxu0 %v5358_v51  ;;  %v2465_v27 = vrot.slane %v2464_v23, 4 }
 0x22d   : >> { %5168 = vmatpush3.bf16.msra.mxu1 %v5356_v29 }
 0x22e   : >> { %3474 = vmatmul.mubr.bf16.gmra.mrb[44].mxu0 %v6507_v62  ;;  %5161 = vmatprep.subr.bf16.mxu1 %v5358_v51  ;;  %v2458_v62 = vrot.slane %v2444_v4, 5  ;;  %v2138_v4 = vld [vmem:[%s6321_s26 + $0xb8] sm:$0xf] }
 0x22f   : >> { %3481 = vmatprep.mubr.bf16.mxu0 %v6613_v3  ;;  %5120 = vmatpush3.bf16.msra.mxu0 %v5358_v51  ;;  %v2472_v12 = vshrl.u32 %v2138_v4, 16 }
 0x230   : >> { %3571 = vmatmul.mubr.bf16.gmra.mrb[44].mxu1 %v6562_v14  ;;  %5121 = vmatprep.subr.bf16.mxu0 %v5360_v43  ;;  %v2137_v14 = vld [vmem:[%s6321_s26 + $0xb0] sm:$0x1]  ;;  %v2459_v2 = vor.u32 %v2458_v62, %v2457_v26  ;;  %s4358_s26 = smul.u32 96, %s5383_s16  ;;  %s2097_s16 = sadd.s32 1, %s5383_s16  }
 0x231   : >> { %3578 = vmatprep.mubr.bf16.mxu1 %v6598_v40  ;;  %5169 = vmatpush3.bf16.msra.mxu1 %v5358_v51  ;;  %v2467_v49 = vshll.u32 %v2137_v14, 16  ;;  %v4252_v21 = vrot.slane %v2472_v12, 11  ;;  %p2094_p5 = scmp.ge.s32.totalorder %s2097_s16, 2  }
 0x232   : >> { %5162 = vmatprep.subr.bf16.mxu1 %v5360_v43  ;;  %v2460_v16 = vrot.slane %v2459_v2, 4  ;;  %s6826_s14 = scalar_lea.vmem %s5470_s11, %s4358_s26 }
 0x233   : >> { %5122 = vmatpush3.bf16.msra.mxu0 %v5360_v43  ;;  %v2469_v37 = vrot.slane %v2467_v49, 5 }
 0x235   : >> { %5170 = vmatpush3.bf16.msra.mxu1 %v5360_v43  ;;  %v2470_v61 = vsel %vm5629_vm8, %v2465_v27, %v2469_v37 }
 0x236   : >> { %3482 = vmatmul.mubr.bf16.gmra.mrb[48].mxu0 %v6556_v7  ;;  %v4278_v7 = vcombine.low %v6629_v53, %v6632_v58  ;;  %v4281_v58 = vcombine.low %v2139_v52, %v2140_v54 }
 0x237   : >> { %3489 = vmatprep.mubr.bf16.mxu0 %v6654_v33 }
 0x238   : >> { %3579 = vmatmul.mubr.bf16.gmra.mrb[48].mxu1 %v6602_v45  ;;  %v2462_v45 = vsel %vm5629_vm8, %v2460_v16, %v2461_v30 }
 0x239   : >> { %3586 = vmatprep.mubr.bf16.mxu1 %v6620_v38  ;;  %v4279_v53 = vcombine.low %v2462_v45, %v2470_v61 }
 0x23e   : >> { %3490 = vmatmul.mubr.bf16.gmra.mrb[52].mxu0 %v6598_v40  ;;  %v2488_v40 = vrot.slane %v2486_v59, 7 }
 0x23f   : >> { %3497 = vmatprep.mubr.bf16.mxu0 %v6679_v42 }
 0x240   : >> { %3587 = vmatmul.mubr.bf16.gmra.mrb[52].mxu1 %v6642_v1  ;;  %v2491_v41 = vor.u32 %v2489_v10, %v2488_v40  ;;  %v2483_v1 = vsel %vm6339_vm10, %v4252_v21, %v2482_v22 }
 0x241   : >> { %3594 = vmatprep.mubr.bf16.mxu1 %v4278_v7 }
 0x242   : >> { %v2492_v60 = vsel %vm6339_vm10, %v2484_v13, %v2491_v41 }
 0x243   : >> { %v4280_v56 = vcombine.low %v2483_v1, %v2492_v60 }
 0x246   : >> { %3498 = vmatmul.mubr.bf16.gmra.mrb[56].mxu0 %v6620_v38  ;;  %v2497_v38 = vrot.slane %v2489_v10, 5 }
 0x247   : >> { %3505 = vmatprep.mubr.bf16.mxu0 %v4279_v53 }
 0x248   : >> { %3595 = vmatmul.mubr.bf16.gmra.mrb[56].mxu1 %v6672_v18  ;;  %v2500_v5 = vor.u32 %v2499_v9, %v2497_v38 }
 0x249   : >> { %3602 = vmatprep.mubr.bf16.mxu1 %v4281_v58 }
 0x24a   : >> { %v2501_v36 = vrot.slane %v2500_v5, 4 }
 0x24c   : >> { %v2506_v20 = vsel %vm5629_vm8, %v2501_v36, %v2505_v31 }
 0x24e   : >> { %3506 = vmatmul.mubr.bf16.gmra.mrb[60].mxu0 %v4278_v7 }
 0x24f   : >> { %5123 = vmatprep.mubr.bf16.mxu0 %v6485_v28  ;;  %v2498_v28 = vsel %vm5629_vm8, %v2496_v0, %v2497_v38 }
 0x250   : >> { %3603 = vmatmul.mubr.bf16.gmra.mrb[60].mxu1 %v4280_v56 }
 0x251   : >> { %5131 = vmatprep.mubr.bf16.mxu1 %v6654_v33  ;;  %v4282_v33 = vcombine.low %v2498_v28, %v2506_v20 }
 0x256   : >> { %5124 = vmatmul.mubr.bf16.vlgmr.msra.gmra.mrb[64].mxu0 %v6537_v24 }
 0x257   : >> { %5127 = vmatprep.mubr.bf16.mxu0 %v6582_v50 }
 0x258   : >> { %5132 = vmatmul.mubr.bf16.vlgmr.msra.gmra.mrb[64].mxu1 %v6679_v42 }
 0x259   : >> { %5135 = vmatprep.mubr.bf16.mxu1 %v4279_v53 }
 0x25e   : >> { %5128 = vmatmul.mubr.bf16.gmra.mrb[68].mxu0 %v6613_v3 }
 0x260   : >> { %5136 = vmatmul.mubr.bf16.gmra.mrb[68].mxu1 %v4282_v33 }
 0x2a9   : >> { %v4819_v44 = vpop.f32.mrb[0].mxu0 }
 0x2aa   : >> { %v4820_v24 = vpop.f32.mrb[1].mxu0 }
 0x2ab   : >> { %v4821_v46 = vadd.f32 %v4820_v24, %v4819_v44  ;;  %v4822_v18 = vpop.f32.mrb[2].mxu0  ;;  %v4883_v8 = vpop.f32.mrb[0].mxu1 }
 0x2ac   : >> { %v4823_v48 = vpop.f32.mrb[3].mxu0  ;;  %v4884_v50 = vpop.f32.mrb[1].mxu1 }
 0x2ad   : >> { %v4824_v57 = vadd.f32 %v4823_v48, %v4822_v18  ;;  %v4885_v42 = vadd.f32 %v4884_v50, %v4883_v8  ;;  %v4886_v63 = vpop.f32.mrb[2].mxu1 }
 0x2ae   : >> { %v4887_v17 = vpop.f32.mrb[3].mxu1 }
 0x2af   : >> { %v6764_v55 = vadd.f32 %v4885_v42, %v4821_v46  ;;  %v4888_v29 = vadd.f32 %v4887_v17, %v4886_v63 }
 0x2b1   : >> { %v4825_v51 = vpop.f32.mrb[4].mxu0  ;;  %v6766_v43 = vadd.f32 %v4888_v29, %v4824_v57 }
 0x2b2   : >> { %v4826_v26 = vpop.f32.mrb[5].mxu0 }
 0x2b3   : >> { %v4827_v3 = vadd.f32 %v4826_v26, %v4825_v51  ;;  %v4828_v62 = vpop.f32.mrb[6].mxu0  ;;  %v4889_v30 = vpop.f32.mrb[4].mxu1 }
 0x2b4   : >> { %v4829_v32 = vpop.f32.mrb[7].mxu0  ;;  %v4890_v14 = vpop.f32.mrb[5].mxu1 }
 0x2b5   : >> { %v4830_v2 = vadd.f32 %v4829_v32, %v4828_v62  ;;  %v4891_v23 = vadd.f32 %v4890_v14, %v4889_v30  ;;  %v4892_v49 = vpop.f32.mrb[6].mxu1 }
 0x2b6   : >> { %v4893_v52 = vpop.f32.mrb[7].mxu1 }
 0x2b7   : >> { %v6768_v54 = vadd.f32 %v4891_v23, %v4827_v3  ;;  %v4894_v16 = vadd.f32 %v4893_v52, %v4892_v49 }
 0x2b9   : >> { %v4831_v27 = vpop.f32.mrb[8].mxu0  ;;  %v6770_v37 = vadd.f32 %v4894_v16, %v4830_v2 }
 0x2ba   : >> { %v4832_v7 = vpop.f32.mrb[9].mxu0 }
 0x2bb   : >> { %v4833_v6 = vadd.f32 %v4832_v7, %v4831_v27  ;;  %v4834_v59 = vpop.f32.mrb[10].mxu0  ;;  %v4895_v4 = vpop.f32.mrb[8].mxu1 }
 0x2bc   : >> { %v4835_v45 = vpop.f32.mrb[11].mxu0  ;;  %v4896_v61 = vpop.f32.mrb[9].mxu1 }
 0x2bd   : >> { %v4836_v39 = vadd.f32 %v4835_v45, %v4834_v59  ;;  %v4897_v11 = vadd.f32 %v4896_v61, %v4895_v4  ;;  %v4898_v40 = vpop.f32.mrb[10].mxu1 }
 0x2be   : >> { %v4899_v10 = vpop.f32.mrb[11].mxu1 }
 0x2bf   : >> { %v6772_v12 = vadd.f32 %v4897_v11, %v4833_v6  ;;  %v4900_v53 = vadd.f32 %v4899_v10, %v4898_v40 }
 0x2c1   : >> { %v4837_v58 = vpop.f32.mrb[12].mxu0  ;;  %v6774_v21 = vadd.f32 %v4900_v53, %v4836_v39 }
 0x2c2   : >> { %v4838_v22 = vpop.f32.mrb[13].mxu0 }
 0x2c3   : >> { %v4839_v13 = vadd.f32 %v4838_v22, %v4837_v58  ;;  %v4840_v41 = vpop.f32.mrb[14].mxu0  ;;  %v4901_v1 = vpop.f32.mrb[12].mxu1 }
 0x2c4   : >> { %v4841_v60 = vpop.f32.mrb[15].mxu0  ;;  %v4902_v56 = vpop.f32.mrb[13].mxu1 }
 0x2c5   : >> { %v4842_v34 = vadd.f32 %v4841_v60, %v4840_v41  ;;  %v4903_v15 = vadd.f32 %v4902_v56, %v4901_v1  ;;  %v4904_v38 = vpop.f32.mrb[14].mxu1 }
 0x2c6   : >> { %v4905_v9 = vpop.f32.mrb[15].mxu1 }
 0x2c7   : >> { %v6776_v19 = vadd.f32 %v4903_v15, %v4839_v13  ;;  %v4906_v47 = vadd.f32 %v4905_v9, %v4904_v38 }
 0x2c9   : >> { %v4843_v5 = vpop.f32.mrb[16].mxu0  ;;  %v6778_v35 = vadd.f32 %v4906_v47, %v4842_v34 }
 0x2ca   : >> { %v4844_v0 = vpop.f32.mrb[17].mxu0 }
 0x2cb   : >> { %v4845_v36 = vadd.f32 %v4844_v0, %v4843_v5  ;;  %v4846_v31 = vpop.f32.mrb[18].mxu0  ;;  %v4907_v28 = vpop.f32.mrb[16].mxu1 }
 0x2cc   : >> { %v4847_v20 = vpop.f32.mrb[19].mxu0  ;;  %v4908_v33 = vpop.f32.mrb[17].mxu1 }
 0x2cd   : >> { %v4848_v44 = vadd.f32 %v4847_v20, %v4846_v31  ;;  %v4909_v24 = vadd.f32 %v4908_v33, %v4907_v28  ;;  %v4910_v46 = vpop.f32.mrb[18].mxu1 }
 0x2ce   : >> { %v4911_v18 = vpop.f32.mrb[19].mxu1 }
 0x2cf   : >> { %v6780_v8 = vadd.f32 %v4909_v24, %v4845_v36  ;;  %v4912_v48 = vadd.f32 %v4911_v18, %v4910_v46 }
 0x2d1   : >> { %v4849_v50 = vpop.f32.mrb[20].mxu0  ;;  %v6782_v57 = vadd.f32 %v4912_v48, %v4848_v44 }
 0x2d2   : >> { %v4850_v42 = vpop.f32.mrb[21].mxu0 }
 0x2d3   : >> { %v4851_v63 = vadd.f32 %v4850_v42, %v4849_v50  ;;  %v4852_v17 = vpop.f32.mrb[22].mxu0  ;;  %v4913_v29 = vpop.f32.mrb[20].mxu1 }
 0x2d4   : >> { %v4853_v51 = vpop.f32.mrb[23].mxu0  ;;  %v4914_v26 = vpop.f32.mrb[21].mxu1 }
 0x2d5   : >> { %v4854_v3 = vadd.f32 %v4853_v51, %v4852_v17  ;;  %v4915_v62 = vadd.f32 %v4914_v26, %v4913_v29  ;;  %v4916_v30 = vpop.f32.mrb[22].mxu1 }
 0x2d6   : >> { %v4917_v32 = vpop.f32.mrb[23].mxu1 }
 0x2d7   : >> { %v6784_v14 = vadd.f32 %v4915_v62, %v4851_v63  ;;  %v4918_v2 = vadd.f32 %v4917_v32, %v4916_v30 }
 0x2d9   : >> { %v4855_v23 = vpop.f32.mrb[24].mxu0  ;;  %v6786_v49 = vadd.f32 %v4918_v2, %v4854_v3 }
 0x2da   : >> { %v4856_v52 = vpop.f32.mrb[25].mxu0 }
 0x2db   : >> { %v4857_v16 = vadd.f32 %v4856_v52, %v4855_v23  ;;  %v4858_v27 = vpop.f32.mrb[26].mxu0  ;;  %v4919_v7 = vpop.f32.mrb[24].mxu1 }
 0x2dc   : >> { %v4859_v6 = vpop.f32.mrb[27].mxu0  ;;  %v4920_v59 = vpop.f32.mrb[25].mxu1 }
 0x2dd   : >> { %v4860_v4 = vadd.f32 %v4859_v6, %v4858_v27  ;;  %v4921_v45 = vadd.f32 %v4920_v59, %v4919_v7  ;;  %v4922_v61 = vpop.f32.mrb[26].mxu1 }
 0x2de   : >> { %v4923_v39 = vpop.f32.mrb[27].mxu1 }
 0x2df   : >> { %v6788_v11 = vadd.f32 %v4921_v45, %v4857_v16  ;;  %v4924_v40 = vadd.f32 %v4923_v39, %v4922_v61 }
 0x2e1   : >> { %v4861_v10 = vpop.f32.mrb[28].mxu0  ;;  %v6790_v53 = vadd.f32 %v4924_v40, %v4860_v4 }
 0x2e2   : >> { %v4862_v58 = vpop.f32.mrb[29].mxu0 }
 0x2e3   : >> { %v4863_v22 = vadd.f32 %v4862_v58, %v4861_v10  ;;  %v4864_v13 = vpop.f32.mrb[30].mxu0  ;;  %v4925_v41 = vpop.f32.mrb[28].mxu1 }
 0x2e4   : >> { %v4865_v1 = vpop.f32.mrb[31].mxu0  ;;  %v4926_v60 = vpop.f32.mrb[29].mxu1 }
 0x2e5   : >> { %v4866_v56 = vadd.f32 %v4865_v1, %v4864_v13  ;;  %v4927_v34 = vadd.f32 %v4926_v60, %v4925_v41  ;;  %v4928_v15 = vpop.f32.mrb[30].mxu1 }
 0x2e6   : >> { %v4929_v38 = vpop.f32.mrb[31].mxu1 }
 0x2e7   : >> { %v6792_v9 = vadd.f32 %v4927_v34, %v4863_v22  ;;  %v4930_v47 = vadd.f32 %v4929_v38, %v4928_v15 }
 0x2e9   : >> { %v4947_v5 = vpop.f32.mrb[32].mxu0  ;;  %v6794_v0 = vadd.f32 %v4930_v47, %v4866_v56 }
 0x2ea   : >> { %v4948_v36 = vpop.f32.mrb[33].mxu0 }
 0x2eb   : >> { %v4949_v31 = vadd.f32 %v4948_v36, %v4947_v5  ;;  %v4950_v28 = vpop.f32.mrb[34].mxu0  ;;  %v5011_v20 = vpop.f32.mrb[32].mxu1 }
 0x2ec   : >> { %v4951_v33 = vpop.f32.mrb[35].mxu0  ;;  %v5012_v24 = vpop.f32.mrb[33].mxu1 }
 0x2ed   : >> { %v3452_v44 = vadd.f32 %v4949_v31, %v6764_v55  ;;  %v4952_v46 = vadd.f32 %v4951_v33, %v4950_v28  ;;  %v5013_v18 = vadd.f32 %v5012_v24, %v5011_v20  ;;  %v5014_v48 = vpop.f32.mrb[34].mxu1 }
 0x2ee   : >> { %v5015_v42 = vpop.f32.mrb[35].mxu1 }
 0x2ef   : >> { %v3455_v50 = vadd.f32 %v4952_v46, %v6766_v43  ;;  %v5016_v63 = vadd.f32 %v5015_v42, %v5014_v48  ;;  %v6798_v17 = vadd.f32 %v5013_v18, %v3452_v44 }
 0x2f1   : >> { %v4953_v29 = vpop.f32.mrb[36].mxu0  ;;  %v6800_v26 = vadd.f32 %v5016_v63, %v3455_v50 }
 0x2f2   : >> { %v4954_v51 = vpop.f32.mrb[37].mxu0 }
 0x2f3   : >> { %v4955_v3 = vadd.f32 %v4954_v51, %v4953_v29  ;;  %v4956_v62 = vpop.f32.mrb[38].mxu0  ;;  %v5017_v30 = vpop.f32.mrb[36].mxu1 }
 0x2f4   : >> { %v4957_v32 = vpop.f32.mrb[39].mxu0  ;;  %v5018_v2 = vpop.f32.mrb[37].mxu1 }
 0x2f5   : >> { %v3460_v55 = vadd.f32 %v4955_v3, %v6768_v54  ;;  %v4958_v23 = vadd.f32 %v4957_v32, %v4956_v62  ;;  %v5019_v52 = vadd.f32 %v5018_v2, %v5017_v30  ;;  %v5020_v16 = vpop.f32.mrb[38].mxu1 }
 0x2f6   : >> { %v5021_v27 = vpop.f32.mrb[39].mxu1 }
 0x2f7   : >> { %v3463_v43 = vadd.f32 %v4958_v23, %v6770_v37  ;;  %v5022_v7 = vadd.f32 %v5021_v27, %v5020_v16  ;;  %v6804_v6 = vadd.f32 %v5019_v52, %v3460_v55 }
 0x2f9   : >> { %v4959_v59 = vpop.f32.mrb[40].mxu0  ;;  %v6806_v45 = vadd.f32 %v5022_v7, %v3463_v43 }
 0x2fa   : >> { %v4960_v4 = vpop.f32.mrb[41].mxu0 }
 0x2fb   : >> { %v4961_v61 = vadd.f32 %v4960_v4, %v4959_v59  ;;  %v4962_v39 = vpop.f32.mrb[42].mxu0  ;;  %v5023_v40 = vpop.f32.mrb[40].mxu1 }
 0x2fc   : >> { %v4963_v10 = vpop.f32.mrb[43].mxu0  ;;  %v5024_v58 = vpop.f32.mrb[41].mxu1 }
 0x2fd   : >> { %v3468_v54 = vadd.f32 %v4961_v61, %v6772_v12  ;;  %v4964_v22 = vadd.f32 %v4963_v10, %v4962_v39  ;;  %v5025_v13 = vadd.f32 %v5024_v58, %v5023_v40  ;;  %v5026_v41 = vpop.f32.mrb[42].mxu1  ;;  %v4520_v61 = vld [vmem:[%s6826_s14 + $0x18] sm:$0xff]   ;;  %v4522_v10 = vld [vmem:[%s6826_s14 + $0x48] sm:$0xff]  }
 0x2fe   : >> { %v5027_v1 = vpop.f32.mrb[43].mxu1 }
 0x2ff   : >> { %v3471_v37 = vadd.f32 %v4964_v22, %v6774_v21  ;;  %v5028_v60 = vadd.f32 %v5027_v1, %v5026_v41  ;;  %v6810_v56 = vadd.f32 %v5025_v13, %v3468_v54  ;;  %v4359_v22 = vld [vmem:[%s6826_s14 + $0xc] sm:$0xff]   ;;  %v4463_v1 = vunpack.c.h.bf16 %v4520_v61 }
 0x301   : >> { %v4965_v34 = vpop.f32.mrb[44].mxu0  ;;  %v6812_v38 = vadd.f32 %v5028_v60, %v3471_v37  ;;  %v4462_v37 = vunpack.c.l.bf16 %v4520_v61  ;;  %v4371_v60 = vld [vmem:[%s6826_s14 + $0x3c] sm:$0xff]  }
 0x302   : >> { %v4966_v15 = vpop.f32.mrb[45].mxu0 }
 0x303   : >> { %v4967_v47 = vadd.f32 %v4966_v15, %v4965_v34  ;;  %v4968_v5 = vpop.f32.mrb[46].mxu0  ;;  %v5029_v36 = vpop.f32.mrb[44].mxu1 }
 0x304   : >> { %v4969_v31 = vpop.f32.mrb[47].mxu0  ;;  %v5030_v28 = vpop.f32.mrb[45].mxu1 }
 0x305   : >> { %v3476_v12 = vadd.f32 %v4967_v47, %v6776_v19  ;;  %v4970_v20 = vadd.f32 %v4969_v31, %v4968_v5  ;;  %v5031_v33 = vadd.f32 %v5030_v28, %v5029_v36  ;;  %v5032_v44 = vpop.f32.mrb[46].mxu1  ;;  %v4470_v47 = vunpack.c.l.bf16 %v4522_v10 }
 0x306   : >> { %v5033_v24 = vpop.f32.mrb[47].mxu1  ;;  %v3782_v36 = vunpack.c.l.bf16 %v4359_v22  ;;  %v3783_v31 = vunpack.c.h.bf16 %v4359_v22  ;;  %v3794_v28 = vunpack.c.l.bf16 %v4371_v60 }
 0x307   : >> { %v3479_v21 = vadd.f32 %v4970_v20, %v6778_v35  ;;  %v5034_v46 = vadd.f32 %v5033_v24, %v5032_v44  ;;  %v6816_v18 = vadd.f32 %v5031_v33, %v3476_v12  ;;  %v3795_v20 = vunpack.c.h.bf16 %v4371_v60  ;;  %v4364_v33 = vld [vmem:[%s6826_s14 + $0x20] sm:$0x1]  ;;  %v4376_v44 = vld [vmem:[%s6826_s14 + $0x50] sm:$0x1] }
 0x309   : >> { %v4971_v48 = vpop.f32.mrb[48].mxu0  ;;  %v6818_v42 = vadd.f32 %v5034_v46, %v3479_v21  ;;  %v3836_v46 = vrot.slane %v4462_v37, 1 }
 0x30a   : >> { %v4972_v50 = vpop.f32.mrb[49].mxu0 }
 0x30b   : >> { %v4973_v63 = vadd.f32 %v4972_v50, %v4971_v48  ;;  %v4974_v29 = vpop.f32.mrb[50].mxu0  ;;  %v5035_v51 = vpop.f32.mrb[48].mxu1  ;;  %v6842_v48 = vrot.slane %v4463_v1, 1  ;;  %v4361_v50 = vld [vmem:[%s6826_s14 + $0x14] sm:$0x1] }
 0x30c   : >> { %v4975_v19 = vpop.f32.mrb[51].mxu0  ;;  %v5036_v62 = vpop.f32.mrb[49].mxu1 }
 0x30d   : >> { %v3484_v3 = vadd.f32 %v4973_v63, %v6780_v8  ;;  %v4976_v30 = vadd.f32 %v4975_v19, %v4974_v29  ;;  %v5037_v32 = vadd.f32 %v5036_v62, %v5035_v51  ;;  %v5038_v35 = vpop.f32.mrb[50].mxu1  ;;  %v3856_v51 = vrot.slane %v4470_v47, 1 }
 0x30e   : >> { %v5039_v2 = vpop.f32.mrb[51].mxu1 }
 0x30f   : >> { %v3487_v55 = vadd.f32 %v4976_v30, %v6782_v57  ;;  %v5040_v23 = vadd.f32 %v5039_v2, %v5038_v35  ;;  %v6823_v52 = vadd.f32 %v5037_v32, %v3484_v3  ;;  %v4373_v3 = vld [vmem:[%s6826_s14 + $0x44] sm:$0x1]  ;;  %v3831_v35 = vrot.slane %v3782_v36, 1  ;;  %v4521_v2 = vld [vmem:[%s6826_s14 + $0x30] sm:$0xff]  }
 0x311   : >> { %v4977_v16 = vpop.f32.mrb[52].mxu0  ;;  %v6828_v27 = vadd.f32 %v5040_v23, %v3487_v55  ;;  %v6849_v55 = vrot.slane %v3783_v31, 1 }
 0x312   : >> { %v4978_v43 = vpop.f32.mrb[53].mxu0 }
 0x313   : >> { %v4979_v8 = vadd.f32 %v4978_v43, %v4977_v16  ;;  %v4980_v7 = vpop.f32.mrb[54].mxu0  ;;  %v5041_v59 = vpop.f32.mrb[52].mxu1  ;;  %v3851_v43 = vrot.slane %v3794_v28, 1  ;;  %v6867_v37 = vsel %vm3830_vm11, %v3831_v35, %v6849_v55 }
 0x314   : >> { %v4981_v4 = vpop.f32.mrb[55].mxu0  ;;  %v5042_v39 = vpop.f32.mrb[53].mxu1 }
 0x315   : >> { %v3492_v57 = vadd.f32 %v4979_v8, %v6784_v14  ;;  %v4982_v40 = vadd.f32 %v4981_v4, %v4980_v7  ;;  %v5043_v54 = vadd.f32 %v5042_v39, %v5041_v59  ;;  %v5044_v58 = vpop.f32.mrb[54].mxu1  ;;  %v4471_v14 = vunpack.c.h.bf16 %v4522_v10  ;;  %v4523_v59 = vld [vmem:[%s6826_s14 + $0x60] sm:$0xff]  }
 0x316   : >> { %v5045_v41 = vpop.f32.mrb[55].mxu1  ;;  %v3852_v8 = vrot.slane %v3795_v20, 1  ;;  %v3787_v7 = vunpack.c.l.bf16 %v4364_v33  ;;  %v3784_v39 = vunpack.c.l.bf16 %v4361_v50  ;;  %v4466_v10 = vunpack.c.l.bf16 %v4521_v2 }
 0x317   : >> { %v3495_v13 = vadd.f32 %v4982_v40, %v6786_v49  ;;  %v5046_v34 = vadd.f32 %v5045_v41, %v5044_v58  ;;  %v6836_v15 = vadd.f32 %v5043_v54, %v3492_v57  ;;  %v6845_v19 = vrot.slane %v4471_v14, 1  ;;  %v4365_v58 = vld [vmem:[%s6826_s14 + $0x24] sm:$0xff]  }
 0x318   : >> { %v3799_v57 = vunpack.c.l.bf16 %v4376_v44  ;;  %v4467_v54 = vunpack.c.h.bf16 %v4521_v2  ;;  %v6859_v41 = vsel %vm3830_vm11, %v3836_v46, %v6842_v48  ;;  %v4474_v1 = vunpack.c.l.bf16 %v4523_v59  ;;  %v4377_v44 = vld [vmem:[%s6826_s14 + $0x54] sm:$0xff]  }
 0x319   : >> { %v4983_v5 = vpop.f32.mrb[56].mxu0  ;;  %v6839_v49 = vadd.f32 %v5046_v34, %v3495_v13  ;;  %v6870_v34 = vsel %vm3830_vm11, %v3851_v43, %v3852_v8  ;;  %v3839_v47 = vrot.slane %v3787_v7, 1  ;;  %v4475_v14 = vunpack.c.h.bf16 %v4523_v59 }
 0x31a   : >> { %v4984_v12 = vpop.f32.mrb[57].mxu0  ;;  %v3859_v28 = vrot.slane %v3799_v57, 1  ;;  %v3788_v20 = vunpack.c.l.bf16 %v4365_v58  ;;  %v3789_v33 = vunpack.c.h.bf16 %v4365_v58  ;;  %v3834_v50 = vrot.slane %v3784_v39, 1 }
 0x31b   : >> { %v4985_v21 = vadd.f32 %v4984_v12, %v4983_v5  ;;  %v4986_v24 = vpop.f32.mrb[58].mxu0  ;;  %v5047_v63 = vpop.f32.mrb[56].mxu1  ;;  %v4370_v5 = vld [vmem:[%s6826_s14 + $0x38] sm:$0x1]  ;;  %v3800_v43 = vunpack.c.l.bf16 %v4377_v44  ;;  %v3801_v39 = vunpack.c.h.bf16 %v4377_v44 }
 0x31c   : >> { %v4987_v29 = vpop.f32.mrb[59].mxu0  ;;  %v5048_v30 = vpop.f32.mrb[57].mxu1  ;;  %v3793_v35 = vunpack.c.l.bf16 %v4370_v5  ;;  %v6879_v57 = vrot.slane %v3789_v33, 1  ;;  %v3835_v58 = vsel %vm3830_vm11, %v6849_v55, %v3834_v50  ;;  %v6916_v55 = vld [vmem:[%s7028_s6] ss:$0 sm:$0xff] }
 0x31d   : >> { %v3500_v62 = vadd.f32 %v4985_v21, %v6788_v11  ;;  %v4988_v32 = vadd.f32 %v4987_v29, %v4986_v24  ;;  %v5049_v23 = vadd.f32 %v5048_v30, %v5047_v63  ;;  %v5050_v16 = vpop.f32.mrb[58].mxu1  ;;  %v3796_v11 = vunpack.c.l.bf16 %v4373_v3  ;;  %v4382_v21 = vld [vmem:[%s6826_s14 + $0x68] sm:$0x1] }
 0x31e   : >> { %v5051_v61 = vpop.f32.mrb[59].mxu1  ;;  %v3846_v29 = vrot.slane %v4466_v10, 1  ;;  %v3805_v7 = vunpack.c.l.bf16 %v4382_v21  ;;  %v6890_v10 = vsel %vm3830_vm11, %v6845_v19, %v3859_v28  ;;  %v6909_v5 = vrot.slane %v3800_v43, 1 }
 0x31f   : >> { %v3503_v4 = vadd.f32 %v4988_v32, %v6790_v53  ;;  %v5052_v40 = vadd.f32 %v5051_v61, %v5050_v16  ;;  %v6855_v22 = vadd.f32 %v5049_v23, %v3500_v62  ;;  %v6863_v53 = vsel %vm3830_vm11, %v3856_v51, %v6845_v19 }
 0x320   : >> { %v3854_v63 = vrot.slane %v3796_v11, 1  ;;  %v3847_v51 = vrot.slane %v4467_v54, 1  ;;  %v3866_v32 = vrot.slane %v4474_v1, 1  ;;  %v3867_v16 = vrot.slane %v4475_v14, 1  ;;  %v6903_v14 = vld [vmem:[%s6826_s14 + $0x2c] sm:$0x1] }
 0x321   : >> { %v4989_v13 = vpop.f32.mrb[60].mxu0  ;;  %v6873_v36 = vadd.f32 %v5052_v40, %v3503_v4  ;;  %v3841_v61 = vrot.slane %v3788_v20, 1  ;;  %v3840_v40 = vsel %vm3830_vm11, %v6842_v48, %v3839_v47  ;;  %v6906_v48 = vld [vmem:[%s6826_s14 + $0x5c] sm:$0x1]  ;;  %v6926_v33 = vrot.slane %v3801_v39, 1 }
 0x322   : >> { %v4990_v60 = vpop.f32.mrb[61].mxu0  ;;  %v6900_v1 = vsel %vm3830_vm11, %v3846_v29, %v3847_v51  ;;  %v6920_v20 = vsel %vm3830_vm11, %v3866_v32, %v3867_v16  ;;  %v3790_v50 = vunpack.c.l.bf16 %v6903_v14 }
 0x323   : >> { %v4991_v31 = vadd.f32 %v4990_v60, %v4989_v13  ;;  %v4992_v12 = vpop.f32.mrb[62].mxu0  ;;  %v5053_v24 = vpop.f32.mrb[60].mxu1  ;;  %v6897_v13 = vsel %vm3830_vm11, %v3852_v8, %v3854_v63  ;;  %v3849_v60 = vrot.slane %v3793_v35, 1 }
 0x324   : >> { %v4993_v46 = vpop.f32.mrb[63].mxu0  ;;  %v5054_v62 = vpop.f32.mrb[61].mxu1 }
 0x325   : >> { %v3508_v3 = vadd.f32 %v4991_v31, %v6792_v9  ;;  %v4994_v30 = vadd.f32 %v4993_v46, %v4992_v12  ;;  %v5055_v2 = vadd.f32 %v5054_v62, %v5053_v24  ;;  %v5056_v23 = vpop.f32.mrb[62].mxu1  ;;  %v6884_v9 = vld [vmem:[%s7027_s5] ss:$0 sm:$0xff]  ;;  %v3869_v12 = vrot.slane %v3805_v7, 1 }
 0x326   : >> { %v5057_v4 = vpop.f32.mrb[63].mxu1 }
 0x327   : >> { %v3511_v59 = vadd.f32 %v4994_v30, %v6794_v0  ;;  %v5058_v11 = vadd.f32 %v5057_v4, %v5056_v23  ;;  %v6892_v0 = vadd.f32 %v5055_v2, %v3508_v3  ;;  %v6936_v30 = vsel %vm3830_vm11, %v3847_v51, %v3849_v60 }
 0x328   : >> { %v6942_v23 = vsel %vm3830_vm11, %v3867_v16, %v3869_v12 }
 0x329   : >> { %v5125_v54 = vpop.f32.mrb[64].mxu0  ;;  %v6911_v31 = vadd.f32 %v5058_v11, %v3511_v59 }
 0x32a   : >> { %v3654_v19 = vadd.f32 %v5125_v54, %v6804_v6  ;;  %v3645_v47 = vpop.f32.mrb[65].mxu0  ;;  %v6924_v6 = vsel %vm3830_vm11, %v3841_v61, %v6879_v57 }
 0x32b   : >> { %v3646_v8 = vadd.f32 %v3645_v47, %v6798_v17  ;;  %v5126_v28 = vpop.f32.mrb[66].mxu0  ;;  %v5133_v21 = vpop.f32.mrb[64].mxu1  ;;  %v3802_v17 = vunpack.c.l.bf16 %v6906_v48 }
 0x32c   : >> { %v3717_v44 = vmul.f32 %v6884_v9, %v3654_v19  ;;  %v3657_v24 = vadd.f32 %v5126_v28, %v6806_v45  ;;  %v3648_v46 = vpop.f32.mrb[67].mxu0  ;;  %v3686_v63 = vadd.f32 %v5133_v21, %v6836_v15  ;;  %v3677_v3 = vpop.f32.mrb[65].mxu1 }
 0x32d   : >> { %v3715_v29 = vmul.f32 %v6884_v9, %v3646_v8  ;;  %v3649_v62 = vadd.f32 %v3648_v46, %v6800_v26  ;;  %v3678_v35 = vadd.f32 %v3677_v3, %v6823_v52  ;;  %v5134_v2 = vpop.f32.mrb[66].mxu1 }
 0x32e   : >> { %v3740_v32 = vadd.f32 %v6916_v55, %v3717_v44  ;;  %v3718_v45 = vmul.f32 %v6884_v9, %v3657_v24  ;;  %v3725_v15 = vmul.f32 %v6884_v9, %v3686_v63  ;;  %v3689_v26 = vadd.f32 %v5134_v2, %v6839_v49  ;;  %v3680_v7 = vpop.f32.mrb[67].mxu1 }
 0x32f   : >> { %v3738_v43 = vadd.f32 %v6916_v55, %v3715_v29  ;;  %v3716_v51 = vmul.f32 %v6884_v9, %v3649_v62  ;;  %v3723_v52 = vmul.f32 %v6884_v9, %v3678_v35  ;;  %v3681_v61 = vadd.f32 %v3680_v7, %v6828_v27 }
 0x330   : >> { %v3889_v59 = vadd.f32 %v6859_v41, %v3740_v32  ;;  %v3741_v4 = vadd.f32 %v6916_v55, %v3718_v45  ;;  %v3748_v16 = vadd.f32 %v6916_v55, %v3725_v15  ;;  %v3726_v11 = vmul.f32 %v6884_v9, %v3689_v26 }
 0x331   : >> { %v3887_v39 = vadd.f32 %v6867_v37, %v3738_v43  ;;  %v3739_v54 = vadd.f32 %v6916_v55, %v3716_v51  ;;  %v5129_v49 = vpop.f32.mrb[68].mxu0  ;;  %v3746_v19 = vadd.f32 %v6916_v55, %v3723_v52  ;;  %v3724_v41 = vmul.f32 %v6884_v9, %v3681_v61 }
 0x332   : >> { %v3905_v60 = vmax.f32 %v3889_v59, 0.0  ;;  %v3890_v47 = vadd.f32 %v3840_v40, %v3741_v4  ;;  %v3661_v12 = vpop.f32.mrb[69].mxu0  ;;  %v3897_v27 = vadd.f32 %v6863_v53, %v3748_v16  ;;  %v3749_v28 = vadd.f32 %v6916_v55, %v3726_v11 }
 0x333   : >> { %v3903_v8 = vmax.f32 %v3887_v39, 0.0  ;;  %v3888_v37 = vadd.f32 %v3835_v58, %v3739_v54  ;;  %v5130_v44 = vpop.f32.mrb[70].mxu0  ;;  %v3895_v21 = vadd.f32 %v6870_v34, %v3746_v19  ;;  %v3747_v46 = vadd.f32 %v6916_v55, %v3724_v41  ;;  %v5137_v40 = vpop.f32.mrb[68].mxu1 }
 0x334   : >> { %v3906_v24 = vmax.f32 %v3890_v47, 0.0  ;;  %v3670_v63 = vadd.f32 %v5129_v49, %v6816_v18  ;;  %v3664_v29 = vpop.f32.mrb[71].mxu0  ;;  %v3913_v3 = vmax.f32 %v3897_v27, 0.0  ;;  %v3898_v53 = vadd.f32 %v6890_v10, %v3749_v28  ;;  %v3693_v58 = vpop.f32.mrb[69].mxu1 }
 0x335   : >> { %v3904_v62 = vmax.f32 %v3888_v37, 0.0  ;;  %v3702_v32 = vadd.f32 %v5137_v40, %v6892_v0  ;;  %v3911_v35 = vmax.f32 %v3895_v21, 0.0  ;;  %v3896_v45 = vadd.f32 %v6897_v13, %v3747_v46  ;;  %v5138_v18 = vpop.f32.mrb[70].mxu1 }
 0x336   : >> { %v4484_v34 = vpack.c.bf16 %v3906_v24, %v3905_v60  ;;  %v3721_v2 = vmul.f32 %v6884_v9, %v3670_v63  ;;  %v3914_v15 = vmax.f32 %v3898_v53, 0.0  ;;  %v3662_v51 = vadd.f32 %v3661_v12, %v6810_v56  ;;  %v3696_v10 = vpop.f32.mrb[71].mxu1 }
 0x337   : >> { %v4479_v43 = vpack.c.bf16 %v3904_v62, %v3903_v8  ;;  %v3729_v26 = vmul.f32 %v6884_v9, %v3702_v32  ;;  %v3912_v7 = vmax.f32 %v3896_v45, 0.0  ;;  %v3694_v59 = vadd.f32 %v3693_v58, %v6855_v22 }
 0x338   : >> { %4524 = vst [vmem:[%s6965_s22 + $0x8] sm:$0xff] %v4484_v34   ;;  %v3744_v0 = vadd.f32 %v6916_v55, %v3721_v2  ;;  %v3673_v13 = vadd.f32 %v5130_v44, %v6818_v42  ;;  %v4504_v52 = vpack.c.bf16 %v3914_v15, %v3913_v3  ;;  %v3719_v61 = vmul.f32 %v6884_v9, %v3662_v51 }
 0x339   : >> { %4480 = vst [vmem:[%s6965_s22] sm:$0xff] %v4479_v43   ;;  %v3752_v4 = vadd.f32 %v6916_v55, %v3729_v26  ;;  %v3705_v16 = vadd.f32 %v5138_v18, %v6911_v31  ;;  %v4499_v56 = vpack.c.bf16 %v3912_v7, %v3911_v35  ;;  %v3727_v39 = vmul.f32 %v6884_v9, %v3694_v59 }
 0x33a   : >> { %v3722_v11 = vmul.f32 %v6884_v9, %v3673_v13  ;;  %v3844_v54 = vrot.slane %v3790_v50, 1  ;;  %4528 = vst [vmem:[%s6965_s22 + $0x28] sm:$0xff] %v4504_v52   ;;  %v3742_v22 = vadd.f32 %v6916_v55, %v3719_v61  ;;  %v3665_v49 = vadd.f32 %v3664_v29, %v6812_v38 }
 0x33b   : >> { %v3730_v42 = vmul.f32 %v6884_v9, %v3705_v16  ;;  %v3864_v60 = vrot.slane %v3802_v17, 1  ;;  %4527 = vst [vmem:[%s6965_s22 + $0x20] sm:$0xff] %v4499_v56   ;;  %v3893_v31 = vadd.f32 %v6900_v1, %v3744_v0  ;;  %v3750_v19 = vadd.f32 %v6916_v55, %v3727_v39 }
 0x33c   : >> { %v3745_v47 = vadd.f32 %v6916_v55, %v3722_v11  ;;  %v3697_v14 = vadd.f32 %v3696_v10, %v6873_v36  ;;  %v3901_v50 = vadd.f32 %v6920_v20, %v3752_v4  ;;  %v3863_v41 = vsel %vm3830_vm11, %v6909_v5, %v6926_v33 }
 0x33d   : >> { %v3753_v38 = vadd.f32 %v6916_v55, %v3730_v42  ;;  %v3720_v48 = vmul.f32 %v6884_v9, %v3665_v49  ;;  %v3845_v1 = vsel %vm3830_vm11, %v6879_v57, %v3844_v54  ;;  %v3891_v27 = vadd.f32 %v6924_v6, %v3742_v22 }
 0x33e   : >> { %v3894_v17 = vadd.f32 %v6936_v30, %v3745_v47  ;;  %v3728_v12 = vmul.f32 %v6884_v9, %v3697_v14  ;;  %v3865_v5 = vsel %vm3830_vm11, %v6926_v33, %v3864_v60  ;;  %v3909_v8 = vmax.f32 %v3893_v31, 0.0 }
 0x33f   : >> { %v3902_v36 = vadd.f32 %v6942_v23, %v3753_v38  ;;  %v3743_v20 = vadd.f32 %v6916_v55, %v3720_v48  ;;  %v3899_v28 = vadd.f32 %v3863_v41, %v3750_v19  ;;  %v3917_v57 = vmax.f32 %v3901_v50, 0.0 }
 0x340   : >> { %v3910_v37 = vmax.f32 %v3894_v17, 0.0  ;;  %v3751_v30 = vadd.f32 %v6916_v55, %v3728_v12  ;;  %v3907_v23 = vmax.f32 %v3891_v27, 0.0 }
 0x341   : >> { %v3918_v9 = vmax.f32 %v3902_v36, 0.0  ;;  %v3892_v44 = vadd.f32 %v3845_v1, %v3743_v20  ;;  %v3915_v63 = vmax.f32 %v3899_v28, 0.0 }
 0x342   : >> { %v4494_v6 = vpack.c.bf16 %v3910_v37, %v3909_v8  ;;  %v3900_v21 = vadd.f32 %v3865_v5, %v3751_v30  ;;  %2096 = sbr.rel (!%p2094_p5) target bundleno = 436 (0x1b4), region = 110 }
 0x343   : >> { %v4514_v24 = vpack.c.bf16 %v3918_v9, %v3917_v57  ;;  %v3908_v46 = vmax.f32 %v3892_v44, 0.0 }
 0x344   : >> { %4526 = vst [vmem:[%s6965_s22 + $0x18] sm:$0xff] %v4494_v6   ;;  %v3916_v40 = vmax.f32 %v3900_v21, 0.0 }
 0x345   : >> { %4530 = vst [vmem:[%s6965_s22 + $0x38] sm:$0xff] %v4514_v24   ;;  %v4489_v33 = vpack.c.bf16 %v3908_v46, %v3907_v23 }
 0x346   : >> { %v4509_v29 = vpack.c.bf16 %v3916_v40, %v3915_v63 }
 0x347   : >> { %4525 = vst [vmem:[%s6965_s22 + $0x10] sm:$0xff] %v4489_v33  }
 0x348   : >> { %4529 = vst [vmem:[%s6965_s22 + $0x30] sm:$0xff] %v4509_v29  }
 0x349 PF: > { %s17_s24 = sadd.s32 1, %s5375_s24  }
 0x34a   : > { %p14_p6 = scmp.ge.s32.totalorder %s17_s24, 4  }
 0x34c   :  { %16 = sbr.rel (!%p14_p6) target bundleno = 1 (0x1), region = 121 }

</bundles_post_ra>
